<compile_context>
chip_gen: v7x
topology: tpu7x:2x2x1
jax: 0.10.0
libtpu: 0.0.40
codegen_flags: <defaults>
</compile_context>

<pallas_src>
import functools

import jax
import jax.numpy as jnp
from jax import lax
from jax.experimental import pallas as pl
from jax.experimental.pallas import tpu as pltpu

LANE = 128  # TPU lane width: pad channel-like dims up to a multiple of this.


def _basic_block_kernel(*refs, has_ds):
    """One batch element per grid step; everything lane-dense, matmuls only.

    xcol_ref: (1, H*W, K25)  bf16  5x5-neighbourhood im2col of x (K padded)
    w1s_ref:  (K25, 9*CP)    bf16  conv1 weights at the 9 offsets conv2 needs
    b1t_ref:  (1, 9*CP)      f32   folded bn1 bias, tiled per tap
    mask_ref: (H*W, 9*CP)    bf16  0/1 spatial-validity mask per tap
    w2s_ref:  (9*CP, CP)     bf16  conv2 weights stacked over taps
    b2_ref:   (1, CP)        f32   folded bn2 bias
    has_ds:   wd_ref (K25, CP) bf16 (1x1 downsample at centre-tap rows),
              bd_ref (1, CP) f32
    else:     xid_ref (1, H*W, CP) f32 (identity shortcut, exact f32)
    out_ref:  (1, H*W, CP)   f32
    """
    if has_ds:
        (xcol_ref, w1s_ref, b1t_ref, mask_ref, w2s_ref, b2_ref,
         wd_ref, bd_ref, out_ref) = refs
    else:
        (xcol_ref, w1s_ref, b1t_ref, mask_ref, w2s_ref, b2_ref,
         xid_ref, out_ref) = refs

    xcol = xcol_ref[0]                                     # (H*W, K25) bf16

    # conv1 + bn1 + relu, evaluated at all 9 spatial offsets conv2 reads.
    t = jnp.dot(xcol, w1s_ref[...], preferred_element_type=jnp.float32)
    t = jnp.maximum(t + b1t_ref[...], 0.0)
    t = (t * mask_ref[...]).astype(jnp.bfloat16)           # (H*W, 9*CP)

    # conv2 + bn2 as a single stacked-tap matmul (K = 9*CP).
    y2 = jnp.dot(t, w2s_ref[...], preferred_element_type=jnp.float32)
    y2 = y2 + b2_ref[...]

    # Shortcut: 1x1 conv (+ folded bn) when Cin != Cout, else exact identity.
    if has_ds:
        ident = jnp.dot(xcol, wd_ref[...],
                        preferred_element_type=jnp.float32) + bd_ref[...]
    else:
        ident = xid_ref[0]

    out_ref[0] = jnp.maximum(y2 + ident, 0.0)


def basic_block_pallas(x_nchw, prep):
    """x_nchw: (N, Cin, H, W) float32. Returns (N, Cout, H, W) float32."""
    N, Cin, H, W = x_nchw.shape
    Cout = prep["b1"].shape[-1]
    has_ds = prep["wd"] is not None
    HW = H * W
    CP = pl.cdiv(Cout, LANE) * LANE          # lane-padded channel width
    K25 = pl.cdiv(25 * Cin, LANE) * LANE     # lane-padded im2col depth

    # ---- lane-dense layout plumbing (pure XLA, outside the kernel) ----------
    x_nhwc = jnp.transpose(x_nchw, (0, 2, 3, 1))
    xp2 = jnp.pad(x_nhwc, ((0, 0), (2, 2), (2, 2), (0, 0)))
    cols = [xp2[:, rh:rh + H, rw:rw + W, :]
            for rh in range(5) for rw in range(5)]
    x_col = jnp.concatenate(cols, axis=-1).reshape(N, HW, 25 * Cin)
    x_col = jnp.pad(x_col, ((0, 0), (0, 0), (0, K25 - 25 * Cin)))
    x_col = x_col.astype(jnp.bfloat16)

    # conv1 weights placed at the 9 offsets (dh, dw) conv2 reads:
    # column block tap*CP:(tap+1)*CP of w1s computes conv1 output at (h+dh, w+dw).
    w1_33 = prep["w1"].reshape(3, 3, Cin, Cout)
    w1_cols = []
    for dh in (-1, 0, 1):
        for dw in (-1, 0, 1):
            w5 = jnp.pad(w1_33,
                         ((dh + 1, 1 - dh), (dw + 1, 1 - dw), (0, 0), (0, 0)))
            w5 = w5.reshape(25 * Cin, Cout)
            w5 = jnp.pad(w5, ((0, K25 - 25 * Cin), (0, CP - Cout)))
            w1_cols.append(w5)
    w1s = jnp.concatenate(w1_cols, axis=1)                 # (K25, 9*CP) bf16

    b1_p = jnp.pad(prep["b1"], ((0, 0), (0, CP - Cout)))   # (1, CP) f32
    b1t = jnp.tile(b1_p, (1, 9))                           # (1, 9*CP)

    # Spatial-validity mask per tap: 1 iff (h+dh, w+dw) is inside the image.
    hh = jnp.arange(H)
    ww = jnp.arange(W)
    mask_cols = []
    for dh in (-1, 0, 1):
        for dw in (-1, 0, 1):
            mh = (hh + dh >= 0) & (hh + dh < H)
            mw = (ww + dw >= 0) & (ww + dw < W)
            m = (mh[:, None] & mw[None, :]).reshape(HW, 1)
            mask_cols.append(jnp.broadcast_to(m, (HW, CP)))
    maskt = jnp.concatenate(mask_cols, axis=1).astype(jnp.bfloat16)

    # conv2 weights stacked over taps -> one K = 9*CP matmul.
    w2s = jnp.pad(prep["w2"],
                  ((0, 0), (0, CP - Cout), (0, CP - Cout))).reshape(9 * CP, CP)
    b2_p = jnp.pad(prep["b2"], ((0, 0), (0, CP - Cout)))

    def const_spec(shape):
        return pl.BlockSpec(shape, lambda n: (0,) * len(shape))

    in_specs = [
        pl.BlockSpec((1, HW, K25), lambda n: (n, 0, 0)),
        const_spec((K25, 9 * CP)),
        const_spec((1, 9 * CP)),
        const_spec((HW, 9 * CP)),
        const_spec((9 * CP, CP)),
        const_spec((1, CP)),
    ]
    args = [x_col, w1s, b1t, maskt, w2s, b2_p]
    blk_bytes = (HW * K25 * 2 + K25 * 9 * CP * 2 + 9 * CP * 4
                 + HW * 9 * CP * 2 + 9 * CP * CP * 2 + CP * 4 + HW * CP * 4)

    if has_ds:
        # 1x1 downsample weight embedded at the centre-tap rows of the im2col.
        wd_k = jnp.zeros((K25, CP), jnp.bfloat16)
        wd_k = wd_k.at[12 * Cin:13 * Cin, :Cout].set(prep["wd"])
        bd_p = jnp.pad(prep["bd"], ((0, 0), (0, CP - Cout)))
        in_specs += [const_spec((K25, CP)), const_spec((1, CP))]
        args += [wd_k, bd_p]
        blk_bytes += K25 * CP * 2 + CP * 4
    else:
        x_id = jnp.pad(x_nhwc.reshape(N, HW, Cin),
                       ((0, 0), (0, 0), (0, CP - Cin)))    # f32 exact identity
        in_specs += [pl.BlockSpec((1, HW, CP), lambda n: (n, 0, 0))]
        args += [x_id]
        blk_bytes += HW * CP * 4

    kernel = functools.partial(_basic_block_kernel, has_ds=has_ds)

    # VMEM budget: double-buffered blocks + the (HW, 9*CP) f32 + bf16
    # intermediate the compiler keeps in VMEM, plus headroom.
    vmem_limit = 2 * blk_bytes + HW * 9 * CP * 6 + (4 << 20)

    out_flat = pl.pallas_call(
        kernel,
        out_shape=jax.ShapeDtypeStruct((N, HW, CP), jnp.float32),
        grid_spec=pltpu.PrefetchScalarGridSpec(
            num_scalar_prefetch=0,
            grid=(N,),
            in_specs=in_specs,
            out_specs=pl.BlockSpec((1, HW, CP), lambda n: (n, 0, 0)),
        ),
        compiler_params=pltpu.CompilerParams(
            dimension_semantics=("parallel",),
            vmem_limit_bytes=int(vmem_limit)),
    )(*args)

    out = out_flat[:, :, :Cout].reshape(N, H, W, Cout)
    return jnp.transpose(out, (0, 3, 1, 2))


# --------------------------- parameter construction --------------------------

def _fold_bn(conv_w, conv_b, gamma, beta, mean, var, eps=1e-5):
    """Fold conv bias + eval-mode BatchNorm into the weight and a bias."""
    scale = gamma / jnp.sqrt(var + eps)                 # (Cout,)
    w = conv_w * scale                                  # scale output channels
    b = scale * (conv_b - mean) + beta
    return w, b.reshape(1, -1).astype(jnp.float32)


def make_params(key, Cin, Cout):
    ks = jax.random.split(key, 16)
    u = lambda k, shape, s=0.2: jax.random.uniform(k, shape, jnp.float32, -s, s)

    w1 = u(ks[0], (3, 3, Cin, Cout))                    # HWIO
    cb1 = u(ks[1], (Cout,))
    g1, be1 = u(ks[2], (Cout,)) + 1.0, u(ks[3], (Cout,))
    m1 = u(ks[4], (Cout,))
    v1 = jax.random.uniform(ks[5], (Cout,), jnp.float32, 0.5, 1.5)

    w2 = u(ks[6], (3, 3, Cout, Cout))
    cb2 = u(ks[7], (Cout,))
    g2, be2 = u(ks[8], (Cout,)) + 1.0, u(ks[9], (Cout,))
    m2 = u(ks[10], (Cout,))
    v2 = jax.random.uniform(ks[11], (Cout,), jnp.float32, 0.5, 1.5)

    w1f, b1 = _fold_bn(w1, cb1, g1, be1, m1, v1)
    w2f, b2 = _fold_bn(w2, cb2, g2, be2, m2, v2)

    prep = dict(
        w1=w1f.reshape(9, Cin, Cout).astype(jnp.bfloat16), b1=b1,
        w2=w2f.reshape(9, Cout, Cout).astype(jnp.bfloat16), b2=b2,
        wd=None, bd=None)

    if Cin != Cout:  # stride == 1 here, so downsample iff Cin != Cout
        wd = u(ks[12], (Cin, Cout))
        cbd = u(ks[13], (Cout,))
        gd, bed = u(ks[14], (Cout,)) + 1.0, u(ks[15], (Cout,))
        md = jnp.zeros((Cout,)) + 0.05
        vd = jnp.ones((Cout,)) * 1.1
        wdf, bd = _fold_bn(wd, cbd, gd, bed, md, vd)
        prep["wd"] = wdf.astype(jnp.bfloat16)
        prep["bd"] = bd
    return prep


# ------------------------------- JAX reference -------------------------------

def basic_block_ref(x_nchw, prep):
    """Pure-JAX reference using the same folded, bf16-cast parameters."""
    N, Cin, H, W = x_nchw.shape
    Cout = prep["b1"].shape[-1]
    x = jnp.transpose(x_nchw, (0, 2, 3, 1))             # NHWC f32
    xb = x.astype(jnp.bfloat16)

    def conv3x3(inp, w):
        return lax.conv_general_dilated(
            inp, w, window_strides=(1, 1), padding=((1, 1), (1, 1)),
            dimension_numbers=("NHWC", "HWIO", "NHWC"),
            preferred_element_type=jnp.float32)

    w1 = prep["w1"].reshape(3, 3, Cin, Cout)
    w2 = prep["w2"].reshape(3, 3, Cout, Cout)
    y1 = jnp.maximum(conv3x3(xb, w1) + prep["b1"][0], 0.0)
    y2 = conv3x3(y1.astype(jnp.bfloat16), w2) + prep["b2"][0]
    if prep["wd"] is not None:
        ident = jnp.einsum("nhwc,cd->nhwd", xb, prep["wd"],
                           preferred_element_type=jnp.float32) + prep["bd"][0]
    else:
        ident = x
    out = jnp.maximum(y2 + ident, 0.0)
    return jnp.transpose(out, (0, 3, 1, 2))


if __name__ == "__main__":
    key = jax.random.PRNGKey(0)
    k1, k2, k3, k4 = jax.random.split(key, 4)

    # Case 1: Cin != Cout  ->  downsample (1x1 conv + BN) shortcut path.
    N, Cin, Cout, H, W = 2, 4, 8, 16, 16
    x = jax.random.normal(k1, (N, Cin, H, W), jnp.float32)
    prep = make_params(k2, Cin, Cout)
    out = jax.block_until_ready(basic_block_pallas(x, prep))
    ref = jax.block_until_ready(basic_block_ref(x, prep))
    assert out.shape == (N, Cout, H, W), out.shape
    assert jnp.allclose(out, ref, rtol=1e-3, atol=1e-3), \
        float(jnp.max(jnp.abs(out - ref)))

    # Case 2: Cin == Cout  ->  pure identity shortcut (exact f32 add).
    x2 = jax.random.normal(k3, (N, Cout, H, W), jnp.float32)
    prep2 = make_params(k4, Cout, Cout)
    out2 = jax.block_until_ready(basic_block_pallas(x2, prep2))
    ref2 = jax.block_until_ready(basic_block_ref(x2, prep2))
    assert out2.shape == (N, Cout, H, W), out2.shape
    assert jnp.allclose(out2, ref2, rtol=1e-3, atol=1e-3), \
        float(jnp.max(jnp.abs(out2 - ref2)))

    print("KERNEL_OK")
</pallas_src>

<mosaic_0001>
module attributes {stable_mosaic.version = 11 : i64} {
  func.func @_basic_block_kernel(%arg0: i32, %arg1: memref<1x256x128xbf16, #tpu.memory_space<vmem>>, %arg2: memref<128x1152xbf16, #tpu.memory_space<vmem>>, %arg3: memref<1x1152xf32, #tpu.memory_space<vmem>>, %arg4: memref<256x1152xbf16, #tpu.memory_space<vmem>>, %arg5: memref<1152x128xbf16, #tpu.memory_space<vmem>>, %arg6: memref<1x128xf32, #tpu.memory_space<vmem>>, %arg7: memref<128x128xbf16, #tpu.memory_space<vmem>>, %arg8: memref<1x128xf32, #tpu.memory_space<vmem>>, %arg9: memref<1x256x128xf32, #tpu.memory_space<vmem>>) attributes {dimension_semantics = [#tpu.dimension_semantics<parallel>], iteration_bounds = array<i64: 2>, scalar_prefetch = 0 : i64, scratch_operands = 0 : i64, tpu.core_type = #tpu.core_type<tc>, window_params = [{transform_indices = @transform_0, window_bounds = array<i64: 1, 256, 128>}, {pipeline_mode = #tpu.pipeline_mode<synchronous>, transform_indices = @transform_1, window_bounds = array<i64: 128, 1152>}, {pipeline_mode = #tpu.pipeline_mode<synchronous>, transform_indices = @transform_2, window_bounds = array<i64: 1, 1152>}, {pipeline_mode = #tpu.pipeline_mode<synchronous>, transform_indices = @transform_3, window_bounds = array<i64: 256, 1152>}, {pipeline_mode = #tpu.pipeline_mode<synchronous>, transform_indices = @transform_4, window_bounds = array<i64: 1152, 128>}, {pipeline_mode = #tpu.pipeline_mode<synchronous>, transform_indices = @transform_5, window_bounds = array<i64: 1, 128>}, {pipeline_mode = #tpu.pipeline_mode<synchronous>, transform_indices = @transform_6, window_bounds = array<i64: 128, 128>}, {pipeline_mode = #tpu.pipeline_mode<synchronous>, transform_indices = @transform_7, window_bounds = array<i64: 1, 128>}, {transform_indices = @transform_8, window_bounds = array<i64: 1, 256, 128>}]} {
    %c0 = arith.constant 0 : index
    %c0_0 = arith.constant 0 : index
    %c0_1 = arith.constant 0 : index
    %0 = vector.load %arg1[%c0, %c0_0, %c0_1] : memref<1x256x128xbf16, #tpu.memory_space<vmem>>, vector<1x256x128xbf16>
    %1 = vector.shape_cast %0 : vector<1x256x128xbf16> to vector<256x128xbf16>
    %c0_2 = arith.constant 0 : index
    %c0_3 = arith.constant 0 : index
    %2 = vector.load %arg2[%c0_2, %c0_3] : memref<128x1152xbf16, #tpu.memory_space<vmem>>, vector<128x1152xbf16>
    %cst = arith.constant dense<0.000000e+00> : vector<256x1152xf32>
    %3 = tpu.matmul %1, %2, %cst {dimension_numbers = #tpu.dot_dimension_numbers<[1], [0], [0], [1], [0, 0, 1, 1], [], []>} : vector<256x128xbf16>, vector<128x1152xbf16>, vector<256x1152xf32> -> vector<256x1152xf32>
    %c0_4 = arith.constant 0 : index
    %c0_5 = arith.constant 0 : index
    %4 = vector.load %arg3[%c0_4, %c0_5] : memref<1x1152xf32, #tpu.memory_space<vmem>>, vector<1x1152xf32>
    %5 = vector.broadcast %4 : vector<1x1152xf32> to vector<256x1152xf32>
    %6 = arith.addf %3, %5 : vector<256x1152xf32>
    %cst_6 = arith.constant 0.000000e+00 : f32
    %7 = vector.broadcast %cst_6 : f32 to vector<256x1152xf32>
    %8 = arith.maximumf %6, %7 : vector<256x1152xf32>
    %c0_7 = arith.constant 0 : index
    %c0_8 = arith.constant 0 : index
    %9 = vector.load %arg4[%c0_7, %c0_8] : memref<256x1152xbf16, #tpu.memory_space<vmem>>, vector<256x1152xbf16>
    %10 = arith.extf %9 : vector<256x1152xbf16> to vector<256x1152xf32>
    %11 = arith.mulf %8, %10 : vector<256x1152xf32>
    %12 = arith.truncf %11 : vector<256x1152xf32> to vector<256x1152xbf16>
    %c0_9 = arith.constant 0 : index
    %c0_10 = arith.constant 0 : index
    %13 = vector.load %arg5[%c0_9, %c0_10] : memref<1152x128xbf16, #tpu.memory_space<vmem>>, vector<1152x128xbf16>
    %cst_11 = arith.constant dense<0.000000e+00> : vector<256x128xf32>
    %14 = tpu.matmul %12, %13, %cst_11 {dimension_numbers = #tpu.dot_dimension_numbers<[1], [0], [0], [1], [0, 0, 1, 1], [], []>} : vector<256x1152xbf16>, vector<1152x128xbf16>, vector<256x128xf32> -> vector<256x128xf32>
    %c0_12 = arith.constant 0 : index
    %c0_13 = arith.constant 0 : index
    %15 = vector.load %arg6[%c0_12, %c0_13] : memref<1x128xf32, #tpu.memory_space<vmem>>, vector<1x128xf32>
    %16 = vector.broadcast %15 : vector<1x128xf32> to vector<256x128xf32>
    %17 = arith.addf %14, %16 : vector<256x128xf32>
    %c0_14 = arith.constant 0 : index
    %c0_15 = arith.constant 0 : index
    %18 = vector.load %arg7[%c0_14, %c0_15] : memref<128x128xbf16, #tpu.memory_space<vmem>>, vector<128x128xbf16>
    %cst_16 = arith.constant dense<0.000000e+00> : vector<256x128xf32>
    %19 = tpu.matmul %1, %18, %cst_16 {dimension_numbers = #tpu.dot_dimension_numbers<[1], [0], [0], [1], [0, 0, 1, 1], [], []>} : vector<256x128xbf16>, vector<128x128xbf16>, vector<256x128xf32> -> vector<256x128xf32>
    %c0_17 = arith.constant 0 : index
    %c0_18 = arith.constant 0 : index
    %20 = vector.load %arg8[%c0_17, %c0_18] : memref<1x128xf32, #tpu.memory_space<vmem>>, vector<1x128xf32>
    %21 = vector.broadcast %20 : vector<1x128xf32> to vector<256x128xf32>
    %22 = arith.addf %19, %21 : vector<256x128xf32>
    %23 = arith.addf %17, %22 : vector<256x128xf32>
    %cst_19 = arith.constant 0.000000e+00 : f32
    %24 = vector.broadcast %cst_19 : f32 to vector<256x128xf32>
    %25 = arith.maximumf %23, %24 : vector<256x128xf32>
    %c0_20 = arith.constant 0 : index
    %c0_21 = arith.constant 0 : index
    %c0_22 = arith.constant 0 : index
    %26 = vector.load %arg9[%c0_20, %c0_21, %c0_22] : memref<1x256x128xf32, #tpu.memory_space<vmem>>, vector<1x256x128xf32>
    %27 = vector.shape_cast %26 : vector<1x256x128xf32> to vector<256x128xf32>
    %28 = vector.shape_cast %25 : vector<256x128xf32> to vector<1x256x128xf32>
    tpu.vector_store %arg9[%c0_20, %c0_21, %c0_22], %28 {strides = array<i32>} : memref<1x256x128xf32, #tpu.memory_space<vmem>>, vector<1x256x128xf32>,
    return
  }
  func.func @transform_0(%arg0: i32) -> (i32, i32, i32) {
    %c0_i32 = arith.constant 0 : i32
    %c0_i32_0 = arith.constant 0 : i32
    %c0_i32_1 = arith.constant 0 : i32
    return %arg0, %c0_i32, %c0_i32_0 : i32, i32, i32
  }
  func.func @transform_1(%arg0: i32) -> (i32, i32) {
    %c0_i32 = arith.constant 0 : i32
    %c0_i32_0 = arith.constant 0 : i32
    %c0_i32_1 = arith.constant 0 : i32
    return %c0_i32, %c0_i32_0 : i32, i32
  }
  func.func @transform_2(%arg0: i32) -> (i32, i32) {
    %c0_i32 = arith.constant 0 : i32
    %c0_i32_0 = arith.constant 0 : i32
    %c0_i32_1 = arith.constant 0 : i32
    return %c0_i32, %c0_i32_0 : i32, i32
  }
  func.func @transform_3(%arg0: i32) -> (i32, i32) {
    %c0_i32 = arith.constant 0 : i32
    %c0_i32_0 = arith.constant 0 : i32
    %c0_i32_1 = arith.constant 0 : i32
    return %c0_i32, %c0_i32_0 : i32, i32
  }
  func.func @transform_4(%arg0: i32) -> (i32, i32) {
    %c0_i32 = arith.constant 0 : i32
    %c0_i32_0 = arith.constant 0 : i32
    %c0_i32_1 = arith.constant 0 : i32
    return %c0_i32, %c0_i32_0 : i32, i32
  }
  func.func @transform_5(%arg0: i32) -> (i32, i32) {
    %c0_i32 = arith.constant 0 : i32
    %c0_i32_0 = arith.constant 0 : i32
    %c0_i32_1 = arith.constant 0 : i32
    return %c0_i32, %c0_i32_0 : i32, i32
  }
  func.func @transform_6(%arg0: i32) -> (i32, i32) {
    %c0_i32 = arith.constant 0 : i32
    %c0_i32_0 = arith.constant 0 : i32
    %c0_i32_1 = arith.constant 0 : i32
    return %c0_i32, %c0_i32_0 : i32, i32
  }
  func.func @transform_7(%arg0: i32) -> (i32, i32) {
    %c0_i32 = arith.constant 0 : i32
    %c0_i32_0 = arith.constant 0 : i32
    %c0_i32_1 = arith.constant 0 : i32
    return %c0_i32, %c0_i32_0 : i32, i32
  }
  func.func @transform_8(%arg0: i32) -> (i32, i32, i32) {
    %c0_i32 = arith.constant 0 : i32
    %c0_i32_0 = arith.constant 0 : i32
    %c0_i32_1 = arith.constant 0 : i32
    return %arg0, %c0_i32, %c0_i32_0 : i32, i32, i32
  }
}

</mosaic_0001>

<bundles_post_ra>
// kernel: tpu_custom_call.1
= control target key start
LH: loop header
LB: loop body
LE: loop exit
PB: predicated region body
PF: predicated region fallthrough
CT: control target
= control target key end

     0   :  { %13 = vsyncpa [#allocation3], 0  ;;  %s9767_s0 = inlined_call_operand.hbm [shape: bf16[2,256,128], index: 0, kind: input, shape index: {}]   ;;  %s9768_s1 = inlined_call_operand.hbm [shape: bf16[128,1152], index: 1, kind: input, shape index: {}]   ;;  %s9769_s2 = inlined_call_operand.hbm [shape: f32[1,1152], index: 2, kind: input, shape index: {}]   ;;  %s9770_s3 = inlined_call_operand.hbm [shape: bf16[256,1152], index: 3, kind: input, shape index: {}]   ;;  %s9771_s4 = inlined_call_operand.hbm [shape: bf16[1152,128], index: 4, kind: input, shape index: {}]   ;;  %s9772_s5 = inlined_call_operand.vmem [shape: f32[1,128], index: 5, kind: input, shape index: {}]   ;;  %s9773_s6 = inlined_call_operand.hbm [shape: bf16[128,128], index: 6, kind: input, shape index: {}]   ;;  %s9774_s7 = inlined_call_operand.vmem [shape: f32[1,128], index: 7, kind: input, shape index: {}]   ;;  %s9775_s8 = inlined_call_operand.hbm [shape: f32[2,256,128], index: 8, kind: output, shape index: {}]  }
   0x1   :  { %15 = vsyncpa [#allocation3 + $0x1], 0 }
   0x2   :  { %16 = vsyncpa [#allocation6], 0 }
   0x3   :  { %17 = vsyncpa [#allocation9], 0 }
   0x4   :  { %18 = vsyncpa [#allocation12], 0 }
   0x5   :  { %19 = vsyncpa [#allocation4], 0 }
   0x6   :  { %21 = vsyncpa [#allocation4 + $0x1], 0  ;;  %s6598_s27 = smov 0   ;;  %s6600_s28 = smov 0  }
   0x7   :  { %s6602_s29 = smov 0   ;;  %s6604_s30 = smov 0  }
   0x8 LB: > { %s6539_s9 = smov [#allocation5]   ;;  %s6619_s11 = sadd.s32 4294967295, %s6537_s30   ;;  %s6537_s30 = sphi %s6604_s30, %s10643_s30   ;;  %s6533_s29 = sphi %s6602_s29, %s10642_s29   ;;  %s6529_s28 = sphi %s6600_s28, %s10641_s28   ;;  %s6525_s27 = sphi %s6598_s27, %s10640_s27  }
   0x9   : > { %s243_s10 = sshll.u32 %s6539_s9, 4  ;;  %p4974_p0 = scmp.ge.s32.totalorder %s6537_s30, 1  ;;  %s6624_s10 = int_to_ptr.vmem [resolvable:$true] %s243_s10 }
   0xa   : > { %p9776_p1 = scmp.eq.s32.totalorder %s6619_s11, 0  ;;  %p231_p2 = scmp.lt.s32.totalorder %s6537_s30, 3 }
   0xb   : > { %s6540_s13 = smov [#allocation8]   ;;  %s6541_s16 = smov [#allocation7]  }
   0xc   : > { %p6626_p3 = pnand %p4974_p0, %p231_p2  ;;  %s267_s14 = sshll.u32 %s6540_s13, 4  ;;  %s6639_s14 = int_to_ptr.vmem [resolvable:$true] %s267_s14 }
   0xd   : > { %s257_s17 = sshll.u32 %s6541_s16, 4  ;;  %s6289_s20 = scalar_lea.hbm %s9768_s1, 9216  ;;  %s6641_s17 = int_to_ptr.vmem [resolvable:$true] %s257_s17 }
   0xe   : > { %s9990_s12 = scalar_select %p6626_p3, 1, 0 }
   0xf   : > { %p5970_p5 = pneg %p6626_p3  ;;  %p6290_p7 = scmp.ne.s32.totalorder %s9768_s1, %s6289_s20 }
  0x10   : > { %p6296_p11 = scmp.lt.u32.totalorder %s6289_s20, %s9768_s1 }
  0x11   : > { %p6635_p6 = pnand %p5970_p5, %p9776_p1 }
  0x13   : > { %p6651_p8 = pneg %p6635_p6 }
  0x15   : > { %p6292_p9 = pnand %p6651_p8, %p6290_p7 }
  0x17   : > { %p6293_p10 = pneg %p6292_p9 }
  0x19   : > { %p6298_p12 = pnand %p6296_p11, %p6293_p10 }
  0x1b   : > { %6301 = shalt.err (!%p6298_p12)
}
  0x1c   : > { %s6302_s26 = scalar_lea.vmem %s6624_s10, 9216  ;;  %p6310_p5 = scmp.lt.s32.totalorder %s6624_s10, %s6624_s10 }
  0x1d   : > { %p6303_p13 = scmp.ne.s32.totalorder %s6624_s10, %s6302_s26  ;;  %p6311_p4 = scmp.lt.s32.totalorder %s6302_s26, %s6302_s26 }
  0x1f   : > { %p6305_p0 = pnand %p6303_p13, %p6651_p8  ;;  %p6312_p7 = por %p6311_p4, %p6310_p5 }
  0x21   : > { %p6306_p2 = pneg %p6305_p0 }
  0x23   : > { %p6313_p9 = pnand %p6312_p7, %p6306_p2 }
  0x25   : > { %6316 = shalt.err (!%p6313_p9)
}
  0x26   : > { %s6542_s9 = smov 576   ;;  %s6543_s13 = smov 36  }
  0x27   : > { %5973 = dma.hbm_to_vmem [thread:$0]  (!%p6635_p6), %s9768_s1, 9216, %s6624_s10, [#allocation6], %s6542_s9, %s6542_s9, %s6543_s13  }
  0x28   : > { %s6317_s21 = scalar_lea.hbm %s9770_s3, 18432 }
  0x29   : > { %p6318_p4 = scmp.ne.s32.totalorder %s9770_s3, %s6317_s21  ;;  %p6324_p12 = scmp.lt.u32.totalorder %s6317_s21, %s9770_s3 }
  0x2b   : > { %p6320_p10 = pnand %p6318_p4, %p6651_p8 }
  0x2d   : > { %p6321_p11 = pneg %p6320_p10 }
  0x2f   : > { %p6326_p13 = pnand %p6324_p12, %p6321_p11 }
  0x31   : > { %6329 = shalt.err (!%p6326_p13)
}
  0x32   : > { %s6330_s10 = scalar_lea.vmem %s6639_s14, 18432  ;;  %p6338_p7 = scmp.lt.s32.totalorder %s6639_s14, %s6639_s14 }
  0x33   : > { %p6331_p0 = scmp.ne.s32.totalorder %s6639_s14, %s6330_s10  ;;  %p6339_p9 = scmp.lt.s32.totalorder %s6330_s10, %s6330_s10 }
  0x35   : > { %p6333_p2 = pnand %p6331_p0, %p6651_p8  ;;  %p6340_p4 = por %p6339_p9, %p6338_p7 }
  0x37   : > { %p6334_p5 = pneg %p6333_p2 }
  0x39   : > { %p6341_p10 = pnand %p6340_p4, %p6334_p5 }
  0x3b   : > { %6344 = shalt.err (!%p6341_p10)
}
  0x3c   : > { %5979 = dma.hbm_to_vmem [thread:$0]  (!%p6635_p6), %s9770_s3, 18432, %s6639_s14, [#allocation9], %s6542_s9, %s6542_s9, %s6543_s13  }
  0x3d   : > { %s6345_s21 = scalar_lea.hbm %s9769_s2, 144 }
  0x3e   : > { %p6346_p11 = scmp.ne.s32.totalorder %s9769_s2, %s6345_s21  ;;  %p6352_p0 = scmp.lt.u32.totalorder %s6345_s21, %s9769_s2 }
  0x40   : > { %p6348_p12 = pnand %p6346_p11, %p6651_p8 }
  0x42   : > { %p6349_p13 = pneg %p6348_p12 }
  0x44   : > { %p6354_p2 = pnand %p6352_p0, %p6349_p13 }
  0x46   : > { %6357 = shalt.err (!%p6354_p2)
}
  0x47   : > { %s6358_s14 = scalar_lea.vmem %s6641_s17, 144  ;;  %s6365_s9 = scalar_lea.vmem %s6641_s17, 160 }
  0x48   : > { %p6359_p5 = scmp.ne.s32.totalorder %s6641_s17, %s6358_s14  ;;  %p6366_p4 = scmp.lt.s32.totalorder %s6641_s17, %s6641_s17 }
  0x49   : > { %p6367_p10 = scmp.lt.s32.totalorder %s6365_s9, %s6358_s14 }
  0x4a   : > { %p6361_p7 = pnand %p6359_p5, %p6651_p8 }
  0x4b   : > { %p6368_p11 = por %p6367_p10, %p6366_p4 }
  0x4c   : > { %p6362_p9 = pneg %p6361_p7 }
  0x4e   : > { %p6369_p12 = pnand %p6368_p11, %p6362_p9 }
  0x50   : > { %6372 = shalt.err (!%p6369_p12)
}
  0x51   : > { %5976 = dma.hbm_to_vmem [thread:$0]  (!%p6635_p6), %s9769_s2, 144, %s6641_s17, [#allocation6]  }
  0x52   : > { %s6544_s16 = smov [#allocation10]   ;;  %s6373_s21 = scalar_lea.hbm %s9771_s4, 9216 }
  0x53   : > { %s280_s18 = sshll.u32 %s6544_s16, 4  ;;  %p6374_p13 = scmp.ne.s32.totalorder %s9771_s4, %s6373_s21  ;;  %s281_s18 = int_to_ptr.vmem [resolvable:$true] %s280_s18 }
  0x54   : > { %p6380_p5 = scmp.lt.u32.totalorder %s6373_s21, %s9771_s4 }
  0x55   : > { %p6376_p0 = pnand %p6374_p13, %p6651_p8 }
  0x57   : > { %p6377_p2 = pneg %p6376_p0 }
  0x59   : > { %p6382_p7 = pnand %p6380_p5, %p6377_p2 }
  0x5b   : > { %6385 = shalt.err (!%p6382_p7)
}
  0x5c   : > { %s6386_s17 = scalar_lea.vmem %s281_s18, 9216  ;;  %p6394_p11 = scmp.lt.s32.totalorder %s281_s18, %s281_s18 }
  0x5d   : > { %p6387_p9 = scmp.ne.s32.totalorder %s281_s18, %s6386_s17  ;;  %p6395_p12 = scmp.lt.s32.totalorder %s6386_s17, %s6386_s17 }
  0x5f   : > { %p6389_p4 = pnand %p6387_p9, %p6651_p8  ;;  %p6396_p1 = por %p6395_p12, %p6394_p11 }
  0x61   : > { %p6390_p10 = pneg %p6389_p4 }
  0x63   : > { %p6397_p3 = pnand %p6396_p1, %p6390_p10 }
  0x65   : > { %6400 = shalt.err (!%p6397_p3)
}
  0x66   : > { %s9778_s14 = smov 64   ;;  %s9779_s9 = smov 4  }
  0x67   : > { %5982 = dma.hbm_to_vmem [thread:$0]  (!%p6635_p6), %s9771_s4, 9216, %s281_s18, [#allocation9], %s9778_s14, %s9778_s14, %s9779_s9  }
  0x68   : > { %s6547_s16 = smov [#allocation11]   ;;  %s6401_s22 = scalar_lea.hbm %s9773_s6, 1024 }
  0x69   : > { %s296_s19 = sshll.u32 %s6547_s16, 4  ;;  %p6402_p1 = scmp.ne.s32.totalorder %s9773_s6, %s6401_s22  ;;  %s297_s19 = int_to_ptr.vmem [resolvable:$true] %s296_s19 }
  0x6a   : > { %p6408_p0 = scmp.lt.u32.totalorder %s6401_s22, %s9773_s6 }
  0x6b   : > { %p6404_p3 = pnand %p6402_p1, %p6651_p8 }
  0x6d   : > { %p6405_p13 = pneg %p6404_p3 }
  0x6f   : > { %p6410_p2 = pnand %p6408_p0, %p6405_p13 }
  0x71   : > { %6413 = shalt.err (!%p6410_p2)
}
  0x72   : > { %s6414_s18 = scalar_lea.vmem %s297_s19, 1024  ;;  %p6422_p4 = scmp.lt.s32.totalorder %s297_s19, %s297_s19 }
  0x73   : > { %p6415_p5 = scmp.ne.s32.totalorder %s297_s19, %s6414_s18  ;;  %p6423_p10 = scmp.lt.s32.totalorder %s6414_s18, %s6414_s18 }
  0x75   : > { %p6417_p7 = pnand %p6415_p5, %p6651_p8  ;;  %p6424_p11 = por %p6423_p10, %p6422_p4 }
  0x77   : > { %p6418_p9 = pneg %p6417_p7 }
  0x79   : > { %p6425_p12 = pnand %p6424_p11, %p6418_p9 }
  0x7b   : > { %6428 = shalt.err (!%p6425_p12)
}
  0x7c   : > { %5985 = dma.hbm_to_vmem [thread:$0]  (!%p6635_p6), %s9773_s6, 1024, %s297_s19, [#allocation12], %s9778_s14, %s9778_s14, %s9779_s9  }
  0x7d   : > { %s4973_s15 = sadd.s32 4294967294, %s6537_s30   ;;  %s6763_s23 = sadd.s32 1, %s6537_s30  }
  0x7e   : > { %s34_s16 = sadd.s32 1, %s6533_s29  ;;  %s31_s20 = ssub.s32 %s6537_s30, %s6763_s23 }
  0x7f   : > { %p41_p8 = scmp.ne.s32.totalorder %s6533_s29, %s6529_s28  ;;  %p32_p1 = scmp.eq.s32.totalorder %s31_s20, 0 }
  0x80   : > { %p42_p3 = scmp.eq.s32.totalorder %s6537_s30, 0  ;;  %p47_p13 = scmp.ne.s32.totalorder %s6529_s28, %s6525_s27 }
  0x81   : > { %p218_p0 = scmp.eq.s32.totalorder %s6619_s11, 1  ;;  %p9993_p5 = scmp.eq.s32.totalorder %s6619_s11, 0 }
  0x82   : > { %s6775_s21 = scalar_select %p32_p1, %s6533_s29, %s34_s16  }
  0x83   : > { %p43_p2 = por %p42_p3, %p41_p8  ;;  %p6779_p7 = por %p9993_p5, %p47_p13 }
  0x84   : > { %p6783_p6 = por %p218_p0, %p41_p8  ;;  %p224_p9 = scmp.eq.s32.totalorder %s4973_s15, 1 }
  0x85   : > { %p5999_p4 = scmp.lt.s32.totalorder %s6537_s30, 2  ;;  %s313_s24 = sand.u32 1, %s6533_s29  }
  0x86   : > { %s9995_s19 = scalar_select %p6783_p6, 1, 0 }
  0x87   : > { %p6789_p10 = por %p224_p9, %p47_p13  ;;  %s4981_s26 = sshll.u32 %s313_s24, 7 }
  0x88   : > { %s5168_s17 = sshll.u32 %s6537_s30, 11  ;;  %s317_s16 = scalar_lea.vmem [#allocation2], %s4981_s26 }
  0x89   : > { %s9996_s25 = scalar_select %p6789_p10, 1, 0 }
  0x8a   : > { %s6797_s10 = scalar_lea.hbm %s9767_s0, %s5168_s17  ;;  %s324_s20 = sshll.u32 %s317_s16, 4  ;;  %s6803_s20 = int_to_ptr.vmem [resolvable:$true] %s324_s20 }
  0x8b   : > { %p6799_p11 = pnand %p5999_p4, %p43_p2  ;;  %s6805_s14 = scalar_lea.sflag [#allocation3], %s313_s24 }
  0x8c   : > { %s6429_s9 = scalar_lea.hbm %s6797_s10, 2048  ;;  %s6434_s18 = scalar_lea.hbm %s9767_s0, 4096 }
  0x8d   : > { %p6430_p12 = scmp.ne.s32.totalorder %s6797_s10, %s6429_s9  ;;  %p6431_p8 = pneg %p6799_p11 }
  0x8e   : > { %p6435_p13 = scmp.lt.u32.totalorder %s6797_s10, %s9767_s0  ;;  %p6436_p0 = scmp.lt.u32.totalorder %s6434_s18, %s6429_s9 }
  0x8f   : > { %p6432_p1 = pnand %p6431_p8, %p6430_p12  ;;  %p6438_p5 = scmp.lt.u32.totalorder %s6429_s9, %s6797_s10 }
  0x90   : > { %p6437_p2 = por %p6436_p0, %p6435_p13 }
  0x91   : > { %p6433_p3 = pneg %p6432_p1 }
  0x92   : > { %p6439_p9 = por %p6438_p5, %p6437_p2 }
  0x94   : > { %p6440_p4 = pnand %p6439_p9, %p6433_p3 }
  0x96   : > { %6443 = shalt.err (!%p6440_p4)
}
  0x97   : > { %s6444_s24 = scalar_lea.vmem %s6803_s20, 2048  ;;  %s6548_s26 = smov [#allocation2]  }
  0x98   : > { %p6445_p12 = scmp.ne.s32.totalorder %s6803_s20, %s6444_s24  ;;  %s6449_s17 = sshll.u32 %s6548_s26, 4  ;;  %s6450_s17 = int_to_ptr.vmem [resolvable:$false] %s6449_s17 }
  0x99   : > { %s6451_s13 = scalar_lea.vmem %s6450_s17, 4096  ;;  %p6452_p6 = scmp.lt.s32.totalorder %s6803_s20, %s6450_s17 }
  0x9a   : > { %p6447_p1 = pnand %p6445_p12, %p6431_p8  ;;  %p6453_p13 = scmp.lt.s32.totalorder %s6451_s13, %s6444_s24 }
  0x9c   : > { %p6448_p10 = pneg %p6447_p1  ;;  %p6454_p0 = por %p6453_p13, %p6452_p6 }
  0x9e   : > { %p6455_p2 = pnand %p6454_p0, %p6448_p10 }
  0xa0   : > { %6458 = shalt.err (!%p6455_p2)
}
  0xa1   : > { %s9998_s9 = smov 4   ;;  %s9999_s18 = smov 64  }
  0xa2   : > { %5989 = dma.hbm_to_vmem [thread:$0]  (!%p6799_p11), %s6797_s10, 2048, %s6803_s20, %s6805_s14, %s9999_s18, %s9999_s18, %s9998_s9  }
  0xa3   : > { %p10000_p8 = scmp.ne.s32.totalorder %s9990_s12, 0 }
  0xa5   : > { %336 = sbr.rel (%p10000_p8) target bundleno = 1114 (0x45a), region = 52 }
  0xac   : > { %s6839_s16 = sand.u32 1, %s6529_s28  }
  0xad   : > { %s4985_s24 = sshll.u32 %s6839_s16, 7  ;;  %s339_s26 = scalar_lea.sflag [#allocation3], %s6839_s16 }
  0xae   : > { %s6843_s17 = scalar_lea.vmem [#allocation2], %s4985_s24 }
  0xaf   : > { %6504 = dma.done.wait (%p6779_p7), %s339_s26, 2048  }
  0xb0   : > { %6506 = vsyncadd (%p6779_p7), %s339_s26, 4294965248  ;;  %p10001_p6 = scmp.eq.s32.totalorder %s6619_s11, 0 }
  0xb2   : > { %6508 = dma.done.wait (%p10001_p6), [#allocation6], 9360   ;;  %p10002_p10 = pmov %p10001_p6 }
  0xb3   : > { %p10003_p11 = pmov %p10001_p6 }
  0xb4   : > { %6510 = vsyncadd (%p10002_p10), [#allocation6], 4294957936 }
  0xb5   : > { %6512 = dma.done.wait (%p10003_p11), [#allocation9], 27648   ;;  %p10004_p3 = pmov %p10001_p6 }
  0xb7   : > { %6514 = vsyncadd (%p10004_p3), [#allocation9], 4294939648  ;;  %p10005_p5 = pmov %p10004_p3 }
  0xb8   : > { %p10006_p9 = pmov %p10004_p3 }
  0xb9   : > { %6516 = dma.done.wait (%p10005_p5), [#allocation12], 1024  }
  0xba   : > { %6518 = vsyncadd (%p10006_p9), [#allocation12], 4294966272  ;;  %v9781_v0 = vmov 0   ;;  %v6050_v1 = vld [vmem:[#allocation5 + $0x4] ss:$36 sps:$4 sm:$0xff]   ;;  %v6939_v45 = vld [vmem:[%s6843_s17 + $0x10] sm:$0xff]  }
  0xbb   : > { %1053 = vmatprep.mubr.bf16.mxu0 %v9781_v0  ;;  %1286 = vmatprep.mubr.bf16.mxu1 %v9781_v0  ;;  %v6863_v2 = vld [vmem:[#allocation5 + $0xc] ss:$36 sps:$4 sm:$0xff]   ;;  %v6054_v3 = vld [vmem:[#allocation5] ss:$36 sps:$4 sm:$0xff]   ;;  %v6869_v6 = vld [vmem:[#allocation5 + $0x54] ss:$36 sps:$4 sm:$0xff]  }
  0xbc   : > { %1021 = vmatprep.subr.bf16.mxu0 %v6050_v1  ;;  %v6865_v4 = vld [vmem:[#allocation5 + $0x8] ss:$36 sps:$4 sm:$0xff]   ;;  %5834 = vmatprep.subr.bf16.mxu1 %v6863_v2  ;;  %v6871_v8 = vld [vmem:[#allocation5 + $0x50] ss:$36 sps:$4 sm:$0xff]   ;;  %v6874_v10 = vld [vmem:[#allocation5 + $0x9c] ss:$36 sps:$4 sm:$0xff]  }
  0xbd   : > { %v6056_v5 = vld [vmem:[#allocation5 + $0x4c] ss:$36 sps:$4 sm:$0xff]   ;;  %1022 = vmatpush1.bf16.msra.mxu0 %v6054_v3  ;;  %5842 = vmatpush1.bf16.msra.mxu1 %v6865_v4  ;;  %v6062_v9 = vld [vmem:[#allocation5 + $0x94] ss:$36 sps:$4 sm:$0xff]   ;;  %v6068_v13 = vld [vmem:[#allocation5 + $0xdc] ss:$36 sps:$4 sm:$0xff]  }
  0xbe   : > { %v6060_v7 = vld [vmem:[#allocation5 + $0x48] ss:$36 sps:$4 sm:$0xff]   ;;  %1023 = vmatprep.subr.bf16.mxu0 %v6056_v5  ;;  %5835 = vmatprep.subr.bf16.mxu1 %v6869_v6  ;;  %v6066_v11 = vld [vmem:[#allocation5 + $0x90] ss:$36 sps:$4 sm:$0xff]   ;;  %v6876_v12 = vld [vmem:[#allocation5 + $0x98] ss:$36 sps:$4 sm:$0xff]  }
  0xbf   : > { %v6880_v14 = vld [vmem:[#allocation5 + $0xe4] ss:$36 sps:$4 sm:$0xff]   ;;  %v6072_v15 = vld [vmem:[#allocation5 + $0xd8] ss:$36 sps:$4 sm:$0xff]   ;;  %v6886_v18 = vld [vmem:[#allocation5 + $0x12c] ss:$36 sps:$4 sm:$0xff]  }
  0xc0   : > { %v6883_v16 = vld [vmem:[#allocation5 + $0xe0] ss:$36 sps:$4 sm:$0xff]   ;;  %v6888_v20 = vld [vmem:[#allocation5 + $0x128] ss:$36 sps:$4 sm:$0xff]   ;;  %v6892_v22 = vld [vmem:[#allocation5 + $0x174] ss:$36 sps:$4 sm:$0xff]  }
  0xc1   : > { %1024 = vmatpush1.bf16.msra.mxu0 %v6060_v7  ;;  %5843 = vmatpush1.bf16.msra.mxu1 %v6871_v8  ;;  %v6074_v17 = vld [vmem:[#allocation5 + $0x124] ss:$36 sps:$4 sm:$0xff]   ;;  %v6080_v21 = vld [vmem:[#allocation5 + $0x16c] ss:$36 sps:$4 sm:$0xff]   ;;  %v6086_v25 = vld [vmem:[#allocation5 + $0x1b4] ss:$36 sps:$4 sm:$0xff]  }
  0xc2   : > { %1025 = vmatprep.subr.bf16.mxu0 %v6062_v9  ;;  %5836 = vmatprep.subr.bf16.mxu1 %v6874_v10  ;;  %v6078_v19 = vld [vmem:[#allocation5 + $0x120] ss:$36 sps:$4 sm:$0xff]   ;;  %v6084_v23 = vld [vmem:[#allocation5 + $0x168] ss:$36 sps:$4 sm:$0xff]   ;;  %v6895_v24 = vld [vmem:[#allocation5 + $0x170] ss:$36 sps:$4 sm:$0xff]  }
  0xc3   : > { %v6898_v26 = vld [vmem:[#allocation5 + $0x1bc] ss:$36 sps:$4 sm:$0xff]   ;;  %v6090_v27 = vld [vmem:[#allocation5 + $0x1b0] ss:$36 sps:$4 sm:$0xff]   ;;  %v6904_v30 = vld [vmem:[#allocation5 + $0x204] ss:$36 sps:$4 sm:$0xff]  }
  0xc4   : > { %v6900_v28 = vld [vmem:[#allocation5 + $0x1b8] ss:$36 sps:$4 sm:$0xff]   ;;  %v6907_v32 = vld [vmem:[#allocation5 + $0x200] ss:$36 sps:$4 sm:$0xff]   ;;  %v6925_v39 = vld [vmem:[%s6843_s17 + $0x8] sm:$0xff]   ;;  %s4991_s20 = sshll.u32 %s6839_s16, 8 }
  0xc5   : > { %1026 = vmatpush1.bf16.msra.mxu0 %v6066_v11  ;;  %5844 = vmatpush1.bf16.msra.mxu1 %v6876_v12  ;;  %v6092_v29 = vld [vmem:[#allocation5 + $0x1fc] ss:$36 sps:$4 sm:$0xff]   ;;  %v6113_v37 = vld [vmem:[#allocation5 + $0x64] ss:$36 sps:$4 sm:$0xff]   ;;  %v6118_v41 = vld [vmem:[#allocation5 + $0xac] ss:$36 sps:$4 sm:$0xff]  }
  0xc6   : > { %1027 = vmatprep.subr.bf16.mxu0 %v6068_v13  ;;  %5837 = vmatprep.subr.bf16.mxu1 %v6880_v14  ;;  %v6096_v31 = vld [vmem:[#allocation5 + $0x1f8] ss:$36 sps:$4 sm:$0xff]   ;;  %v6911_v33 = vld [vmem:[%s6843_s17] sm:$0xff]   ;;  %v6928_v40 = vld [vmem:[%s6843_s17 + $0x28] sm:$0xff]   ;;  %s9608_s15 = scalar_lea.vmem [#allocation13], %s4991_s20  ;;  %s5169_s13 = sshll.u32 %s6619_s11, 12 }
  0xc7   : > { %v6914_v34 = vld [vmem:[%s6843_s17 + $0x20] sm:$0xff]   ;;  %v6107_v36 = vld [vmem:[#allocation5 + $0x18] ss:$36 sps:$4 sm:$0xff]   ;;  %v6116_v42 = vld [vmem:[#allocation5 + $0xa8] ss:$36 sps:$4 sm:$0xff]   ;;  %s4852_s9 = sshll.u32 %s9608_s15, 4  ;;  %s9718_s26 = scalar_lea.hbm %s9775_s8, %s5169_s13  ;;  %s9720_s9 = int_to_ptr.vmem [resolvable:$true] %s4852_s9 }
  0xc8   : > { %v6109_v35 = vld [vmem:[#allocation5 + $0x1c] ss:$36 sps:$4 sm:$0xff]   ;;  %v6122_v43 = vld [vmem:[#allocation5 + $0xf4] ss:$36 sps:$4 sm:$0xff]   ;;  %v6130_v49 = vld [vmem:[#allocation5 + $0x184] ss:$36 sps:$4 sm:$0xff]  }
  0xc9   : > { %1028 = vmatpush1.bf16.msra.mxu0 %v6072_v15  ;;  %5845 = vmatpush1.bf16.msra.mxu1 %v6883_v16  ;;  %v6111_v38 = vld [vmem:[#allocation5 + $0x60] ss:$36 sps:$4 sm:$0xff]   ;;  %v6120_v44 = vld [vmem:[#allocation5 + $0xf0] ss:$36 sps:$4 sm:$0xff]   ;;  %v6125_v48 = vld [vmem:[#allocation5 + $0x138] ss:$36 sps:$4 sm:$0xff]  }
  0xca   : > { %1029 = vmatprep.subr.bf16.mxu0 %v6074_v17  ;;  %5838 = vmatprep.subr.bf16.mxu1 %v6886_v18  ;;  %v6942_v46 = vld [vmem:[%s6843_s17 + $0x30] sm:$0xff]   ;;  %v6127_v47 = vld [vmem:[#allocation5 + $0x13c] ss:$36 sps:$4 sm:$0xff]   ;;  %v6132_v54 = vld [vmem:[#allocation5 + $0x1c8] ss:$36 sps:$4 sm:$0xff]   ;;  %s4839_s11 = scalar_lea.sflag [#allocation4], %s6839_s16 }
  0xcb   : > { %v6951_v50 = vld [vmem:[%s6843_s17 + $0x18] sm:$0xff]   ;;  %v6128_v51 = vld [vmem:[#allocation5 + $0x180] ss:$36 sps:$4 sm:$0xff]   ;;  %v6134_v53 = vld [vmem:[#allocation5 + $0x1cc] ss:$36 sps:$4 sm:$0xff]   ;;  %p10637_p4 = scmp.ne.s32.totalorder %s9995_s19, 0 }
  0xcc   : > { %v6956_v52 = vld [vmem:[%s6843_s17 + $0x38] sm:$0xff]   ;;  %v6965_v56 = vld [vmem:[%s6843_s17 + $0x40] sm:$0xff]   ;;  %v6135_v57 = vld [vmem:[#allocation5 + $0x210] ss:$36 sps:$4 sm:$0xff]   ;;  %s6550_s12 = smov [#allocation13]  }
  0xcd   : > { %1030 = vmatpush1.bf16.msra.mxu0 %v6078_v19  ;;  %5846 = vmatpush1.bf16.msra.mxu1 %v6888_v20  ;;  %v6137_v55 = vld [vmem:[#allocation5 + $0x214] ss:$36 sps:$4 sm:$0xff]   ;;  %v6141_v59 = vld [vmem:[#allocation10 + $0x40] sm:$0xff]   ;;  %v6996_v63 = vld [vmem:[%s6843_s17 + $0x60] sm:$0xff]   ;;  %s6463_s14 = sshll.u32 %s6550_s12, 4  ;;  %s6464_s14 = int_to_ptr.vmem [resolvable:$false] %s6463_s14 }
  0xce   : > { %1031 = vmatprep.subr.bf16.mxu0 %v6080_v21  ;;  %5839 = vmatprep.subr.bf16.mxu1 %v6892_v22  ;;  %v6140_v58 = vld [vmem:[#allocation5 + $0x14] ss:$36 sps:$4 sm:$0xff]   ;;  %v6975_v60 = vld [vmem:[%s6843_s17 + $0x48] sm:$0xff]   ;;  %s6465_s22 = scalar_lea.vmem %s6464_s14, 8192  ;;  %p6466_p13 = scmp.lt.s32.totalorder %s9720_s9, %s6464_s14 }
  0xcf   : > { %v6982_v61 = vld [vmem:[%s6843_s17 + $0x50] sm:$0xff]   ;;  %v6989_v62 = vld [vmem:[%s6843_s17 + $0x58] sm:$0xff]   ;;  %v7003_v1 = vld [vmem:[%s6843_s17 + $0x68] sm:$0xff]  }
  0xd0   : > { %v7017_v3 = vld [vmem:[%s6843_s17 + $0x78] sm:$0xff]   ;;  %v6170_v9 = vld [vmem:[#allocation10 + $0x58] sm:$0xff]   ;;  %v6173_v11 = vld [vmem:[#allocation10 + $0x60] sm:$0xff]  }
  0xd1   : > { %1032 = vmatpush1.bf16.msra.mxu0 %v6084_v23  ;;  %5847 = vmatpush1.bf16.msra.mxu1 %v6895_v24  ;;  %v6155_v5 = vld [vmem:[#allocation10 + $0x48] sm:$0xff]   ;;  %v6167_v7 = vld [vmem:[#allocation10 + $0x50] sm:$0xff]   ;;  %v6180_v17 = vld [vmem:[#allocation10 + $0x78] sm:$0xff]  }
  0xd2   : > { %1033 = vmatprep.subr.bf16.mxu0 %v6086_v25  ;;  %5840 = vmatprep.subr.bf16.mxu1 %v6898_v26  ;;  %v6176_v13 = vld [vmem:[#allocation10 + $0x68] sm:$0xff]   ;;  %v6178_v15 = vld [vmem:[#allocation10 + $0x70] sm:$0xff]   ;;  %v6148_v23 = vld [vmem:[#allocation5 + $0xa4] ss:$36 sps:$4 sm:$0xff]  }
  0xd3   : > { %v6138_v19 = vld [vmem:[#allocation5 + $0x10] ss:$36 sps:$4 sm:$0xff]   ;;  %v6143_v21 = vld [vmem:[#allocation5 + $0x58] ss:$36 sps:$4 sm:$0xff]  }
  0xd4   : > { %v6151_v25 = vld [vmem:[#allocation5 + $0xec] ss:$36 sps:$4 sm:$0xff]  }
  0xd5   : > { %1034 = vmatpush1.bf16.msra.mxu0 %v6090_v27  ;;  %5848 = vmatpush1.bf16.msra.mxu1 %v6900_v28  ;;  %v6154_v27 = vld [vmem:[#allocation5 + $0x134] ss:$36 sps:$4 sm:$0xff]  }
  0xd6   : > { %1035 = vmatprep.subr.bf16.mxu0 %v6092_v29  ;;  %5841 = vmatprep.subr.bf16.mxu1 %v6904_v30  ;;  %v6159_v29 = vld [vmem:[#allocation5 + $0x17c] ss:$36 sps:$4 sm:$0xff]  }
  0xd9   : > { %1036 = vmatpush1.bf16.msra.mxu0 %v6096_v31  ;;  %5849 = vmatpush1.bf16.msra.mxu1 %v6907_v32  ;;  %v6162_v31 = vld [vmem:[#allocation5 + $0x1c4] ss:$36 sps:$4 sm:$0xff]  }
  0xda   : > { %1214 = vmatprep.subr.bf16.mxu0 %v6863_v2  ;;  %1600 = vmatprep.subr.bf16.mxu1 %v6109_v35  ;;  %v7010_v2 = vld [vmem:[%s6843_s17 + $0x70] sm:$0xff]  }
  0xdb   : > { %v6165_v35 = vld [vmem:[#allocation5 + $0x20c] ss:$36 sps:$4 sm:$0xff]  }
  0xdc   : > { %1054 = vmatmul.mubr.bf16.vlgmr.msra.gmra.mrb[0].mxu0 %v6911_v33  ;;  %1287 = vmatmul.mubr.bf16.vlgmr.msra.gmra.mrb[0].mxu1 %v6914_v34 }
  0xdd   : > { %1215 = vmatpush1.bf16.msra.mxu0 %v6865_v4  ;;  %1063 = vmatprep.mubr.bf16.mxu0 %v9781_v0  ;;  %v6142_v4 = vld [vmem:[#allocation10] sm:$0xff]  }
  0xde   : > { %1296 = vmatprep.mubr.bf16.mxu1 %v9781_v0  ;;  %1216 = vmatprep.subr.bf16.mxu0 %v6869_v6  ;;  %v6156_v6 = vld [vmem:[#allocation10 + $0x8] sm:$0xff]  }
  0xdf   : > { %1601 = vmatpush1.bf16.msra.mxu1 %v6107_v36  ;;  %v6163_v36 = vld [vmem:[#allocation5 + $0x208] ss:$36 sps:$4 sm:$0xff]  }
  0xe0   : > { %1602 = vmatprep.subr.bf16.mxu1 %v6113_v37  ;;  %v6166_v37 = vld [vmem:[#allocation5 + $0x20] ss:$36 sps:$4 sm:$0xff]  }
  0xe1   : > { %1217 = vmatpush1.bf16.msra.mxu0 %v6871_v8  ;;  %v6168_v8 = vld [vmem:[#allocation10 + $0x10] sm:$0xff]  }
  0xe2   : > { %1218 = vmatprep.subr.bf16.mxu0 %v6874_v10  ;;  %v6171_v10 = vld [vmem:[#allocation10 + $0x18] sm:$0xff]  }
  0xe3   : > { %1603 = vmatpush1.bf16.msra.mxu1 %v6111_v38  ;;  %v6169_v38 = vld [vmem:[#allocation5 + $0x68] ss:$36 sps:$4 sm:$0xff]  }
  0xe4   : > { %1064 = vmatmul.mubr.bf16.gmra.mrb[4].mxu0 %v6925_v39  ;;  %1297 = vmatmul.mubr.bf16.gmra.mrb[4].mxu1 %v6928_v40 }
  0xe5   : > { %1073 = vmatprep.mubr.bf16.mxu0 %v9781_v0  ;;  %1306 = vmatprep.mubr.bf16.mxu1 %v9781_v0 }
  0xe6   : > { %1219 = vmatpush1.bf16.msra.mxu0 %v6876_v12  ;;  %1604 = vmatprep.subr.bf16.mxu1 %v6118_v41  ;;  %v6174_v12 = vld [vmem:[#allocation10 + $0x20] sm:$0xff]  }
  0xe7   : > { %1220 = vmatprep.subr.bf16.mxu0 %v6880_v14  ;;  %1605 = vmatpush1.bf16.msra.mxu1 %v6116_v42  ;;  %v6177_v14 = vld [vmem:[#allocation10 + $0x28] sm:$0xff]  }
  0xe8   : > { %1606 = vmatprep.subr.bf16.mxu1 %v6122_v43  ;;  %v6172_v41 = vld [vmem:[#allocation5 + $0xb0] ss:$36 sps:$4 sm:$0xff]   ;;  %v6175_v42 = vld [vmem:[#allocation5 + $0xf8] ss:$36 sps:$4 sm:$0xff]   ;;  %v6183_v43 = vld [vmem:[#allocation5 + $0x188] ss:$36 sps:$4 sm:$0xff]  }
  0xea   : > { %1221 = vmatpush1.bf16.msra.mxu0 %v6883_v16  ;;  %v6179_v16 = vld [vmem:[#allocation10 + $0x30] sm:$0xff]  }
  0xeb   : > { %1222 = vmatprep.subr.bf16.mxu0 %v6886_v18  ;;  %1607 = vmatpush1.bf16.msra.mxu1 %v6120_v44  ;;  %v6181_v18 = vld [vmem:[#allocation10 + $0x38] sm:$0xff]   ;;  %v512_v44 = vlaneseq }
  0xec   : > { %1074 = vmatmul.mubr.bf16.gmra.mrb[8].mxu0 %v6939_v45  ;;  %1307 = vmatmul.mubr.bf16.gmra.mrb[8].mxu1 %v6942_v46 }
  0xed   : > { %1083 = vmatprep.mubr.bf16.mxu0 %v9781_v0  ;;  %1316 = vmatprep.mubr.bf16.mxu1 %v9781_v0 }
  0xee   : > { %1223 = vmatpush1.bf16.msra.mxu0 %v6888_v20  ;;  %1608 = vmatprep.subr.bf16.mxu1 %v6127_v47  ;;  %v6145_v20 = vld [vmem:[#allocation5 + $0x5c] ss:$36 sps:$4 sm:$0xff]  }
  0xef   : > { %1224 = vmatprep.subr.bf16.mxu0 %v6892_v22  ;;  %1609 = vmatpush1.bf16.msra.mxu1 %v6125_v48  ;;  %v6185_v22 = vld [vmem:[#allocation10 + $0x140] sm:$0xff]   ;;  %v6187_v47 = vld [vmem:[#allocation5 + $0x218] ss:$36 sps:$4 sm:$0xff]  }
  0xf0   : > { %1610 = vmatprep.subr.bf16.mxu1 %v6130_v49  ;;  %v6194_v48 = vld [vmem:[#allocation10 + $0xc0] sm:$0xff]  }
  0xf2   : > { %1225 = vmatpush1.bf16.msra.mxu0 %v6895_v24  ;;  %v6146_v24 = vld [vmem:[#allocation5 + $0xa0] ss:$36 sps:$4 sm:$0xff]  }
  0xf3   : > { %1611 = vmatpush1.bf16.msra.mxu1 %v6128_v51  ;;  %1226 = vmatprep.subr.bf16.mxu0 %v6898_v26  ;;  %v6149_v26 = vld [vmem:[#allocation5 + $0xe8] ss:$36 sps:$4 sm:$0xff]   ;;  %v7074_v51 = vld [vmem:[#allocation7] sm:$0xff] }
  0xf4   : > { %1084 = vmatmul.mubr.bf16.gmra.mrb[12].mxu0 %v6951_v50  ;;  %1317 = vmatmul.mubr.bf16.gmra.mrb[12].mxu1 %v6956_v52 }
  0xf5   : > { %1093 = vmatprep.mubr.bf16.mxu0 %v9781_v0  ;;  %1326 = vmatprep.mubr.bf16.mxu1 %v9781_v0 }
  0xf6   : > { %1612 = vmatprep.subr.bf16.mxu1 %v6134_v53  ;;  %1227 = vmatpush1.bf16.msra.mxu0 %v6900_v28  ;;  %v6152_v28 = vld [vmem:[#allocation5 + $0x130] ss:$36 sps:$4 sm:$0xff]  }
  0xf7   : > { %1613 = vmatpush1.bf16.msra.mxu1 %v6132_v54  ;;  %1228 = vmatprep.subr.bf16.mxu0 %v6904_v30  ;;  %v6157_v30 = vld [vmem:[#allocation5 + $0x178] ss:$36 sps:$4 sm:$0xff]   ;;  %v7083_v53 = vld [vmem:[#allocation8 + $0x24] sm:$0xff] }
  0xf8   : > { %1614 = vmatprep.subr.bf16.mxu1 %v6137_v55  ;;  %v7085_v54 = vld [vmem:[#allocation8 + $0x48] sm:$0xff] }
  0xfa   : > { %1229 = vmatpush1.bf16.msra.mxu0 %v6907_v32  ;;  %v6160_v32 = vld [vmem:[#allocation5 + $0x1c0] ss:$36 sps:$4 sm:$0xff]  }
  0xfb   : > { %1615 = vmatpush1.bf16.msra.mxu1 %v6135_v57  ;;  %1407 = vmatprep.subr.bf16.mxu0 %v6140_v58  ;;  %v7092_v57 = vld [vmem:[#allocation8 + $0x90] sm:$0xff] }
  0xfc   : > { %1094 = vmatmul.mubr.bf16.gmra.mrb[16].mxu0 %v6914_v34  ;;  %1327 = vmatmul.mubr.bf16.gmra.mrb[16].mxu1 %v6965_v56 }
  0xfd   : > { %1103 = vmatprep.mubr.bf16.mxu0 %v9781_v0  ;;  %1336 = vmatprep.mubr.bf16.mxu1 %v9781_v0 }
  0xfe   : > { %5194 = vmatprep.subr.bf16.mxu1 %v6141_v59  ;;  %v7257_v59 = vld [vmem:[#allocation8 + $0x33c] sm:$0xff] }
  0xff   : > { %10019 = vst [vmem:[#allocation31_spill] sm:$0xff] %v7257_v59 }
 0x104   : > { %1104 = vmatmul.mubr.bf16.gmra.mrb[20].mxu0 %v6928_v40  ;;  %1337 = vmatmul.mubr.bf16.gmra.mrb[20].mxu1 %v6975_v60 }
 0x105   : > { %1113 = vmatprep.mubr.bf16.mxu0 %v9781_v0  ;;  %1346 = vmatprep.mubr.bf16.mxu1 %v9781_v0 }
 0x10c   : > { %1114 = vmatmul.mubr.bf16.gmra.mrb[24].mxu0 %v6942_v46  ;;  %1347 = vmatmul.mubr.bf16.gmra.mrb[24].mxu1 %v6982_v61 }
 0x10d   : > { %1123 = vmatprep.mubr.bf16.mxu0 %v9781_v0  ;;  %1356 = vmatprep.mubr.bf16.mxu1 %v9781_v0 }
 0x114   : > { %1124 = vmatmul.mubr.bf16.gmra.mrb[28].mxu0 %v6956_v52  ;;  %1357 = vmatmul.mubr.bf16.gmra.mrb[28].mxu1 %v6989_v62 }
 0x115   : > { %1133 = vmatprep.mubr.bf16.mxu0 %v9781_v0  ;;  %1366 = vmatprep.mubr.bf16.mxu1 %v9781_v0 }
 0x11c   : > { %1134 = vmatmul.mubr.bf16.gmra.mrb[32].mxu0 %v6965_v56  ;;  %1367 = vmatmul.mubr.bf16.gmra.mrb[32].mxu1 %v6996_v63 }
 0x11d   : > { %1143 = vmatprep.mubr.bf16.mxu0 %v9781_v0  ;;  %1376 = vmatprep.mubr.bf16.mxu1 %v9781_v0 }
 0x124   : > { %1144 = vmatmul.mubr.bf16.gmra.mrb[36].mxu0 %v6975_v60  ;;  %1377 = vmatmul.mubr.bf16.gmra.mrb[36].mxu1 %v7003_v1 }
 0x125   : > { %1153 = vmatprep.mubr.bf16.mxu0 %v9781_v0  ;;  %1386 = vmatprep.mubr.bf16.mxu1 %v9781_v0 }
 0x12c   : > { %1154 = vmatmul.mubr.bf16.gmra.mrb[40].mxu0 %v6982_v61  ;;  %1387 = vmatmul.mubr.bf16.gmra.mrb[40].mxu1 %v7010_v2 }
 0x12d   : > { %1163 = vmatprep.mubr.bf16.mxu0 %v9781_v0  ;;  %1396 = vmatprep.mubr.bf16.mxu1 %v9781_v0 }
 0x134   : > { %1164 = vmatmul.mubr.bf16.gmra.mrb[44].mxu0 %v6989_v62  ;;  %1397 = vmatmul.mubr.bf16.gmra.mrb[44].mxu1 %v7017_v3 }
 0x135   : > { %1173 = vmatprep.mubr.bf16.mxu0 %v9781_v0  ;;  %1632 = vmatprep.mubr.bf16.mxu1 %v9781_v0 }
 0x13c   : > { %1174 = vmatmul.mubr.bf16.gmra.mrb[48].mxu0 %v6996_v63  ;;  %1633 = vmatmul.mubr.bf16.vlgmr.msra.gmra.mrb[48].mxu1 %v6911_v33 }
 0x13d   : > { %1183 = vmatprep.mubr.bf16.mxu0 %v9781_v0  ;;  %1642 = vmatprep.mubr.bf16.mxu1 %v9781_v0 }
 0x13e   : > { %5195 = vmatpush3.bf16.msra.mxu1 %v6142_v4  ;;  %v7255_v4 = vld [vmem:[#allocation8 + $0x368] sm:$0xff] }
 0x13f   : > { %5196 = vmatprep.subr.bf16.mxu1 %v6155_v5  ;;  %10018 = vst [vmem:[#allocation30_spill] sm:$0xff] %v7255_v4 }
 0x142   : > { %5197 = vmatpush3.bf16.msra.mxu1 %v6156_v6 }
 0x143   : > { %5198 = vmatprep.subr.bf16.mxu1 %v6167_v7  ;;  %v7108_v7 = vld [vmem:[#allocation8 + $0xfc] sm:$0xff] }
 0x144   : > { %1184 = vmatmul.mubr.bf16.gmra.mrb[52].mxu0 %v7003_v1  ;;  %1643 = vmatmul.mubr.bf16.gmra.mrb[52].mxu1 %v6925_v39 }
 0x145   : > { %1193 = vmatprep.mubr.bf16.mxu0 %v9781_v0  ;;  %1652 = vmatprep.mubr.bf16.mxu1 %v9781_v0 }
 0x146   : > { %5199 = vmatpush3.bf16.msra.mxu1 %v6168_v8 }
 0x147   : > { %5200 = vmatprep.subr.bf16.mxu1 %v6170_v9 }
 0x14a   : > { %5201 = vmatpush3.bf16.msra.mxu1 %v6171_v10 }
 0x14b   : > { %5202 = vmatprep.subr.bf16.mxu1 %v6173_v11 }
 0x14c   : > { %1194 = vmatmul.mubr.bf16.gmra.mrb[56].mxu0 %v7010_v2  ;;  %1653 = vmatmul.mubr.bf16.gmra.mrb[56].mxu1 %v6939_v45 }
 0x14d   : > { %1203 = vmatprep.mubr.bf16.mxu0 %v9781_v0  ;;  %1662 = vmatprep.mubr.bf16.mxu1 %v9781_v0 }
 0x14e   : > { %5203 = vmatpush3.bf16.msra.mxu1 %v6174_v12  ;;  %v7114_v12 = vld [vmem:[#allocation8 + $0x120] sm:$0xff] }
 0x14f   : > { %5204 = vmatprep.subr.bf16.mxu1 %v6176_v13  ;;  %v7116_v13 = vld [vmem:[#allocation8 + $0x128] sm:$0xff] }
 0x152   : > { %5205 = vmatpush3.bf16.msra.mxu1 %v6177_v14  ;;  %v7118_v14 = vld [vmem:[#allocation8 + $0x14c] sm:$0xff] }
 0x153   : > { %5206 = vmatprep.subr.bf16.mxu1 %v6178_v15 }
 0x154   : > { %1204 = vmatmul.mubr.bf16.gmra.mrb[60].mxu0 %v7017_v3  ;;  %1663 = vmatmul.mubr.bf16.gmra.mrb[60].mxu1 %v6951_v50 }
 0x155   : > { %1246 = vmatprep.mubr.bf16.mxu0 %v9781_v0  ;;  %1672 = vmatprep.mubr.bf16.mxu1 %v9781_v0 }
 0x156   : > { %5207 = vmatpush3.bf16.msra.mxu1 %v6179_v16  ;;  %v7230_v16 = vld [vmem:[#allocation8 + $0x2f4] sm:$0xff] }
 0x157   : > { %5208 = vmatprep.subr.bf16.mxu1 %v6180_v17  ;;  %10015 = vst [vmem:[#allocation27_spill] sm:$0xff] %v7230_v16 }
 0x15a   : > { %5209 = vmatpush3.bf16.msra.mxu1 %v6181_v18 }
 0x15b   : > { %5418 = vmatprep.subr.bf16.mxu1 %v6185_v22  ;;  %v7194_v22 = vld [vmem:[#allocation8 + $0x288] sm:$0xff] }
 0x15c   : > { %1247 = vmatmul.mubr.bf16.vlgmr.msra.gmra.mrb[64].mxu0 %v6911_v33  ;;  %1673 = vmatmul.mubr.bf16.gmra.mrb[64].mxu1 %v6914_v34  ;;  %10007 = vst [vmem:[#allocation19_spill] sm:$0xff] %v7194_v22 }
 0x15d   : > { %1408 = vmatpush1.bf16.msra.mxu0 %v6138_v19  ;;  %1256 = vmatprep.mubr.bf16.mxu0 %v9781_v0  ;;  %v7124_v19 = vld [vmem:[#allocation8 + $0x144] sm:$0xff] }
 0x15e   : > { %1409 = vmatprep.subr.bf16.mxu0 %v6145_v20  ;;  %1682 = vmatprep.mubr.bf16.mxu1 %v9781_v0 }
 0x161   : > { %1410 = vmatpush1.bf16.msra.mxu0 %v6143_v21 }
 0x162   : > { %1411 = vmatprep.subr.bf16.mxu0 %v6148_v23  ;;  %v7202_v23 = vld [vmem:[#allocation8 + $0x2d8] sm:$0xff] }
 0x163   : > { %10009 = vst [vmem:[#allocation21_spill] sm:$0xff] %v7202_v23  ;;  %v6253_v23 = vld [vmem:[%s6843_s17 + $0x50] sm:$0xff]  }
 0x164   : > { %1257 = vmatmul.mubr.bf16.gmra.mrb[68].mxu0 %v6925_v39  ;;  %1683 = vmatmul.mubr.bf16.gmra.mrb[68].mxu1 %v6928_v40 }
 0x165   : > { %1412 = vmatpush1.bf16.msra.mxu0 %v6146_v24  ;;  %1266 = vmatprep.mubr.bf16.mxu0 %v9781_v0  ;;  %v7132_v24 = vld [vmem:[#allocation8 + $0x168] sm:$0xff] }
 0x166   : > { %1413 = vmatprep.subr.bf16.mxu0 %v6151_v25  ;;  %1692 = vmatprep.mubr.bf16.mxu1 %v9781_v0  ;;  %v7134_v25 = vld [vmem:[#allocation8 + $0x170] sm:$0xff] }
 0x169   : > { %1414 = vmatpush1.bf16.msra.mxu0 %v6149_v26  ;;  %v7136_v26 = vld [vmem:[#allocation8 + $0x194] sm:$0xff] }
 0x16a   : > { %1415 = vmatprep.subr.bf16.mxu0 %v6154_v27 }
 0x16c   : > { %1267 = vmatmul.mubr.bf16.gmra.mrb[72].mxu0 %v6939_v45  ;;  %1693 = vmatmul.mubr.bf16.gmra.mrb[72].mxu1 %v6942_v46 }
 0x16d   : > { %1416 = vmatpush1.bf16.msra.mxu0 %v6152_v28  ;;  %1276 = vmatprep.mubr.bf16.mxu0 %v9781_v0  ;;  %v7222_v28 = vld [vmem:[#allocation8 + $0x1dc] sm:$0xff] }
 0x16e   : > { %1417 = vmatprep.subr.bf16.mxu0 %v6159_v29  ;;  %1702 = vmatprep.mubr.bf16.mxu1 %v9781_v0  ;;  %v7144_v29 = vld [vmem:[#allocation8 + $0x18c] sm:$0xff]  ;;  %10013 = vst [vmem:[#allocation25_spill] sm:$0xff] %v7222_v28 }
 0x171   : > { %1418 = vmatpush1.bf16.msra.mxu0 %v6157_v30  ;;  %v7146_v30 = vld [vmem:[#allocation8 + $0x1b0] sm:$0xff] }
 0x172   : > { %1419 = vmatprep.subr.bf16.mxu0 %v6162_v31 }
 0x174   : > { %1277 = vmatmul.mubr.bf16.gmra.mrb[76].mxu0 %v6951_v50  ;;  %1703 = vmatmul.mubr.bf16.gmra.mrb[76].mxu1 %v6956_v52 }
 0x175   : > { %1420 = vmatpush1.bf16.msra.mxu0 %v6160_v32  ;;  %1439 = vmatprep.mubr.bf16.mxu0 %v9781_v0 }
 0x176   : > { %1421 = vmatprep.subr.bf16.mxu0 %v6165_v35  ;;  %1712 = vmatprep.mubr.bf16.mxu1 %v9781_v0  ;;  %v7154_v35 = vld [vmem:[#allocation8 + $0x1d4] sm:$0xff] }
 0x179   : > { %1422 = vmatpush1.bf16.msra.mxu0 %v6163_v36  ;;  %v7156_v36 = vld [vmem:[#allocation8 + $0x1f8] sm:$0xff] }
 0x17a   : > { %5690 = vmatprep.subr.bf16.mxu0 %v6166_v37 }
 0x17c   : > { %1440 = vmatmul.mubr.bf16.vlgmr.msra.gmra.mrb[80].mxu0 %v6911_v33  ;;  %1713 = vmatmul.mubr.bf16.gmra.mrb[80].mxu1 %v6965_v56  ;;  %v6182_v33 = vld [vmem:[#allocation5 + $0x140] ss:$36 sps:$4 sm:$0xff]   ;;  %v7090_v56 = vld [vmem:[#allocation8 + $0x6c] sm:$0xff] }
 0x17d   : > { %5691 = vmatpush3.bf16.msra.mxu0 %v6166_v37  ;;  %1449 = vmatprep.mubr.bf16.mxu0 %v9781_v0  ;;  %v7228_v37 = vld [vmem:[#allocation8 + $0x320] sm:$0xff] }
 0x17e   : > { %1722 = vmatprep.mubr.bf16.mxu1 %v9781_v0  ;;  %5692 = vmatprep.subr.bf16.mxu0 %v6169_v38  ;;  %10014 = vst [vmem:[#allocation26_spill] sm:$0xff] %v7228_v37  ;;  %v10021_v37 = vmov 0  }
 0x181   : > { %5693 = vmatpush3.bf16.msra.mxu0 %v6169_v38 }
 0x182   : > { %5694 = vmatprep.subr.bf16.mxu0 %v6172_v41 }
 0x184   : > { %1450 = vmatmul.mubr.bf16.gmra.mrb[84].mxu0 %v6925_v39  ;;  %1723 = vmatmul.mubr.bf16.gmra.mrb[84].mxu1 %v6975_v60  ;;  %v6184_v39 = vld [vmem:[#allocation5 + $0x1d0] ss:$36 sps:$4 sm:$0xff]   ;;  %v7099_v60 = vld [vmem:[#allocation8 + $0xb4] sm:$0xff] }
 0x185   : > { %1459 = vmatprep.mubr.bf16.mxu0 %v9781_v0  ;;  %1732 = vmatprep.mubr.bf16.mxu1 %v9781_v0 }
 0x186   : > { %5695 = vmatpush3.bf16.msra.mxu0 %v6172_v41  ;;  %v7178_v41 = vld [vmem:[#allocation8 + $0x240] sm:$0xff] }
 0x187   : > { %5696 = vmatprep.subr.bf16.mxu0 %v6175_v42 }
 0x18a   : > { %5697 = vmatpush3.bf16.msra.mxu0 %v6175_v42 }
 0x18b   : > { %5698 = vmatprep.subr.bf16.mxu0 %v6182_v33 }
 0x18c   : > { %1460 = vmatmul.mubr.bf16.gmra.mrb[88].mxu0 %v6939_v45  ;;  %1733 = vmatmul.mubr.bf16.gmra.mrb[88].mxu1 %v6982_v61  ;;  %v7071_v45 = vshrl.u32 %v512_v44, 7  ;;  %v7180_v44 = vld [vmem:[#allocation8 + $0x264] sm:$0xff] }
 0x18d   : > { %1469 = vmatprep.mubr.bf16.mxu0 %v9781_v0  ;;  %1742 = vmatprep.mubr.bf16.mxu1 %v9781_v0 }
 0x18e   : > { %5699 = vmatpush3.bf16.msra.mxu0 %v6182_v33  ;;  %v514_v49 = vsub.s32 0, %v7071_v45  ;;  %v518_v52 = vsub.s32 1, %v7071_v45  ;;  %v522_v61 = vsub.s32 2, %v7071_v45  ;;  %v526_v6 = vsub.s32 3, %v7071_v45  ;;  %v7162_v33 = vld [vmem:[#allocation8 + $0x21c] sm:$0xff] }
 0x18f   : > { %5700 = vmatprep.subr.bf16.mxu0 %v6183_v43 }
 0x190   : > { %v7088_v55 = vrot.slane %v7074_v51, %v514_v49  ;;  %v7096_v58 = vrot.slane %v7074_v51, %v518_v52  ;;  %v7127_v20 = vrot.slane %v7074_v51, %v522_v61  ;;  %v7141_v27 = vrot.slane %v7074_v51, %v526_v6  ;;  %v7170_v52 = vld [vmem:[#allocation8 + $0x248] sm:$0xff]  ;;  %v7214_v6 = vld [vmem:[#allocation8 + $0x1b8] sm:$0xff] }
 0x191   : > { %v7172_v61 = vld [vmem:[#allocation8 + $0x26c] sm:$0xff]  ;;  %10012 = vst [vmem:[#allocation24_spill] sm:$0xff] %v7214_v6 }
 0x192   : > { %5701 = vmatpush3.bf16.msra.mxu0 %v6183_v43  ;;  %v7204_v43 = vld [vmem:[#allocation8 + $0x2fc] sm:$0xff] }
 0x193   : > { %5702 = vmatprep.subr.bf16.mxu0 %v6184_v39  ;;  %10010 = vst [vmem:[#allocation22_spill] sm:$0xff] %v7204_v43  ;;  %v6251_v43 = vld [vmem:[%s6843_s17 + $0x40] sm:$0xff]  }
 0x194   : > { %1470 = vmatmul.mubr.bf16.gmra.mrb[92].mxu0 %v6951_v50  ;;  %1743 = vmatmul.mubr.bf16.gmra.mrb[92].mxu1 %v6989_v62  ;;  %v7079_v50 = vld [vmem:[#allocation8] sm:$0xff]  ;;  %v7102_v62 = vld [vmem:[#allocation8 + $0xd8] sm:$0xff] }
 0x195   : > { %1479 = vmatprep.mubr.bf16.mxu0 %v9781_v0  ;;  %1752 = vmatprep.mubr.bf16.mxu1 %v9781_v0 }
 0x196   : > { %5703 = vmatpush3.bf16.msra.mxu0 %v6184_v39  ;;  %v7212_v39 = vld [vmem:[#allocation8 + $0x2d0] sm:$0xff] }
 0x197   : > { %5704 = vmatprep.subr.bf16.mxu0 %v6187_v47  ;;  %10011 = vst [vmem:[#allocation23_spill] sm:$0xff] %v7212_v39 }
 0x19a   : > { %5705 = vmatpush3.bf16.msra.mxu0 %v6187_v47  ;;  %v7196_v47 = vld [vmem:[#allocation8 + $0x2ac] sm:$0xff] }
 0x19b   : > { %5306 = vmatprep.subr.bf16.mxu0 %v6194_v48  ;;  %v7184_v48 = vld [vmem:[#allocation8 + $0x290] sm:$0xff]  ;;  %10008 = vst [vmem:[#allocation20_spill] sm:$0xff] %v7196_v47 }
 0x19c   : > { %1480 = vmatmul.mubr.bf16.gmra.mrb[96].mxu0 %v6914_v34  ;;  %1753 = vmatmul.mubr.bf16.gmra.mrb[96].mxu1 %v6996_v63  ;;  %v6250_v34 = vld [vmem:[%s6843_s17 + $0x38] sm:$0xff]  }
 0x19d   : > { %1489 = vmatprep.mubr.bf16.mxu0 %v9781_v0  ;;  %1762 = vmatprep.mubr.bf16.mxu1 %v9781_v0 }
 0x1a4   : > { %1490 = vmatmul.mubr.bf16.gmra.mrb[100].mxu0 %v6928_v40  ;;  %1763 = vmatmul.mubr.bf16.gmra.mrb[100].mxu1 %v7003_v1  ;;  %v7186_v40 = vld [vmem:[#allocation8 + $0x2b4] sm:$0xff]  ;;  %v7235_v1 = vld [vmem:[#allocation8 + $0x344] sm:$0xff] }
 0x1a5   : > { %1499 = vmatprep.mubr.bf16.mxu0 %v9781_v0  ;;  %1772 = vmatprep.mubr.bf16.mxu1 %v9781_v0  ;;  %10016 = vst [vmem:[#allocation28_spill] sm:$0xff] %v7235_v1 }
 0x1ac   : > { %1500 = vmatmul.mubr.bf16.gmra.mrb[104].mxu0 %v6942_v46  ;;  %1773 = vmatmul.mubr.bf16.gmra.mrb[104].mxu1 %v7010_v2 }
 0x1ad   : > { %1509 = vmatprep.mubr.bf16.mxu0 %v9781_v0  ;;  %1782 = vmatprep.mubr.bf16.mxu1 %v9781_v0  ;;  %v7281_v0 = vld [vmem:[#allocation8 + $0x384] sm:$0xff] }
 0x1ae   : > { %10025 = vst [vmem:[#allocation34_spill] sm:$0xff] %v7281_v0 }
 0x1af   : > { %v1055_v46 = vpop.f32.mrb[0].mxu0  ;;  %v7232_v2 = vpop.f32.mrb[0].mxu1 }
 0x1b0   : > { %v1056_v18 = vadd.f32 %v1055_v46, %v7088_v55  ;;  %v1057_v38 = vpop.f32.mrb[1].mxu0  ;;  %v1290_v17 = vpop.f32.mrb[1].mxu1  ;;  %v7250_v46 = vld [vmem:[#allocation8 + $0x318] sm:$0xff] }
 0x1b1   : > { %v1058_v42 = vadd.f32 %v1057_v38, %v7096_v58  ;;  %v1059_v10 = vpop.f32.mrb[2].mxu0  ;;  %v7245_v5 = vpop.f32.mrb[2].mxu1  ;;  %10017 = vst [vmem:[#allocation29_spill] sm:$0xff] %v7250_v46  ;;  %v1291_v49 = vadd.f32 %v1290_v17, %v7141_v27  ;;  %v7271_v17 = vld [vmem:[#allocation8 + $0x38c] sm:$0xff]  ;;  %v10024_v38 = vunpack.c.l.bf16 %v7083_v53 }
 0x1b2   : > { %v1954_v32 = vmax.f32 %v1056_v18, 0.0  ;;  %v1060_v11 = vadd.f32 %v1059_v10, %v7088_v55  ;;  %v1061_v9 = vpop.f32.mrb[3].mxu0  ;;  %v1294_v31 = vpop.f32.mrb[3].mxu1  ;;  %v7262_v18 = vld [vmem:[#allocation8 + $0x360] sm:$0xff]  ;;  %10022 = vst [vmem:[#allocation33_spill] sm:$0xff] %v7271_v17 }
 0x1b3   : > { %v1955_v15 = vmax.f32 %v1058_v42, 0.0  ;;  %v1062_v21 = vadd.f32 %v1061_v9, %v7096_v58  ;;  %v1295_v63 = vadd.f32 %v1294_v31, %v7141_v27  ;;  %10020 = vst [vmem:[#allocation32_spill] sm:$0xff] %v7262_v18  ;;  %v10026_v9 = vunpack.c.h.bf16 %v7079_v50 }
 0x1b4   : > { %v1963_v10 = vmax.f32 %v1060_v11, 0.0  ;;  %1510 = vmatmul.mubr.bf16.gmra.mrb[108].mxu0 %v6250_v34  ;;  %1783 = vmatmul.mubr.bf16.gmra.mrb[108].mxu1 %v7017_v3  ;;  %v10023_v34 = vunpack.c.l.bf16 %v7079_v50  ;;  %v10027_v31 = vunpack.c.h.bf16 %v7083_v53  ;;  %v2029_v11 = vmax.f32 %v1291_v49, 0.0  ;;  %v6188_v50 = vld [vmem:[#allocation10 + $0x148] sm:$0xff]  }
 0x1b5   : > { %v1964_v42 = vmax.f32 %v1062_v21, 0.0  ;;  %1519 = vmatprep.mubr.bf16.mxu0 %v10021_v37  ;;  %v2691_v16 = vmul.f32 %v10026_v9, %v1955_v15  ;;  %v2038_v59 = vmax.f32 %v1295_v63, 0.0  ;;  %v6186_v9 = vld [vmem:[#allocation10 + $0x100] sm:$0xff]   ;;  %v7306_v15 = vld [vmem:[#allocation8 + $0x3b0] sm:$0xff]  ;;  %v10035_v18 = vunpack.c.h.bf16 %v7118_v14 }
 0x1b6   : > { %v2690_v3 = vmul.f32 %v10023_v34, %v1954_v32  ;;  %v2699_v1 = vmul.f32 %v10024_v38, %v1963_v10  ;;  %v7289_v32 = vld [vmem:[#allocation8 + $0x200] sm:$0xff]  ;;  %10030 = vst [vmem:[#allocation37_spill] sm:$0xff] %v7306_v15  ;;  %v10042_v15 = vunpack.c.h.bf16 %v7090_v56 }
 0x1b7   : > { %v1065_v46 = vpop.f32.mrb[4].mxu0  ;;  %v2700_v39 = vmul.f32 %v10027_v31, %v1964_v42  ;;  %v7287_v28 = vpop.f32.mrb[4].mxu1  ;;  %10028 = vst [vmem:[#allocation35_spill] sm:$0xff] %v7289_v32  ;;  %v7291_v38 = vld [vmem:[#allocation8 + $0x224] sm:$0xff]  ;;  %v7321_v47 = vmul.f32 %v10035_v18, %v2038_v59  ;;  %v10041_v59 = vunpack.c.h.bf16 %v7085_v54 }
 0x1b8   : > { %10029 = vst [vmem:[#allocation36_spill] sm:$0xff] %v7291_v38  ;;  %v2978_v10 = vpack.c.bf16 %v2699_v1, %v2690_v3  ;;  %v1066_v34 = vadd.f32 %v1065_v46, %v7088_v55  ;;  %v1067_v21 = vpop.f32.mrb[5].mxu0  ;;  %v7294_v8 = vpop.f32.mrb[5].mxu1 }
 0x1b9   : > { %v1068_v53 = vadd.f32 %v1067_v21, %v7096_v58  ;;  %v1069_v49 = vpop.f32.mrb[6].mxu0  ;;  %v2979_v63 = vpack.c.bf16 %v2700_v39, %v2691_v16  ;;  %v7299_v42 = vpop.f32.mrb[6].mxu1  ;;  %v7308_v21 = vld [vmem:[#allocation8 + $0x3a8] sm:$0xff]  ;;  %10036 = vst [vmem:[#allocation41_spill] sm:$0xff] %v7321_v47  ;;  %v7339_v16 = vld [vmem:[#allocation8 + $0x3f8] sm:$0xff] }
 0x1ba   : > { %v1972_v3 = vmax.f32 %v1066_v34, 0.0  ;;  %v1070_v46 = vadd.f32 %v1069_v49, %v7088_v55  ;;  %v1071_v4 = vpop.f32.mrb[7].mxu0  ;;  %v7304_v6 = vpop.f32.mrb[7].mxu1  ;;  %10031 = vst [vmem:[#allocation38_spill] sm:$0xff] %v7308_v21  ;;  %v7313_v34 = vld [vmem:[#allocation8 + $0x3d4] sm:$0xff]  ;;  %v10033_v49 = vunpack.c.h.bf16 %v7116_v13  ;;  %10040 = vst [vmem:[#allocation43_spill] sm:$0xff] %v7339_v16 }
 0x1bb   : > { %v1973_v17 = vmax.f32 %v1068_v53, 0.0  ;;  %v1072_v31 = vadd.f32 %v1071_v4, %v7096_v58  ;;  %3737 = vmatprep.mubr.bf16.mxu1 %v2979_v63  ;;  %10032 = vst [vmem:[#allocation39_spill] sm:$0xff] %v7313_v34  ;;  %v10039_v53 = vunpack.c.l.bf16 %v7090_v56  ;;  %v6191_v34 = vld [vmem:[#allocation10 + $0x110] sm:$0xff]   ;;  %v7378_v47 = vld [vmem:[#allocation8 + $0x438] sm:$0xff] }
 0x1bc   : > { %v7317_v1 = vmul.f32 %v10033_v49, %v2029_v11  ;;  %v1981_v22 = vmax.f32 %v1070_v46, 0.0  ;;  %1520 = vmatmul.mubr.bf16.gmra.mrb[112].mxu0 %v6251_v43  ;;  %3738 = vmatmul.mubr.bf16.vlgmr.msra.gmra.mrb[112].mxu1 %v2978_v10  ;;  %v6189_v11 = vld [vmem:[#allocation10 + $0x108] sm:$0xff]   ;;  %v10038_v43 = vunpack.c.l.bf16 %v7085_v54  ;;  %10047 = vst [vmem:[#allocation48_spill] sm:$0xff] %v7378_v47 }
 0x1bd   : > { %v1982_v63 = vmax.f32 %v1072_v31, 0.0  ;;  %1529 = vmatprep.mubr.bf16.mxu0 %v10021_v37  ;;  %5419 = vmatpush3.bf16.msra.mxu1 %v6186_v9  ;;  %v7331_v46 = vld [vmem:[#allocation8 + $0x3cc] sm:$0xff]  ;;  %v2709_v18 = vmul.f32 %v10041_v59, %v1973_v17 }
 0x1be   : > { %10034 = vst [vmem:[#allocation40_spill] sm:$0xff] %v7317_v1  ;;  %10037 = vst [vmem:[#allocation42_spill] sm:$0xff] %v7331_v46  ;;  %v2708_v10 = vmul.f32 %v10038_v43, %v1972_v3  ;;  %v2717_v39 = vmul.f32 %v10039_v53, %v1981_v22  ;;  %5420 = vmatprep.subr.bf16.mxu1 %v6188_v50  ;;  %v6190_v31 = vld [vmem:[#allocation10 + $0x150] sm:$0xff]   ;;  %v7350_v50 = vld [vmem:[#allocation8 + $0x41c] sm:$0xff]  ;;  %v10052_v46 = vunpack.c.h.bf16 %v7099_v60 }
 0x1bf   : > { %v1075_v49 = vpop.f32.mrb[8].mxu0  ;;  %v2718_v0 = vmul.f32 %v10042_v15, %v1982_v63  ;;  %v7345_v38 = vpop.f32.mrb[8].mxu1  ;;  %v7348_v22 = vld [vmem:[#allocation8 + $0x3f0] sm:$0xff]  ;;  %10044 = vst [vmem:[#allocation45_spill] sm:$0xff] %v7350_v50  ;;  %v10051_v50 = vunpack.c.h.bf16 %v7092_v57 }
 0x1c0   : > { %10043 = vst [vmem:[#allocation44_spill] sm:$0xff] %v7348_v22  ;;  %v1076_v43 = vadd.f32 %v1075_v49, %v7088_v55  ;;  %v1077_v9 = vpop.f32.mrb[9].mxu0  ;;  %v2987_v4 = vpack.c.bf16 %v2717_v39, %v2708_v10  ;;  %v7355_v54 = vpop.f32.mrb[9].mxu1  ;;  %v7364_v1 = vld [vmem:[#allocation8 + $0x414] sm:$0xff] }
 0x1c1   : > { %v1078_v15 = vadd.f32 %v1077_v9, %v7096_v58  ;;  %v1079_v63 = vpop.f32.mrb[10].mxu0  ;;  %v2988_v59 = vpack.c.bf16 %v2718_v0, %v2709_v18  ;;  %v7360_v3 = vpop.f32.mrb[10].mxu1  ;;  %5421 = vmatpush3.bf16.msra.mxu1 %v6189_v11  ;;  %10045 = vst [vmem:[#allocation46_spill] sm:$0xff] %v7364_v1  ;;  %v6192_v9 = vld [vmem:[#allocation10 + $0x158] sm:$0xff]   ;;  %v7371_v18 = vld [vmem:[#allocation8 + $0x440] sm:$0xff]  ;;  %v10050_v11 = vunpack.c.l.bf16 %v7099_v60 }
 0x1c2   : > { %v1990_v39 = vmax.f32 %v1076_v43, 0.0  ;;  %v1080_v10 = vadd.f32 %v1079_v63, %v7088_v55  ;;  %v1081_v56 = vpop.f32.mrb[11].mxu0  ;;  %v7367_v17 = vpop.f32.mrb[11].mxu1  ;;  %5422 = vmatprep.subr.bf16.mxu1 %v6190_v31  ;;  %10046 = vst [vmem:[#allocation47_spill] sm:$0xff] %v7371_v18  ;;  %v1289_v43 = vadd.f32 %v7232_v2, %v7127_v20  ;;  %v1293_v63 = vadd.f32 %v7245_v5, %v7127_v20  ;;  %v7380_v31 = vld [vmem:[#allocation8 + $0x464] sm:$0xff]  ;;  %v6193_v2 = vld [vmem:[#allocation10 + $0x118] sm:$0xff]  }
 0x1c3   : > { %v1991_v53 = vmax.f32 %v1078_v15, 0.0  ;;  %v1082_v49 = vadd.f32 %v1081_v56, %v7096_v58  ;;  %3745 = vmatprep.mubr.bf16.mxu1 %v2988_v59  ;;  %10048 = vst [vmem:[#allocation49_spill] sm:$0xff] %v7380_v31  ;;  %v6252_v0 = vld [vmem:[%s6843_s17 + $0x48] sm:$0xff]   ;;  %v10057_v31 = vunpack.c.l.bf16 %v7118_v14  ;;  %v10064_v14 = vunpack.c.h.bf16 %v7108_v7 }
 0x1c4   : > { %v1999_v16 = vmax.f32 %v1080_v10, 0.0  ;;  %1530 = vmatmul.mubr.bf16.gmra.mrb[116].mxu0 %v6252_v0  ;;  %3746 = vmatmul.mubr.bf16.gmra.mrb[116].mxu1 %v2987_v4  ;;  %v10049_v0 = vunpack.c.l.bf16 %v7092_v57  ;;  %v6196_v15 = vld [vmem:[#allocation10 + $0x160] sm:$0xff]   ;;  %v2028_v10 = vmax.f32 %v1289_v43, 0.0  ;;  %v2037_v18 = vmax.f32 %v1293_v63, 0.0 }
 0x1c5   : > { %v2000_v59 = vmax.f32 %v1082_v49, 0.0  ;;  %1539 = vmatprep.mubr.bf16.mxu0 %v10021_v37  ;;  %5423 = vmatpush3.bf16.msra.mxu1 %v6191_v34  ;;  %v2727_v5 = vmul.f32 %v10051_v50, %v1991_v53  ;;  %v538_v49 = vsub.s32 6, %v7071_v45  ;;  %v542_v57 = vsub.s32 7, %v7071_v45  ;;  %v6197_v43 = vld [vmem:[#allocation10 + $0x120] sm:$0xff]  }
 0x1c6   : > { %v2726_v4 = vmul.f32 %v10049_v0, %v1990_v39  ;;  %v2735_v22 = vmul.f32 %v10050_v11, %v1999_v16  ;;  %5424 = vmatprep.subr.bf16.mxu1 %v6192_v9  ;;  %v7402_v39 = vld [vmem:[#allocation8 + $0x45c] sm:$0xff] }
 0x1c7   : > { %v1085_v34 = vpop.f32.mrb[12].mxu0  ;;  %v2736_v1 = vmul.f32 %v10052_v46, %v2000_v59  ;;  %v7400_v21 = vpop.f32.mrb[12].mxu1  ;;  %10053 = vst [vmem:[#allocation50_spill] sm:$0xff] %v7402_v39  ;;  %v7423_v63 = vld [vmem:[#allocation8 + $0x3c] sm:$0xff] }
 0x1c8   : > { %v1086_v16 = vadd.f32 %v1085_v34, %v7088_v55  ;;  %v1087_v9 = vpop.f32.mrb[13].mxu0  ;;  %v2996_v11 = vpack.c.bf16 %v2735_v22, %v2726_v4  ;;  %v7405_v0 = vpop.f32.mrb[13].mxu1  ;;  %v7414_v34 = vld [vmem:[#allocation8 + $0x18] sm:$0xff] }
 0x1c9   : > { %v1088_v50 = vadd.f32 %v1087_v9, %v7096_v58  ;;  %v1089_v60 = vpop.f32.mrb[14].mxu0  ;;  %v2997_v46 = vpack.c.bf16 %v2736_v1, %v2727_v5  ;;  %v7410_v53 = vpop.f32.mrb[14].mxu1  ;;  %5425 = vmatpush3.bf16.msra.mxu1 %v6193_v2  ;;  %v6205_v2 = vld [vmem:[#allocation10 + $0x168] sm:$0xff]   ;;  %v7436_v5 = vrot.slane %v7074_v51, %v538_v49  ;;  %v10061_v49 = vunpack.c.l.bf16 %v7108_v7  ;;  %v7565_v39 = vld [vmem:[%s6843_s17 + $0x60] sm:$0xff]  }
 0x1ca   : > { %v2008_v22 = vmax.f32 %v1086_v16, 0.0  ;;  %v1090_v4 = vadd.f32 %v1089_v60, %v7088_v55  ;;  %v1091_v56 = vpop.f32.mrb[15].mxu0  ;;  %v7417_v32 = vpop.f32.mrb[15].mxu1  ;;  %5426 = vmatprep.subr.bf16.mxu1 %v6196_v15  ;;  %v7421_v9 = vld [vmem:[#allocation8 + $0x8] sm:$0xff]  ;;  %v10055_v16 = vunpack.c.l.bf16 %v7116_v13  ;;  %v7432_v15 = vmul.f32 %v10057_v31, %v2037_v18  ;;  %10078 = vst [vmem:[#allocation65_spill] sm:$0xff] %v7565_v39 }
 0x1cb   : > { %10054 = vst [vmem:[#allocation51_spill] sm:$0xff] %v7421_v9  ;;  %v2009_v59 = vmax.f32 %v1088_v50, 0.0  ;;  %v1092_v47 = vadd.f32 %v1091_v56, %v7096_v58  ;;  %3753 = vmatprep.mubr.bf16.mxu1 %v2997_v46  ;;  %v7440_v56 = vrot.slane %v7074_v51, %v542_v57  ;;  %v6207_v13 = vld [vmem:[#allocation10 + $0x128] sm:$0xff]   ;;  %v10060_v31 = vunpack.c.l.bf16 %v7102_v62 }
 0x1cc   : > { %v7428_v60 = vmul.f32 %v10055_v16, %v2028_v10  ;;  %10058 = vst [vmem:[#allocation53_spill] sm:$0xff] %v7432_v15  ;;  %v2017_v1 = vmax.f32 %v1090_v4, 0.0  ;;  %1540 = vmatmul.mubr.bf16.gmra.mrb[120].mxu0 %v6253_v23  ;;  %3754 = vmatmul.mubr.bf16.gmra.mrb[120].mxu1 %v2996_v11  ;;  %v7452_v51 = vadd.f32 %v7287_v28, %v7127_v20  ;;  %v7455_v57 = vld [vmem:[#allocation8 + $0x2c] sm:$0xff]  ;;  %v10063_v16 = vunpack.c.h.bf16 %v7102_v62  ;;  %v7467_v28 = vld [vmem:[#allocation8 + $0x60] sm:$0xff] }
 0x1cd   : > { %10059 = vst [vmem:[#allocation54_spill] sm:$0xff] %v7440_v56  ;;  %v2018_v46 = vmax.f32 %v1092_v47, 0.0  ;;  %1549 = vmatprep.mubr.bf16.mxu0 %v10021_v37  ;;  %5427 = vmatpush3.bf16.msra.mxu1 %v6197_v43  ;;  %v2744_v10 = vmul.f32 %v10060_v31, %v2008_v22  ;;  %10062 = vst [vmem:[#allocation55_spill] sm:$0xff] %v7455_v57  ;;  %v6214_v43 = vld [vmem:[#allocation10 + $0x170] sm:$0xff]   ;;  %v7474_v62 = vadd.f32 %v7299_v42, %v7127_v20 }
 0x1ce   : > { %10056 = vst [vmem:[#allocation52_spill] sm:$0xff] %v7428_v60  ;;  %v2753_v11 = vmul.f32 %v10061_v49, %v2017_v1  ;;  %5428 = vmatprep.subr.bf16.mxu1 %v6205_v2  ;;  %v2745_v18 = vmul.f32 %v10063_v16, %v2009_v59  ;;  %v7463_v1 = vadd.f32 %v7294_v8, %v7141_v27  ;;  %10065 = vst [vmem:[#allocation56_spill] sm:$0xff] %v7467_v28  ;;  %v7500_v9 = vld [vmem:[%s6843_s17 + $0x58] sm:$0xff]  }
 0x1cf   : > { %v1095_v4 = vpop.f32.mrb[16].mxu0  ;;  %v2754_v22 = vmul.f32 %v10064_v14, %v2018_v46  ;;  %v7465_v31 = vpop.f32.mrb[16].mxu1  ;;  %v7478_v7 = vadd.f32 %v7304_v6, %v7141_v27  ;;  %10068 = vst [vmem:[#allocation59_spill] sm:$0xff] %v7500_v9 }
 0x1d0   : > { %v1096_v49 = vadd.f32 %v1095_v4, %v7088_v55  ;;  %v1097_v47 = vpop.f32.mrb[17].mxu0  ;;  %v3005_v23 = vpack.c.bf16 %v2753_v11, %v2744_v10  ;;  %v7480_v8 = vpop.f32.mrb[17].mxu1  ;;  %v6215_v11 = vld [vmem:[#allocation10 + $0x130] sm:$0xff]  }
 0x1d1   : > { %v1098_v59 = vadd.f32 %v1097_v47, %v7096_v58  ;;  %v1099_v46 = vpop.f32.mrb[18].mxu0  ;;  %v3006_v14 = vpack.c.bf16 %v2754_v22, %v2745_v18  ;;  %v7483_v16 = vpop.f32.mrb[18].mxu1  ;;  %5429 = vmatpush3.bf16.msra.mxu1 %v6207_v13  ;;  %v7492_v18 = vld [vmem:[#allocation8 + $0x50] sm:$0xff]  ;;  %v7494_v22 = vld [vmem:[#allocation8 + $0x84] sm:$0xff]  ;;  %v6216_v13 = vld [vmem:[#allocation10 + $0x178] sm:$0xff]   ;;  %v10071_v47 = vunpack.c.l.bf16 %v7124_v19 }
 0x1d2   : > { %v2026_v42 = vmax.f32 %v1096_v49, 0.0  ;;  %v1100_v2 = vadd.f32 %v1099_v46, %v7088_v55  ;;  %v1101_v6 = vpop.f32.mrb[19].mxu0  ;;  %v7488_v50 = vpop.f32.mrb[19].mxu1  ;;  %10066 = vst [vmem:[#allocation57_spill] sm:$0xff] %v7492_v18  ;;  %10067 = vst [vmem:[#allocation58_spill] sm:$0xff] %v7494_v22  ;;  %5430 = vmatprep.subr.bf16.mxu1 %v6214_v43  ;;  %v7510_v49 = vld [vmem:[#allocation8 + $0x74] sm:$0xff]  ;;  %v10074_v18 = vunpack.c.h.bf16 %v7124_v19 }
 0x1d3   : > { %v2027_v4 = vmax.f32 %v1098_v59, 0.0  ;;  %v1102_v10 = vadd.f32 %v1101_v6, %v7096_v58  ;;  %3761 = vmatprep.mubr.bf16.mxu1 %v3006_v14  ;;  %10069 = vst [vmem:[#allocation60_spill] sm:$0xff] %v7510_v49  ;;  %v6217_v46 = vld [vmem:[#allocation10 + $0x138] sm:$0xff]   ;;  %v7521_v43 = vld [vmem:[#allocation8 + $0xa8] sm:$0xff]  ;;  %v10073_v6 = vunpack.c.h.bf16 %v7114_v12  ;;  %v10080_v49 = vunpack.c.l.bf16 %v7132_v24 }
 0x1d4   : > { %v2035_v15 = vmax.f32 %v1100_v2, 0.0  ;;  %1550 = vmatmul.mubr.bf16.gmra.mrb[124].mxu0 %v7500_v9  ;;  %3762 = vmatmul.mubr.bf16.gmra.mrb[124].mxu1 %v3005_v23  ;;  %v10070_v23 = vunpack.c.l.bf16 %v7114_v12  ;;  %10072 = vst [vmem:[#allocation61_spill] sm:$0xff] %v7521_v43  ;;  %v7540_v12 = vadd.f32 %v7367_v17, %v7141_v27  ;;  %v7550_v14 = vld [vmem:[#allocation8 + $0x98] sm:$0xff] }
 0x1d5   : > { %v2036_v59 = vmax.f32 %v1102_v10, 0.0  ;;  %1559 = vmatprep.mubr.bf16.mxu0 %v10021_v37  ;;  %5431 = vmatpush3.bf16.msra.mxu1 %v6215_v11  ;;  %v7518_v10 = vadd.f32 %v7345_v38, %v7127_v20  ;;  %v2763_v11 = vmul.f32 %v10073_v6, %v2027_v4  ;;  %v7533_v38 = vadd.f32 %v7360_v3, %v7127_v20 }
 0x1d6   : > { %v2762_v60 = vmul.f32 %v10070_v23, %v2026_v42  ;;  %v2771_v57 = vmul.f32 %v10071_v47, %v2035_v15  ;;  %5432 = vmatprep.subr.bf16.mxu1 %v6216_v13  ;;  %v7529_v42 = vadd.f32 %v7355_v54, %v7141_v27  ;;  %10075 = vst [vmem:[#allocation62_spill] sm:$0xff] %v7550_v14 }
 0x1d7   : > { %v1105_v2 = vpop.f32.mrb[20].mxu0  ;;  %v2772_v28 = vmul.f32 %v10074_v18, %v2036_v59  ;;  %v7535_v15 = vpop.f32.mrb[20].mxu1 }
 0x1d8   : > { %v1106_v47 = vadd.f32 %v1105_v2, %v7088_v55  ;;  %v1107_v13 = vpop.f32.mrb[21].mxu0  ;;  %v3014_v23 = vpack.c.bf16 %v2771_v57, %v2762_v60  ;;  %v7542_v19 = vpop.f32.mrb[21].mxu1  ;;  %v7552_v60 = vld [vmem:[#allocation8 + $0xcc] sm:$0xff] }
 0x1d9   : > { %v1108_v54 = vadd.f32 %v1107_v13, %v7096_v58  ;;  %v1109_v18 = vpop.f32.mrb[22].mxu0  ;;  %v3015_v59 = vpack.c.bf16 %v2772_v28, %v2763_v11  ;;  %v7546_v3 = vpop.f32.mrb[22].mxu1  ;;  %10076 = vst [vmem:[#allocation63_spill] sm:$0xff] %v7552_v60  ;;  %5433 = vmatpush3.bf16.msra.mxu1 %v6217_v46  ;;  %v7559_v11 = vld [vmem:[#allocation8 + $0xbc] sm:$0xff]  ;;  %v7575_v46 = vld [vmem:[#allocation8 + $0xf0] sm:$0xff]  ;;  %v7583_v13 = vadd.f32 %v7400_v21, %v7127_v20  ;;  %v10084_v28 = vunpack.c.h.bf16 %v7144_v29 }
 0x1da   : > { %v2044_v17 = vmax.f32 %v1106_v47, 0.0  ;;  %v1110_v57 = vadd.f32 %v1109_v18, %v7088_v55  ;;  %v1111_v4 = vpop.f32.mrb[23].mxu0  ;;  %v7556_v22 = vpop.f32.mrb[23].mxu1  ;;  %10077 = vst [vmem:[#allocation64_spill] sm:$0xff] %v7559_v11  ;;  %10079 = vst [vmem:[#allocation66_spill] sm:$0xff] %v7575_v46  ;;  %v10081_v18 = vunpack.c.l.bf16 %v7144_v29  ;;  %v10086_v29 = vmax.f32 %v7463_v1, 0.0 }
 0x1db   : > { %v2045_v6 = vmax.f32 %v1108_v54, 0.0  ;;  %v1112_v2 = vadd.f32 %v1111_v4, %v7096_v58  ;;  %3769 = vmatprep.mubr.bf16.mxu1 %v3015_v59  ;;  %10082 = vst [vmem:[#allocation67_spill] sm:$0xff] %v7583_v13  ;;  %v10083_v59 = vunpack.c.h.bf16 %v7132_v24  ;;  %v7613_v21 = vadd.f32 %v7417_v32, %v7141_v27  ;;  %v7625_v32 = vld [vmem:[#allocation8 + $0x114] sm:$0xff] }
 0x1dc   : > { %v2053_v47 = vmax.f32 %v1110_v57, 0.0  ;;  %1560 = vmatmul.mubr.bf16.gmra.mrb[128].mxu0 %v7565_v39  ;;  %3770 = vmatmul.mubr.bf16.gmra.mrb[128].mxu1 %v3014_v23  ;;  %v2780_v23 = vmul.f32 %v10080_v49, %v2044_v17  ;;  %v7595_v49 = vadd.f32 %v7410_v53, %v7127_v20  ;;  %10090 = vst [vmem:[#allocation71_spill] sm:$0xff] %v7625_v32  ;;  %v10093_v46 = vunpack.c.l.bf16 %v7154_v35 }
 0x1dd   : > { %v2054_v54 = vmax.f32 %v1112_v2, 0.0  ;;  %1569 = vmatprep.mubr.bf16.mxu0 %v10021_v37  ;;  %v7587_v2 = vadd.f32 %v7405_v0, %v7141_v27  ;;  %v2781_v57 = vmul.f32 %v10083_v59, %v2045_v6  ;;  %v10087_v6 = vunpack.c.h.bf16 %v7134_v25 }
 0x1de   : > { %v2789_v43 = vmul.f32 %v10081_v18, %v2053_v47  ;;  %10085 = vst [vmem:[#allocation68_spill] sm:$0xff] %v7595_v49  ;;  %v6220_v47 = vld [vmem:[#allocation10 + $0x200] sm:$0xff]  }
 0x1df   : > { %v1115_v4 = vpop.f32.mrb[24].mxu0  ;;  %v2790_v60 = vmul.f32 %v10084_v28, %v2054_v54  ;;  %v7597_v17 = vpop.f32.mrb[24].mxu1  ;;  %v7608_v28 = vmul.f32 %v10087_v6, %v10086_v29  ;;  %5738 = vmatprep.subr.bf16.mxu1 %v6220_v47  ;;  %v1329_v47 = vadd.f32 %v7465_v31, %v7127_v20  ;;  %v10096_v31 = vunpack.c.h.bf16 %v7154_v35 }
 0x1e0   : > { %v1116_v18 = vadd.f32 %v1115_v4, %v7088_v55  ;;  %v1117_v0 = vpop.f32.mrb[25].mxu0  ;;  %v3023_v14 = vpack.c.bf16 %v2789_v43, %v2780_v23  ;;  %v7601_v56 = vpop.f32.mrb[25].mxu1  ;;  %v7618_v23 = vld [vmem:[#allocation8 + $0xe0] sm:$0xff]  ;;  %v10095_v43 = vunpack.c.h.bf16 %v7146_v30 }
 0x1e1   : > { %10088 = vst [vmem:[#allocation69_spill] sm:$0xff] %v7608_v28  ;;  %v1118_v53 = vadd.f32 %v1117_v0, %v7096_v58  ;;  %v1119_v54 = vpop.f32.mrb[26].mxu0  ;;  %v3024_v59 = vpack.c.bf16 %v2790_v60, %v2781_v57  ;;  %v7615_v4 = vpop.f32.mrb[26].mxu1  ;;  %10089 = vst [vmem:[#allocation70_spill] sm:$0xff] %v7618_v23  ;;  %v1331_v0 = vadd.f32 %v7480_v8, %v7141_v27  ;;  %v10092_v60 = vunpack.c.l.bf16 %v7146_v30 }
 0x1e2   : > { %v2062_v1 = vmax.f32 %v1116_v18, 0.0  ;;  %v1120_v29 = vadd.f32 %v1119_v54, %v7088_v55  ;;  %v1121_v6 = vpop.f32.mrb[27].mxu0  ;;  %v7623_v57 = vpop.f32.mrb[27].mxu1  ;;  %v7632_v54 = vld [vmem:[%s6843_s17 + $0x68] sm:$0xff]  }
 0x1e3   : > { %v2063_v24 = vmax.f32 %v1118_v53, 0.0  ;;  %v1122_v11 = vadd.f32 %v1121_v6, %v7096_v58  ;;  %3777 = vmatprep.mubr.bf16.mxu1 %v3024_v59  ;;  %10091 = vst [vmem:[#allocation72_spill] sm:$0xff] %v7632_v54  ;;  %v1333_v53 = vadd.f32 %v7483_v16, %v7127_v20  ;;  %v7649_v16 = vld [vmem:[#allocation8 + $0x104] sm:$0xff]  ;;  %v2101_v23 = vmax.f32 %v1331_v0, 0.0 }
 0x1e4   : > { %v2071_v18 = vmax.f32 %v1120_v29, 0.0  ;;  %1570 = vmatmul.mubr.bf16.gmra.mrb[132].mxu0 %v7632_v54  ;;  %3778 = vmatmul.mubr.bf16.gmra.mrb[132].mxu1 %v3023_v14  ;;  %v2798_v14 = vmul.f32 %v10092_v60, %v2062_v1  ;;  %10094 = vst [vmem:[#allocation73_spill] sm:$0xff] %v7649_v16  ;;  %v2100_v29 = vmax.f32 %v1329_v47, 0.0  ;;  %v1335_v1 = vadd.f32 %v7488_v50, %v7141_v27 }
 0x1e5   : > { %v2072_v59 = vmax.f32 %v1122_v11, 0.0  ;;  %1579 = vmatprep.mubr.bf16.mxu0 %v10021_v37  ;;  %v530_v11 = vsub.s32 4, %v7071_v45  ;;  %v2799_v39 = vmul.f32 %v10095_v43, %v2063_v24  ;;  %v2109_v49 = vmax.f32 %v1333_v53, 0.0 }
 0x1e6   : > { %v2807_v8 = vmul.f32 %v10093_v46, %v2071_v18  ;;  %v7660_v46 = vld [vmem:[#allocation8 + $0x138] sm:$0xff]  ;;  %v10100_v0 = vunpack.c.h.bf16 %v7170_v52 }
 0x1e7   : > { %v1125_v6 = vpop.f32.mrb[28].mxu0  ;;  %v2808_v9 = vmul.f32 %v10096_v31, %v2072_v59  ;;  %v7658_v60 = vpop.f32.mrb[28].mxu1 }
 0x1e8   : > { %v1126_v18 = vadd.f32 %v1125_v6, %v7088_v55  ;;  %v1127_v54 = vpop.f32.mrb[29].mxu0  ;;  %v3032_v32 = vpack.c.bf16 %v2807_v8, %v2798_v14  ;;  %v7663_v13 = vpop.f32.mrb[29].mxu1  ;;  %v10098_v8 = vunpack.c.l.bf16 %v7170_v52  ;;  %v7688_v53 = vmul.f32 %v10100_v0, %v2101_v23 }
 0x1e9   : > { %v1128_v30 = vadd.f32 %v1127_v54, %v7096_v58  ;;  %v1129_v35 = vpop.f32.mrb[30].mxu0  ;;  %v3033_v24 = vpack.c.bf16 %v2808_v9, %v2799_v39  ;;  %v7666_v43 = vpop.f32.mrb[30].mxu1  ;;  %v7675_v54 = vld [vmem:[#allocation8 + $0x10] sm:$0xff]  ;;  %v10105_v23 = vunpack.c.l.bf16 %v7156_v36  ;;  %v10112_v52 = vunpack.c.h.bf16 %v7156_v36 }
 0x1ea   : > { %v2080_v59 = vmax.f32 %v1126_v18, 0.0  ;;  %v1130_v6 = vadd.f32 %v1129_v35, %v7088_v55  ;;  %v1131_v31 = vpop.f32.mrb[31].mxu0  ;;  %v7671_v14 = vpop.f32.mrb[31].mxu1  ;;  %10097 = vst [vmem:[#allocation74_spill] sm:$0xff] %v7675_v54  ;;  %v7680_v50 = vmul.f32 %v10098_v8, %v2100_v29  ;;  %v2110_v18 = vmax.f32 %v1335_v1, 0.0  ;;  %v7683_v35 = vld [vmem:[%s6843_s17 + $0x70] sm:$0xff]  }
 0x1eb   : > { %v2081_v39 = vmax.f32 %v1128_v30, 0.0  ;;  %v1132_v9 = vadd.f32 %v1131_v31, %v7096_v58  ;;  %3785 = vmatprep.mubr.bf16.mxu1 %v3033_v24  ;;  %10101 = vst [vmem:[#allocation76_spill] sm:$0xff] %v7688_v53  ;;  %v10102_v30 = vunpack.c.l.bf16 %v7172_v61  ;;  %v6258_v24 = vld [vmem:[#allocation7] sm:$0xff]  ;;  %v1339_v1 = vadd.f32 %v7535_v15, %v7127_v20 }
 0x1ec   : > { %10099 = vst [vmem:[#allocation75_spill] sm:$0xff] %v7680_v50  ;;  %v2089_v47 = vmax.f32 %v1130_v6, 0.0  ;;  %1580 = vmatmul.mubr.bf16.gmra.mrb[136].mxu0 %v7683_v35  ;;  %3786 = vmatmul.mubr.bf16.gmra.mrb[136].mxu1 %v3032_v32  ;;  %v7694_v31 = vrot.slane %v6258_v24, %v530_v11  ;;  %v1341_v32 = vadd.f32 %v7542_v19, %v7141_v27  ;;  %v10110_v19 = vunpack.c.h.bf16 %v7172_v61 }
 0x1ed   : > { %v7692_v16 = vmul.f32 %v10102_v30, %v2109_v49  ;;  %v2090_v29 = vmax.f32 %v1132_v9, 0.0  ;;  %1589 = vmatprep.mubr.bf16.mxu0 %v10021_v37  ;;  %v2816_v6 = vmul.f32 %v10105_v23, %v2080_v59  ;;  %v10106_v49 = vunpack.c.l.bf16 %v7162_v33 }
 0x1ee   : > { %10104 = vst [vmem:[#allocation78_spill] sm:$0xff] %v7694_v31  ;;  %v1343_v11 = vadd.f32 %v7546_v3, %v7127_v20  ;;  %v10107_v9 = vmax.f32 %v7478_v7, 0.0  ;;  %v10108_v37 = vunpack.c.h.bf16 %v7136_v26  ;;  %v7716_v30 = vmul.f32 %v10110_v19, %v2110_v18  ;;  %v7726_v7 = vld [vmem:[#allocation8 + $0x15c] sm:$0xff] }
 0x1ef   : > { %10103 = vst [vmem:[#allocation77_spill] sm:$0xff] %v7692_v16  ;;  %v2825_v0 = vmul.f32 %v10106_v49, %v2089_v47  ;;  %v1135_v15 = vpop.f32.mrb[32].mxu0  ;;  %v2817_v59 = vmul.f32 %v10112_v52, %v2081_v39  ;;  %v10113_v23 = vunpack.c.h.bf16 %v7162_v33  ;;  %v1345_v3 = vadd.f32 %v7556_v22, %v7141_v27  ;;  %v7724_v49 = vpop.f32.mrb[32].mxu1 }
 0x1f0   : > { %v7712_v8 = vmul.f32 %v10108_v37, %v10107_v9  ;;  %10111 = vst [vmem:[#allocation80_spill] sm:$0xff] %v7716_v30  ;;  %v1136_v9 = vadd.f32 %v1135_v15, %v7088_v55  ;;  %v1137_v37 = vpop.f32.mrb[33].mxu0  ;;  %v7729_v61 = vpop.f32.mrb[33].mxu1  ;;  %v534_v18 = vsub.s32 5, %v7071_v45  ;;  %v2118_v22 = vmax.f32 %v1339_v1, 0.0  ;;  %v8200_v30 = vld [vmem:[#allocation8 + $0x130] sm:$0xff] }
 0x1f1   : > { %v2826_v47 = vmul.f32 %v10113_v23, %v2090_v29  ;;  %v3041_v31 = vpack.c.bf16 %v2825_v0, %v2816_v6  ;;  %v1138_v33 = vadd.f32 %v1137_v37, %v7096_v58  ;;  %v1139_v39 = vpop.f32.mrb[34].mxu0  ;;  %v2119_v52 = vmax.f32 %v1341_v32, 0.0  ;;  %v7735_v19 = vpop.f32.mrb[34].mxu1 }
 0x1f2   : > { %10109 = vst [vmem:[#allocation79_spill] sm:$0xff] %v7712_v8  ;;  %v2098_v23 = vmax.f32 %v1136_v9, 0.0  ;;  %v1140_v15 = vadd.f32 %v1139_v39, %v7088_v55  ;;  %v1141_v6 = vpop.f32.mrb[35].mxu0  ;;  %v2127_v0 = vmax.f32 %v1343_v11, 0.0  ;;  %v7738_v16 = vpop.f32.mrb[35].mxu1  ;;  %v1349_v11 = vadd.f32 %v7597_v17, %v7127_v20  ;;  %v7753_v39 = vld [vmem:[#allocation8 + $0x34] sm:$0xff] }
 0x1f3   : > { %v3042_v29 = vpack.c.bf16 %v2826_v47, %v2817_v59  ;;  %v2099_v50 = vmax.f32 %v1138_v33, 0.0  ;;  %v1142_v37 = vadd.f32 %v1141_v6, %v7096_v58  ;;  %v2128_v59 = vmax.f32 %v1345_v3, 0.0  ;;  %v7744_v47 = vld [vmem:[%s6843_s17 + $0x78] sm:$0xff]   ;;  %10115 = vst [vmem:[#allocation82_spill] sm:$0xff] %v7753_v39 }
 0x1f4   : > { %v2107_v32 = vmax.f32 %v1140_v15, 0.0  ;;  %1590 = vmatmul.mubr.bf16.gmra.mrb[140].mxu0 %v7744_v47  ;;  %v1351_v9 = vadd.f32 %v7601_v56, %v7141_v27  ;;  %v7751_v33 = vrot.slane %v6258_v24, %v534_v18  ;;  %v10116_v3 = vunpack.c.l.bf16 %v7184_v48 }
 0x1f5   : > { %3793 = vmatprep.mubr.bf16.mxu1 %v3042_v29  ;;  %v2108_v29 = vmax.f32 %v1142_v37, 0.0  ;;  %v10118_v15 = vunpack.c.h.bf16 %v7184_v48  ;;  %v1353_v17 = vadd.f32 %v7615_v4, %v7127_v20  ;;  %v10120_v56 = vunpack.c.l.bf16 %v7186_v40 }
 0x1f6   : > { %3794 = vmatmul.mubr.bf16.gmra.mrb[140].mxu1 %v3041_v31  ;;  %10114 = vst [vmem:[#allocation81_spill] sm:$0xff] %v7751_v33  ;;  %v7757_v6 = vmul.f32 %v10116_v3, %v2118_v22  ;;  %v6260_v31 = vld [vmem:[%s6843_s17] sm:$0xff]   ;;  %v10122_v18 = vunpack.c.l.bf16 %v7178_v41  ;;  %v10123_v1 = vunpack.c.l.bf16 %v7180_v44  ;;  %v10127_v45 = vunpack.c.h.bf16 %v7180_v44 }
 0x1f7   : > { %v7761_v36 = vmul.f32 %v10118_v15, %v2119_v52  ;;  %5706 = vmatprep.mubr.bf16.mxu0 %v6260_v31  ;;  %v7768_v24 = vmul.f32 %v10120_v56, %v2127_v0  ;;  %v1145_v48 = vpop.f32.mrb[36].mxu0  ;;  %v10124_v52 = vunpack.c.h.bf16 %v7186_v40  ;;  %v10126_v31 = vunpack.c.h.bf16 %v7178_v41  ;;  %v7783_v56 = vpop.f32.mrb[36].mxu1  ;;  %v7789_v40 = vld [vmem:[#allocation8 + $0x180] sm:$0xff] }
 0x1f8   : > { %10117 = vst [vmem:[#allocation83_spill] sm:$0xff] %v7757_v6  ;;  %v2834_v37 = vmul.f32 %v10122_v18, %v2098_v23  ;;  %v2843_v22 = vmul.f32 %v10123_v1, %v2107_v32  ;;  %v2844_v0 = vmul.f32 %v10127_v45, %v2108_v29  ;;  %v1146_v18 = vadd.f32 %v1145_v48, %v7088_v55  ;;  %v1147_v1 = vpop.f32.mrb[37].mxu0  ;;  %v7787_v8 = vpop.f32.mrb[37].mxu1  ;;  %v6195_v48 = vld [vmem:[#allocation10 + $0x80] sm:$0xff]  }
 0x1f9   : > { %10119 = vst [vmem:[#allocation84_spill] sm:$0xff] %v7761_v36  ;;  %10121 = vst [vmem:[#allocation85_spill] sm:$0xff] %v7768_v24  ;;  %v7777_v15 = vmul.f32 %v10124_v52, %v2128_v59  ;;  %v2835_v4 = vmul.f32 %v10126_v31, %v2099_v50  ;;  %v2136_v3 = vmax.f32 %v1349_v11, 0.0  ;;  %v2137_v28 = vmax.f32 %v1351_v9, 0.0  ;;  %v1149_v50 = vpop.f32.mrb[38].mxu0  ;;  %v7794_v29 = vpop.f32.mrb[38].mxu1 }
 0x1fa   : > { %v3050_v32 = vpack.c.bf16 %v2843_v22, %v2834_v37  ;;  %v1148_v41 = vadd.f32 %v1147_v1, %v7096_v58  ;;  %v2145_v44 = vmax.f32 %v1353_v17, 0.0  ;;  %v1355_v45 = vadd.f32 %v7623_v57, %v7141_v27  ;;  %v7796_v52 = vld [vmem:[#allocation8 + $0x58] sm:$0xff]  ;;  %v1151_v37 = vpop.f32.mrb[39].mxu0  ;;  %v7799_v22 = vpop.f32.mrb[39].mxu1  ;;  %v6198_v31 = vld [vmem:[#allocation10 + $0xc8] sm:$0xff]  }
 0x1fb   : > { %10125 = vst [vmem:[#allocation86_spill] sm:$0xff] %v7777_v15  ;;  %v3051_v59 = vpack.c.bf16 %v2844_v0, %v2835_v4  ;;  %10128 = vst [vmem:[#allocation87_spill] sm:$0xff] %v7796_v52  ;;  %v2116_v11 = vmax.f32 %v1146_v18, 0.0  ;;  %v1150_v9 = vadd.f32 %v1149_v50, %v7088_v55  ;;  %v10129_v1 = vmax.f32 %v7452_v51, 0.0  ;;  %v6261_v24 = vld [vmem:[%s6843_s17 + $0x8] sm:$0xff]   ;;  %v6264_v52 = vld [vmem:[%s6843_s17 + $0x20] sm:$0xff]  }
 0x1fc   : > { %v10130_v17 = vunpack.c.l.bf16 %v7134_v25  ;;  %v10132_v57 = vmax.f32 %v7474_v62, 0.0  ;;  %v10133_v0 = vunpack.c.l.bf16 %v7136_v26  ;;  %v2117_v54 = vmax.f32 %v1148_v41, 0.0  ;;  %5707 = vmatmul.mubr.bf16.vlgmr.msra.gmra.mrb[144].mxu0 %v6261_v24  ;;  %v10135_v25 = vld [vmem:[#allocation21_spill] sm:$0xff]  ;;  %v6262_v24 = vld [vmem:[%s6843_s17 + $0x10] sm:$0xff]  }
 0x1fd   : > { %v1152_v18 = vadd.f32 %v1151_v37, %v7096_v58  ;;  %3801 = vmatprep.mubr.bf16.mxu1 %v3051_v59  ;;  %v2125_v51 = vmax.f32 %v1150_v9, 0.0  ;;  %v10138_v37 = vunpack.c.h.bf16 %v10135_v25  ;;  %v2146_v9 = vmax.f32 %v1355_v45, 0.0  ;;  %5710 = vmatprep.mubr.bf16.mxu0 %v6262_v24  ;;  %v10145_v26 = vld [vmem:[#allocation20_spill] sm:$0xff] }
 0x1fe   : > { %v7805_v4 = vmul.f32 %v10130_v17, %v10129_v1  ;;  %v7811_v23 = vmul.f32 %v10133_v0, %v10132_v57  ;;  %3802 = vmatmul.mubr.bf16.gmra.mrb[144].mxu1 %v3050_v32  ;;  %v10136_v1 = vunpack.c.l.bf16 %v10135_v25  ;;  %v10140_v57 = vld [vmem:[#allocation22_spill] sm:$0xff]  ;;  %5307 = vmatpush3.bf16.msra.mxu0 %v6195_v48  ;;  %v6199_v32 = vld [vmem:[#allocation10 + $0x88] sm:$0xff]  }
 0x1ff   : > { %v2126_v17 = vmax.f32 %v1152_v18, 0.0  ;;  %v7825_v59 = vmul.f32 %v10138_v37, %v2137_v28  ;;  %v10141_v0 = vunpack.c.l.bf16 %v10140_v57  ;;  %5308 = vmatprep.subr.bf16.mxu0 %v6198_v31  ;;  %v6200_v18 = vld [vmem:[#allocation10 + $0xd0] sm:$0xff]   ;;  %v7836_v25 = vld [vmem:[#allocation8 + $0x1a4] sm:$0xff]  ;;  %v1155_v48 = vpop.f32.mrb[40].mxu0  ;;  %v1359_v31 = vadd.f32 %v7658_v60, %v7127_v20 }
 0x200   : > { %10131 = vst [vmem:[#allocation88_spill] sm:$0xff] %v7805_v4  ;;  %10134 = vst [vmem:[#allocation89_spill] sm:$0xff] %v7811_v23  ;;  %v7819_v62 = vmul.f32 %v10136_v1, %v2136_v3  ;;  %v10143_v3 = vld [vmem:[#allocation19_spill] sm:$0xff]  ;;  %v10148_v45 = vld [vmem:[#allocation24_spill] sm:$0xff]  ;;  %v10153_v28 = vmax.f32 %v7540_v12, 0.0 }
 0x201   : > { %10139 = vst [vmem:[#allocation90_spill] sm:$0xff] %v7825_v59  ;;  %v7829_v50 = vmul.f32 %v10141_v0, %v2145_v44  ;;  %v10144_v1 = vunpack.c.l.bf16 %v10143_v3  ;;  %v10147_v44 = vmax.f32 %v7529_v42, 0.0  ;;  %v10149_v37 = vunpack.c.h.bf16 %v10148_v45 }
 0x202   : > { %10137 = vst [vmem:[#allocation21_spill] sm:$0xff] %v7819_v62  ;;  %v10146_v62 = vunpack.c.l.bf16 %v10145_v26  ;;  %v10151_v24 = vunpack.c.h.bf16 %v10143_v3  ;;  %5309 = vmatpush3.bf16.msra.mxu0 %v6199_v32  ;;  %v10170_v32 = vld [vmem:[#allocation28_spill] sm:$0xff] }
 0x203   : > { %10142 = vst [vmem:[#allocation22_spill] sm:$0xff] %v7829_v50  ;;  %v2852_v33 = vmul.f32 %v10144_v1, %v2116_v11  ;;  %v7844_v0 = vmul.f32 %v10149_v37, %v10147_v44  ;;  %v10152_v1 = vunpack.c.h.bf16 %v10145_v26  ;;  %v10154_v50 = vld [vmem:[#allocation25_spill] sm:$0xff]  ;;  %v1156_v44 = vadd.f32 %v1155_v48, %v7088_v55  ;;  %v1157_v37 = vpop.f32.mrb[41].mxu0  ;;  %5310 = vmatprep.subr.bf16.mxu0 %v6200_v18 }
 0x204   : > { %v2861_v41 = vmul.f32 %v10146_v62, %v2125_v51  ;;  %v2853_v11 = vmul.f32 %v10151_v24, %v2117_v54  ;;  %v7852_v62 = vpop.f32.mrb[40].mxu1  ;;  %v10155_v42 = vunpack.c.h.bf16 %v10154_v50  ;;  %v1361_v54 = vadd.f32 %v7663_v13, %v7141_v27  ;;  %v1159_v3 = vpop.f32.mrb[42].mxu0 }
 0x205   : > { %10150 = vst [vmem:[#allocation19_spill] sm:$0xff] %v7844_v0  ;;  %v2862_v51 = vmul.f32 %v10152_v1, %v2126_v17  ;;  %v1363_v26 = vadd.f32 %v7666_v43, %v7127_v20  ;;  %v7865_v17 = vpop.f32.mrb[41].mxu1  ;;  %v1158_v60 = vadd.f32 %v1157_v37, %v7096_v58  ;;  %v10157_v13 = vunpack.c.h.bf16 %v10140_v57 }
 0x206   : > { %v7858_v4 = vmul.f32 %v10155_v42, %v10153_v28  ;;  %v3059_v23 = vpack.c.bf16 %v2861_v41, %v2852_v33  ;;  %v7868_v24 = vpop.f32.mrb[42].mxu1  ;;  %v6201_v28 = vld [vmem:[#allocation10 + $0x90] sm:$0xff]   ;;  %v2134_v41 = vmax.f32 %v1156_v44, 0.0  ;;  %v1160_v1 = vadd.f32 %v1159_v3, %v7088_v55  ;;  %v1161_v42 = vpop.f32.mrb[43].mxu0 }
 0x207   : > { %v3060_v12 = vpack.c.bf16 %v2862_v51, %v2853_v11  ;;  %v7875_v43 = vmul.f32 %v10157_v13, %v2146_v9  ;;  %v7878_v37 = vpop.f32.mrb[43].mxu1  ;;  %v6202_v11 = vld [vmem:[#allocation10 + $0xd8] sm:$0xff]   ;;  %v2135_v48 = vmax.f32 %v1158_v60, 0.0  ;;  %v1162_v44 = vadd.f32 %v1161_v42, %v7096_v58  ;;  %v7886_v13 = vld [vmem:[#allocation8 + $0x1c8] sm:$0xff]  ;;  %5311 = vmatpush3.bf16.msra.mxu0 %v6201_v28 }
 0x208   : > { %10156 = vst [vmem:[#allocation20_spill] sm:$0xff] %v7858_v4  ;;  %v7881_v51 = vld [vmem:[#allocation8 + $0x7c] sm:$0xff]  ;;  %v2154_v57 = vmax.f32 %v1359_v31, 0.0  ;;  %v1365_v9 = vadd.f32 %v7671_v14, %v7141_v27  ;;  %v2143_v3 = vmax.f32 %v1160_v1, 0.0  ;;  %v6263_v33 = vld [vmem:[%s6843_s17 + $0x18] sm:$0xff]   ;;  %v2155_v18 = vmax.f32 %v1361_v54, 0.0  ;;  %5312 = vmatprep.subr.bf16.mxu0 %v6202_v11 }
 0x209   : > { %10158 = vst [vmem:[#allocation24_spill] sm:$0xff] %v7875_v43  ;;  %10159 = vst [vmem:[#allocation25_spill] sm:$0xff] %v7881_v51  ;;  %3809 = vmatprep.mubr.bf16.mxu1 %v3060_v12  ;;  %5711 = vmatmul.mubr.bf16.gmra.mrb[148].mxu0 %v6263_v33  ;;  %v2163_v0 = vmax.f32 %v1363_v26, 0.0  ;;  %v2144_v4 = vmax.f32 %v1162_v44, 0.0  ;;  %v1369_v60 = vadd.f32 %v7724_v49, %v7127_v20  ;;  %v6203_v31 = vld [vmem:[#allocation10 + $0x98] sm:$0xff]   ;;  %v10160_v1 = vld [vmem:[#allocation23_spill] sm:$0xff]  ;;  %v10171_v59 = vunpack.c.l.bf16 %v10170_v32 }
 0x20a   : > { %3810 = vmatmul.mubr.bf16.gmra.mrb[148].mxu1 %v3059_v23  ;;  %5714 = vmatprep.mubr.bf16.mxu0 %v6264_v52  ;;  %v10161_v42 = vunpack.c.l.bf16 %v10160_v1  ;;  %v10162_v23 = vld [vmem:[#allocation27_spill] sm:$0xff]  ;;  %v1371_v44 = vadd.f32 %v7729_v61, %v7141_v27  ;;  %v10164_v49 = vld [vmem:[#allocation26_spill] sm:$0xff]  ;;  %v1165_v14 = vpop.f32.mrb[44].mxu0  ;;  %v2164_v43 = vmax.f32 %v1365_v9, 0.0  ;;  %v10167_v12 = vunpack.c.h.bf16 %v10160_v1 }
 0x20b   : > { %v10163_v54 = vunpack.c.l.bf16 %v10162_v23  ;;  %v6204_v52 = vld [vmem:[#allocation10 + $0xe0] sm:$0xff]   ;;  %v10165_v28 = vunpack.c.l.bf16 %v10164_v49  ;;  %v10169_v61 = vunpack.c.h.bf16 %v10164_v49  ;;  %5313 = vmatpush3.bf16.msra.mxu0 %v6203_v31 }
 0x20c   : > { %v2870_v33 = vmul.f32 %v10161_v42, %v2134_v41  ;;  %v2871_v51 = vmul.f32 %v10167_v12, %v2135_v48  ;;  %v10168_v41 = vunpack.c.h.bf16 %v10162_v23  ;;  %v7923_v48 = vld [vmem:[#allocation8 + $0xa0] sm:$0xff]  ;;  %v2172_v23 = vmax.f32 %v1369_v60, 0.0  ;;  %5314 = vmatprep.subr.bf16.mxu0 %v6204_v52  ;;  %v6209_v52 = vld [vmem:[#allocation10 + $0xa8] sm:$0xff]  }
 0x20d   : > { %v2879_v26 = vmul.f32 %v10163_v54, %v2143_v3  ;;  %v7904_v39 = vmul.f32 %v10165_v28, %v2154_v57  ;;  %v7910_v3 = vpop.f32.mrb[44].mxu1  ;;  %v7914_v11 = vmul.f32 %v10169_v61, %v2155_v18  ;;  %v1166_v54 = vadd.f32 %v1165_v14, %v7088_v55  ;;  %v1167_v28 = vpop.f32.mrb[45].mxu0 }
 0x20e   : > { %v2880_v42 = vmul.f32 %v10168_v41, %v2144_v4  ;;  %v7919_v57 = vmul.f32 %v10171_v59, %v2163_v0  ;;  %v1168_v4 = vadd.f32 %v1167_v28, %v7096_v58  ;;  %v1169_v12 = vpop.f32.mrb[46].mxu0  ;;  %v7928_v18 = vadd.f32 %v7735_v19, %v7127_v20  ;;  %v6206_v59 = vld [vmem:[#allocation10 + $0xa0] sm:$0xff]   ;;  %v7932_v0 = vld [vmem:[#allocation8 + $0x1ec] sm:$0xff] }
 0x20f   : > { %10166 = vst [vmem:[#allocation23_spill] sm:$0xff] %v7904_v39  ;;  %v3068_v9 = vpack.c.bf16 %v2879_v26, %v2870_v33  ;;  %v7921_v39 = vpop.f32.mrb[45].mxu1  ;;  %v2152_v33 = vmax.f32 %v1166_v54, 0.0  ;;  %v1170_v26 = vadd.f32 %v1169_v12, %v7088_v55  ;;  %v1171_v49 = vpop.f32.mrb[47].mxu0  ;;  %v2173_v41 = vmax.f32 %v1371_v44, 0.0  ;;  %5315 = vmatpush3.bf16.msra.mxu0 %v6206_v59  ;;  %v10185_v54 = vld [vmem:[#allocation31_spill] sm:$0xff] }
 0x210   : > { %10172 = vst [vmem:[#allocation27_spill] sm:$0xff] %v7919_v57  ;;  %v3069_v1 = vpack.c.bf16 %v2880_v42, %v2871_v51  ;;  %v7930_v14 = vpop.f32.mrb[46].mxu1  ;;  %v6208_v51 = vld [vmem:[#allocation10 + $0xe8] sm:$0xff]   ;;  %v2153_v19 = vmax.f32 %v1168_v4, 0.0  ;;  %v10173_v42 = vunpack.c.h.bf16 %v10170_v32  ;;  %v1172_v28 = vadd.f32 %v1171_v49, %v7096_v58  ;;  %v6265_v57 = vld [vmem:[%s6843_s17 + $0x28] sm:$0xff]   ;;  %v1175_v59 = vpop.f32.mrb[48].mxu0 }
 0x211   : > { %v7935_v61 = vpop.f32.mrb[47].mxu1  ;;  %v2161_v12 = vmax.f32 %v1170_v26, 0.0  ;;  %5715 = vmatmul.mubr.bf16.gmra.mrb[152].mxu0 %v6265_v57  ;;  %v10175_v4 = vmax.f32 %v7518_v10, 0.0  ;;  %v10176_v32 = vunpack.c.l.bf16 %v10148_v45  ;;  %v2181_v26 = vmax.f32 %v7928_v18, 0.0  ;;  %5316 = vmatprep.subr.bf16.mxu0 %v6208_v51  ;;  %v6210_v18 = vld [vmem:[#allocation10 + $0xf0] sm:$0xff]  }
 0x212   : > { %v7940_v31 = vmul.f32 %v10173_v42, %v2164_v43  ;;  %3817 = vmatprep.mubr.bf16.mxu1 %v3069_v1  ;;  %v2162_v43 = vmax.f32 %v1172_v28, 0.0  ;;  %v10178_v42 = vld [vmem:[#allocation30_spill] sm:$0xff]  ;;  %v7960_v57 = vadd.f32 %v7738_v16, %v7141_v27  ;;  %v10187_v44 = vmax.f32 %v7533_v38, 0.0 }
 0x213   : > { %3818 = vmatmul.mubr.bf16.gmra.mrb[152].mxu1 %v3068_v9  ;;  %v7951_v60 = vmul.f32 %v10176_v32, %v10175_v4  ;;  %v10179_v49 = vunpack.c.l.bf16 %v10178_v42  ;;  %v6266_v9 = vld [vmem:[%s6843_s17 + $0x30] sm:$0xff]   ;;  %v10181_v10 = vunpack.c.h.bf16 %v10178_v42  ;;  %v10183_v4 = vld [vmem:[#allocation29_spill] sm:$0xff]  ;;  %v10188_v16 = vunpack.c.l.bf16 %v10154_v50  ;;  %5317 = vmatpush3.bf16.msra.mxu0 %v6209_v52 }
 0x214   : > { %10174 = vst [vmem:[#allocation26_spill] sm:$0xff] %v7940_v31  ;;  %5718 = vmatprep.mubr.bf16.mxu0 %v6266_v9  ;;  %v10184_v28 = vunpack.c.l.bf16 %v10183_v4  ;;  %v10190_v9 = vunpack.c.h.bf16 %v10183_v4  ;;  %v10196_v38 = vmax.f32 %v7613_v21, 0.0  ;;  %v1177_v4 = vpop.f32.mrb[49].mxu0  ;;  %5318 = vmatprep.subr.bf16.mxu0 %v6210_v18  ;;  %v10203_v18 = vunpack.c.l.bf16 %v7414_v34 }
 0x215   : > { %10177 = vst [vmem:[#allocation28_spill] sm:$0xff] %v7951_v60  ;;  %v7955_v1 = vmul.f32 %v10179_v49, %v2172_v23  ;;  %v7965_v45 = vmul.f32 %v10181_v10, %v2173_v41  ;;  %v10186_v23 = vunpack.c.l.bf16 %v10185_v54  ;;  %v10191_v41 = vunpack.c.h.bf16 %v10185_v54  ;;  %v1179_v21 = vpop.f32.mrb[50].mxu0 }
 0x216   : > { %v2888_v32 = vmul.f32 %v10184_v28, %v2152_v33  ;;  %v2889_v42 = vmul.f32 %v10190_v9, %v2153_v19  ;;  %v10192_v33 = vmax.f32 %v7587_v2, 0.0  ;;  %v10193_v28 = vld [vmem:[#allocation35_spill] sm:$0xff]  ;;  %v1178_v9 = vadd.f32 %v1177_v4, %v7096_v58 }
 0x217   : > { %10180 = vst [vmem:[#allocation30_spill] sm:$0xff] %v7955_v1  ;;  %10182 = vst [vmem:[#allocation91_spill] sm:$0xff] %v7965_v45  ;;  %v2897_v49 = vmul.f32 %v10186_v23, %v2161_v12  ;;  %v7975_v1 = vmul.f32 %v10188_v16, %v10187_v44  ;;  %v2898_v10 = vmul.f32 %v10191_v41, %v2162_v43  ;;  %v1634_v45 = vpop.f32.mrb[48].mxu1  ;;  %v10194_v12 = vunpack.c.h.bf16 %v10193_v28  ;;  %v10197_v23 = vld [vmem:[#allocation36_spill] sm:$0xff] }
 0x218   : > { %v10198_v50 = vunpack.c.h.bf16 %v10197_v23  ;;  %v1176_v16 = vadd.f32 %v1175_v59, %v7088_v55  ;;  %v1635_v54 = vadd.f32 %v1634_v45, %v7436_v5  ;;  %v7995_v43 = vpop.f32.mrb[49].mxu1  ;;  %v2182_v41 = vmax.f32 %v7960_v57, 0.0  ;;  %v6212_v57 = vld [vmem:[#allocation10 + $0xf8] sm:$0xff]   ;;  %v8007_v4 = vld [vmem:[#allocation8 + $0xc4] sm:$0xff] }
 0x219   : > { %10189 = vst [vmem:[#allocation29_spill] sm:$0xff] %v7975_v1  ;;  %v7985_v51 = vmul.f32 %v10194_v12, %v10192_v33  ;;  %v3077_v19 = vpack.c.bf16 %v2897_v49, %v2888_v32  ;;  %v3078_v33 = vpack.c.bf16 %v2898_v10, %v2889_v42  ;;  %v1638_v12 = vpop.f32.mrb[50].mxu1  ;;  %v1180_v45 = vadd.f32 %v1179_v21, %v7088_v55  ;;  %v1181_v49 = vpop.f32.mrb[51].mxu0  ;;  %v10200_v42 = vld [vmem:[#allocation33_spill] sm:$0xff] }
 0x21a   : > { %v7991_v44 = vmul.f32 %v10198_v50, %v10196_v38  ;;  %v6211_v38 = vld [vmem:[#allocation10 + $0xb0] sm:$0xff]   ;;  %v2170_v32 = vmax.f32 %v1176_v16, 0.0  ;;  %v1960_v50 = vmax.f32 %v1635_v54, 0.0  ;;  %v1639_v2 = vadd.f32 %v1638_v12, %v7436_v5  ;;  %v8005_v60 = vpop.f32.mrb[51].mxu1 }
 0x21b   : > { %10195 = vst [vmem:[#allocation31_spill] sm:$0xff] %v7985_v51  ;;  %v10201_v52 = vunpack.c.l.bf16 %v10200_v42  ;;  %v2171_v59 = vmax.f32 %v1178_v9, 0.0  ;;  %v1182_v16 = vadd.f32 %v1181_v49, %v7096_v58  ;;  %3825 = vmatprep.mubr.bf16.mxu1 %v3078_v33  ;;  %v1379_v54 = vadd.f32 %v7783_v56, %v7127_v20  ;;  %v6267_v12 = vld [vmem:[%s6843_s17 + $0x38] sm:$0xff]   ;;  %v6268_v49 = vld [vmem:[%s6843_s17 + $0x40] sm:$0xff]   ;;  %5319 = vmatpush3.bf16.msra.mxu0 %v6211_v38  ;;  %v8046_v31 = vpop.f32.mrb[52].mxu1 }
 0x21c   : > { %10199 = vst [vmem:[#allocation35_spill] sm:$0xff] %v7991_v44  ;;  %v2179_v21 = vmax.f32 %v1180_v45, 0.0  ;;  %5719 = vmatmul.mubr.bf16.gmra.mrb[156].mxu0 %v6267_v12  ;;  %3826 = vmatmul.mubr.bf16.gmra.mrb[156].mxu1 %v3077_v19  ;;  %v8019_v51 = vmul.f32 %v10203_v18, %v1960_v50  ;;  %v1969_v44 = vmax.f32 %v1639_v2, 0.0  ;;  %v1381_v9 = vadd.f32 %v7787_v8, %v7141_v27  ;;  %v6213_v56 = vld [vmem:[#allocation10 + $0xb8] sm:$0xff]   ;;  %v10205_v45 = vld [vmem:[#allocation32_spill] sm:$0xff] }
 0x21d   : > { %v8011_v10 = vmul.f32 %v10201_v52, %v2181_v26  ;;  %v2180_v26 = vmax.f32 %v1182_v16, 0.0  ;;  %v1383_v33 = vadd.f32 %v7794_v29, %v7127_v20  ;;  %5722 = vmatprep.mubr.bf16.mxu0 %v6268_v49  ;;  %v10206_v52 = vunpack.c.l.bf16 %v10205_v45  ;;  %v10207_v12 = vld [vmem:[#allocation34_spill] sm:$0xff]  ;;  %5320 = vmatprep.subr.bf16.mxu0 %v6212_v57  ;;  %v6218_v29 = vld [vmem:[#allocation10 + $0x1c0] sm:$0xff]  }
 0x21e   : > { %10204 = vst [vmem:[#allocation33_spill] sm:$0xff] %v8019_v51  ;;  %v10208_v2 = vunpack.c.l.bf16 %v10207_v12  ;;  %v1385_v16 = vadd.f32 %v7799_v22, %v7141_v27  ;;  %v10209_v8 = vunpack.c.l.bf16 %v7423_v63  ;;  %v10211_v38 = vunpack.c.h.bf16 %v10205_v45 }
 0x21f   : > { %10202 = vst [vmem:[#allocation36_spill] sm:$0xff] %v8011_v10  ;;  %v2906_v50 = vmul.f32 %v10206_v52, %v2170_v32  ;;  %v10212_v19 = vunpack.c.h.bf16 %v10200_v42  ;;  %v10214_v32 = vunpack.c.h.bf16 %v10207_v12  ;;  %v1389_v57 = vadd.f32 %v7852_v62, %v7127_v20  ;;  %v8053_v42 = vpop.f32.mrb[53].mxu1  ;;  %5321 = vmatpush3.bf16.msra.mxu0 %v6213_v56  ;;  %v6270_v56 = vld [vmem:[%s6843_s17 + $0x50] sm:$0xff]  }
 0x220   : > { %v2915_v18 = vmul.f32 %v10208_v2, %v2179_v21  ;;  %v8036_v1 = vmul.f32 %v10209_v8, %v1969_v44  ;;  %v2907_v49 = vmul.f32 %v10211_v38, %v2171_v59  ;;  %v2190_v21 = vmax.f32 %v1379_v54, 0.0  ;;  %v1185_v2 = vpop.f32.mrb[52].mxu0  ;;  %v8058_v12 = vpop.f32.mrb[54].mxu1  ;;  %5530 = vmatprep.subr.bf16.mxu0 %v6218_v29 }
 0x221   : > { %v8042_v10 = vmul.f32 %v10212_v19, %v2182_v41  ;;  %v2916_v52 = vmul.f32 %v10214_v32, %v2180_v26  ;;  %v1186_v22 = vadd.f32 %v1185_v2, %v7088_v55  ;;  %v1187_v44 = vpop.f32.mrb[53].mxu0  ;;  %v2191_v41 = vmax.f32 %v1381_v9, 0.0  ;;  %v8063_v9 = vpop.f32.mrb[55].mxu1 }
 0x222   : > { %10210 = vst [vmem:[#allocation32_spill] sm:$0xff] %v8036_v1  ;;  %v3086_v8 = vpack.c.bf16 %v2915_v18, %v2906_v50  ;;  %v1188_v19 = vadd.f32 %v1187_v44, %v7096_v58  ;;  %v1189_v26 = vpop.f32.mrb[54].mxu0  ;;  %v1391_v45 = vadd.f32 %v7865_v17, %v7141_v27  ;;  %v8060_v50 = vld [vmem:[#allocation8 + $0x210] sm:$0xff]  ;;  %v2199_v18 = vmax.f32 %v1383_v33, 0.0 }
 0x223   : > { %10213 = vst [vmem:[#allocation34_spill] sm:$0xff] %v8042_v10  ;;  %v3087_v54 = vpack.c.bf16 %v2916_v52, %v2907_v49  ;;  %v2188_v62 = vmax.f32 %v1186_v22, 0.0  ;;  %v2200_v38 = vmax.f32 %v1385_v16, 0.0  ;;  %v1190_v32 = vadd.f32 %v1189_v26, %v7088_v55  ;;  %v1191_v2 = vpop.f32.mrb[55].mxu0  ;;  %v10215_v52 = vld [vmem:[#allocation37_spill] sm:$0xff]  ;;  %v6269_v26 = vld [vmem:[%s6843_s17 + $0x48] sm:$0xff]  }
 0x224   : > { %v2189_v44 = vmax.f32 %v1188_v19, 0.0  ;;  %v1192_v49 = vadd.f32 %v1191_v2, %v7096_v58  ;;  %v1393_v17 = vadd.f32 %v7868_v24, %v7127_v20  ;;  %v10216_v22 = vunpack.c.l.bf16 %v10215_v52  ;;  %5723 = vmatmul.mubr.bf16.gmra.mrb[160].mxu0 %v6269_v26 }
 0x225   : > { %3833 = vmatprep.mubr.bf16.mxu1 %v3087_v54  ;;  %v2197_v16 = vmax.f32 %v1190_v32, 0.0  ;;  %v2208_v59 = vmax.f32 %v1389_v57, 0.0  ;;  %v10218_v19 = vunpack.c.h.bf16 %v10215_v52  ;;  %v2209_v51 = vmax.f32 %v1391_v45, 0.0  ;;  %5726 = vmatprep.mubr.bf16.mxu0 %v6270_v56  ;;  %v10220_v32 = vld [vmem:[#allocation38_spill] sm:$0xff] }
 0x226   : > { %v8071_v33 = vmul.f32 %v10216_v22, %v2190_v21  ;;  %3834 = vmatmul.mubr.bf16.gmra.mrb[160].mxu1 %v3086_v8  ;;  %v2198_v54 = vmax.f32 %v1192_v49, 0.0  ;;  %v1395_v24 = vadd.f32 %v7878_v37, %v7141_v27  ;;  %v8082_v21 = vld [vmem:[#allocation8 + $0xe8] sm:$0xff]  ;;  %v10221_v22 = vunpack.c.l.bf16 %v10220_v32  ;;  %v10222_v8 = vld [vmem:[#allocation39_spill] sm:$0xff]  ;;  %v10227_v49 = vld [vmem:[#allocation42_spill] sm:$0xff] }
 0x227   : > { %v8077_v2 = vmul.f32 %v10218_v19, %v2191_v41  ;;  %v10223_v57 = vunpack.c.l.bf16 %v10222_v8  ;;  %v10225_v52 = vunpack.c.h.bf16 %v10222_v8  ;;  %v10228_v45 = vunpack.c.l.bf16 %v10227_v49 }
 0x228   : > { %10217 = vst [vmem:[#allocation37_spill] sm:$0xff] %v8071_v33  ;;  %v2924_v26 = vmul.f32 %v10221_v22, %v2188_v62  ;;  %v10229_v37 = vunpack.c.h.bf16 %v10220_v32  ;;  %v10230_v56 = vunpack.c.h.bf16 %v10227_v49  ;;  %v2217_v10 = vmax.f32 %v1393_v17, 0.0  ;;  %v8100_v62 = vpop.f32.mrb[56].mxu1  ;;  %v10231_v22 = vld [vmem:[#allocation43_spill] sm:$0xff] }
 0x229   : > { %10219 = vst [vmem:[#allocation92_spill] sm:$0xff] %v8077_v2  ;;  %v8088_v1 = vmul.f32 %v10223_v57, %v2199_v18  ;;  %v8092_v41 = vmul.f32 %v10225_v52, %v2200_v38  ;;  %v2933_v19 = vmul.f32 %v10228_v45, %v2197_v16  ;;  %v1195_v2 = vpop.f32.mrb[56].mxu0  ;;  %v10232_v57 = vunpack.c.l.bf16 %v10231_v22  ;;  %v8108_v45 = vpop.f32.mrb[57].mxu1 }
 0x22a   : > { %v2925_v29 = vmul.f32 %v10229_v37, %v2189_v44  ;;  %v2934_v33 = vmul.f32 %v10230_v56, %v2198_v54  ;;  %v1196_v38 = vadd.f32 %v1195_v2, %v7088_v55  ;;  %v1197_v52 = vpop.f32.mrb[57].mxu0  ;;  %v10234_v54 = vunpack.c.h.bf16 %v10231_v22  ;;  %v8116_v18 = vpop.f32.mrb[58].mxu1  ;;  %v10237_v44 = vld [vmem:[#allocation67_spill] sm:$0xff] }
 0x22b   : > { %10224 = vst [vmem:[#allocation38_spill] sm:$0xff] %v8088_v1  ;;  %10226 = vst [vmem:[#allocation39_spill] sm:$0xff] %v8092_v41  ;;  %v8105_v8 = vmul.f32 %v10232_v57, %v2208_v59  ;;  %v3095_v16 = vpack.c.bf16 %v2933_v19, %v2924_v26  ;;  %v1198_v17 = vadd.f32 %v1197_v52, %v7096_v58  ;;  %v2218_v49 = vmax.f32 %v1395_v24, 0.0  ;;  %v1199_v37 = vpop.f32.mrb[58].mxu0  ;;  %v8118_v59 = vld [vmem:[#allocation8 + $0x234] sm:$0xff]  ;;  %v8121_v57 = vpop.f32.mrb[59].mxu1 }
 0x22c   : > { %v8113_v32 = vmul.f32 %v10234_v54, %v2209_v51  ;;  %v3096_v56 = vpack.c.bf16 %v2934_v33, %v2925_v29  ;;  %10236 = vst [vmem:[#allocation93_spill] sm:$0xff] %v8118_v59  ;;  %v2206_v2 = vmax.f32 %v1196_v38, 0.0  ;;  %v1200_v26 = vadd.f32 %v1199_v37, %v7088_v55  ;;  %v1201_v19 = vpop.f32.mrb[59].mxu0  ;;  %v10240_v52 = vld [vmem:[#allocation68_spill] sm:$0xff]  ;;  %v10243_v54 = vld [vmem:[#allocation45_spill] sm:$0xff]  ;;  %v8186_v41 = vld [vmem:[#allocation8 + $0x258] sm:$0xff] }
 0x22d   : > { %10233 = vst [vmem:[#allocation42_spill] sm:$0xff] %v8105_v8  ;;  %v10238_v8 = vmax.f32 %v10237_v44, 0.0  ;;  %v10239_v51 = vunpack.c.l.bf16 %v10193_v28  ;;  %v10241_v24 = vmax.f32 %v10240_v52, 0.0  ;;  %v10242_v33 = vunpack.c.l.bf16 %v10197_v23  ;;  %v10254_v52 = vld [vmem:[#allocation54_spill] sm:$0xff] }
 0x22e   : > { %10235 = vst [vmem:[#allocation43_spill] sm:$0xff] %v8113_v32  ;;  %v10244_v32 = vunpack.c.l.bf16 %v10243_v54  ;;  %v2207_v37 = vmax.f32 %v1198_v17, 0.0  ;;  %v1202_v1 = vadd.f32 %v1201_v19, %v7096_v58  ;;  %3841 = vmatprep.mubr.bf16.mxu1 %v3096_v56  ;;  %v1399_v44 = vadd.f32 %v7910_v3, %v7127_v20 }
 0x22f   : > { %v8127_v22 = vmul.f32 %v10239_v51, %v10238_v8  ;;  %v8133_v29 = vmul.f32 %v10242_v33, %v10241_v24  ;;  %v2215_v28 = vmax.f32 %v1200_v26, 0.0  ;;  %v10246_v8 = vld [vmem:[#allocation59_spill] sm:$0xff]  ;;  %3842 = vmatmul.mubr.bf16.gmra.mrb[164].mxu1 %v3095_v16  ;;  %v1401_v23 = vadd.f32 %v7921_v39, %v7141_v27  ;;  %v10249_v26 = vld [vmem:[#allocation65_spill] sm:$0xff]  ;;  %v10250_v16 = vld [vmem:[#allocation44_spill] sm:$0xff] }
 0x230   : > { %v8137_v38 = vmul.f32 %v10244_v32, %v2217_v10  ;;  %5727 = vmatmul.mubr.bf16.gmra.mrb[164].mxu0 %v10246_v8  ;;  %v10247_v10 = vunpack.c.h.bf16 %v10243_v54  ;;  %v2216_v17 = vmax.f32 %v1202_v1, 0.0  ;;  %v1403_v56 = vadd.f32 %v7930_v14, %v7127_v20  ;;  %v10252_v24 = vld [vmem:[#allocation46_spill] sm:$0xff] }
 0x231   : > { %v1405_v3 = vadd.f32 %v7935_v61, %v7141_v27  ;;  %5730 = vmatprep.mubr.bf16.mxu0 %v10249_v26  ;;  %v10251_v19 = vunpack.c.l.bf16 %v10250_v16  ;;  %v10253_v33 = vunpack.c.l.bf16 %v10252_v24  ;;  %v1637_v54 = vadd.f32 %v7995_v43, %v10254_v52  ;;  %v1205_v26 = vpop.f32.mrb[60].mxu0 }
 0x232   : > { %10245 = vst [vmem:[#allocation67_spill] sm:$0xff] %v8137_v38  ;;  %v8149_v32 = vmul.f32 %v10247_v10, %v2218_v49  ;;  %v10255_v49 = vunpack.c.h.bf16 %v10250_v16  ;;  %v10256_v10 = vunpack.c.h.bf16 %v10252_v24  ;;  %v2226_v51 = vmax.f32 %v1399_v44, 0.0  ;;  %v8168_v38 = vpop.f32.mrb[60].mxu1  ;;  %v1207_v43 = vpop.f32.mrb[61].mxu0 }
 0x233   : > { %v2942_v39 = vmul.f32 %v10251_v19, %v2206_v2  ;;  %v2951_v8 = vmul.f32 %v10253_v33, %v2215_v28  ;;  %v2227_v28 = vmax.f32 %v1401_v23, 0.0  ;;  %v1206_v19 = vadd.f32 %v1205_v26, %v7088_v55  ;;  %v8175_v16 = vpop.f32.mrb[61].mxu1  ;;  %v1209_v24 = vpop.f32.mrb[62].mxu0 }
 0x234   : > { %10248 = vst [vmem:[#allocation68_spill] sm:$0xff] %v8149_v32  ;;  %v2943_v14 = vmul.f32 %v10255_v49, %v2207_v37  ;;  %v2952_v61 = vmul.f32 %v10256_v10, %v2216_v17  ;;  %v1641_v1 = vadd.f32 %v8005_v60, %v10254_v52  ;;  %v8177_v37 = vld [vmem:[#allocation8 + $0x10c] sm:$0xff]  ;;  %v2235_v17 = vmax.f32 %v1403_v56, 0.0  ;;  %v8180_v10 = vpop.f32.mrb[62].mxu1 }
 0x235   : > { %v3104_v33 = vpack.c.bf16 %v2951_v8, %v2942_v39  ;;  %v1208_v44 = vadd.f32 %v1207_v43, %v7096_v58  ;;  %v2224_v2 = vmax.f32 %v1206_v19, 0.0  ;;  %v2236_v26 = vmax.f32 %v1405_v3, 0.0  ;;  %v1211_v8 = vpop.f32.mrb[63].mxu0  ;;  %v8184_v60 = vpop.f32.mrb[63].mxu1  ;;  %v10257_v43 = vld [vmem:[#allocation47_spill] sm:$0xff] }
 0x236   : > { %v3105_v49 = vpack.c.bf16 %v2952_v61, %v2943_v14  ;;  %v1210_v39 = vadd.f32 %v1209_v24, %v7088_v55  ;;  %v1961_v32 = vmax.f32 %v1637_v54, 0.0  ;;  %v1212_v56 = vadd.f32 %v1211_v8, %v7096_v58  ;;  %v10262_v24 = vld [vmem:[#allocation72_spill] sm:$0xff]  ;;  %v10263_v58 = vld [vmem:[#allocation49_spill] sm:$0xff] }
 0x237   : > { %v2225_v53 = vmax.f32 %v1208_v44, 0.0  ;;  %v10258_v23 = vunpack.c.l.bf16 %v10257_v43  ;;  %v10260_v55 = vunpack.c.h.bf16 %v10257_v43  ;;  %v1970_v44 = vmax.f32 %v1641_v1, 0.0 }
 0x238   : > { %3849 = vmatprep.mubr.bf16.mxu1 %v3105_v49  ;;  %v2233_v54 = vmax.f32 %v1210_v39, 0.0  ;;  %5731 = vmatmul.mubr.bf16.gmra.mrb[168].mxu0 %v10262_v24  ;;  %v10264_v49 = vunpack.c.l.bf16 %v10263_v58  ;;  %v2234_v61 = vmax.f32 %v1212_v56, 0.0 }
 0x239   : > { %v8193_v19 = vmul.f32 %v10258_v23, %v2226_v51  ;;  %v8197_v3 = vmul.f32 %v10260_v55, %v2227_v28  ;;  %3850 = vmatmul.mubr.bf16.gmra.mrb[168].mxu1 %v3104_v33  ;;  %5734 = vmatprep.mubr.bf16.mxu0 %v7683_v35  ;;  %v1645_v51 = vadd.f32 %v8046_v31, %v7436_v5  ;;  %v10266_v23 = vld [vmem:[#allocation48_spill] sm:$0xff]  ;;  %v10268_v33 = vunpack.c.h.bf16 %v10263_v58  ;;  %v10270_v55 = vld [vmem:[#allocation50_spill] sm:$0xff] }
 0x23a   : > { %v8204_v8 = vmul.f32 %v10264_v49, %v2235_v17  ;;  %v10267_v39 = vunpack.c.l.bf16 %v10266_v23  ;;  %v10271_v24 = vunpack.c.l.bf16 %v10270_v55  ;;  %v10272_v17 = vunpack.c.h.bf16 %v7414_v34 }
 0x23b   : > { %10259 = vst [vmem:[#allocation45_spill] sm:$0xff] %v8193_v19  ;;  %10261 = vst [vmem:[#allocation59_spill] sm:$0xff] %v8197_v3  ;;  %v8214_v1 = vmul.f32 %v10268_v33, %v2236_v26  ;;  %v10274_v35 = vunpack.c.h.bf16 %v10266_v23  ;;  %v10275_v31 = vunpack.c.h.bf16 %v10270_v55  ;;  %v1674_v19 = vpop.f32.mrb[64].mxu1  ;;  %v8236_v33 = vld [vmem:[#allocation8 + $0x27c] sm:$0xff] }
 0x23c   : > { %10265 = vst [vmem:[#allocation65_spill] sm:$0xff] %v8204_v8  ;;  %v2960_v43 = vmul.f32 %v10267_v39, %v2224_v2  ;;  %v2969_v14 = vmul.f32 %v10271_v24, %v2233_v54  ;;  %v8220_v56 = vmul.f32 %v10272_v17, %v1961_v32  ;;  %v1248_v8 = vpop.f32.mrb[64].mxu0  ;;  %v10276_v54 = vunpack.c.h.bf16 %v7423_v63 }
 0x23d   : > { %10269 = vst [vmem:[#allocation44_spill] sm:$0xff] %v8214_v1  ;;  %v2961_v49 = vmul.f32 %v10274_v35, %v2225_v53  ;;  %v2970_v28 = vmul.f32 %v10275_v31, %v2234_v61  ;;  %v1249_v58 = vadd.f32 %v1248_v8, %v7127_v20  ;;  %v1250_v39 = vpop.f32.mrb[65].mxu0  ;;  %v1675_v23 = vadd.f32 %v1674_v19, %v7436_v5  ;;  %v8234_v53 = vpop.f32.mrb[65].mxu1 }
 0x23e   : > { %10273 = vst [vmem:[#allocation46_spill] sm:$0xff] %v8220_v56  ;;  %v8231_v34 = vmul.f32 %v10276_v54, %v1970_v44  ;;  %v3113_v32 = vpack.c.bf16 %v2969_v14, %v2960_v43  ;;  %v1251_v61 = vadd.f32 %v1250_v39, %v7141_v27  ;;  %v1252_v55 = vpop.f32.mrb[66].mxu0  ;;  %v1978_v17 = vmax.f32 %v1645_v51, 0.0  ;;  %v1678_v35 = vpop.f32.mrb[66].mxu1 }
 0x23f   : > { %v3114_v24 = vpack.c.bf16 %v2970_v28, %v2961_v49  ;;  %v1647_v8 = vadd.f32 %v8053_v42, %v10254_v52  ;;  %v1956_v31 = vmax.f32 %v1249_v58, 0.0  ;;  %v1253_v63 = vadd.f32 %v1252_v55, %v7127_v20  ;;  %v1254_v44 = vpop.f32.mrb[67].mxu0  ;;  %v8243_v43 = vpop.f32.mrb[67].mxu1  ;;  %v10284_v28 = vld [vmem:[#allocation56_spill] sm:$0xff] }
 0x240   : > { %10277 = vst [vmem:[#allocation54_spill] sm:$0xff] %v8231_v34  ;;  %v2032_v14 = vmax.f32 %v1675_v23, 0.0  ;;  %v1679_v19 = vadd.f32 %v1678_v35, %v7436_v5  ;;  %v1957_v54 = vmax.f32 %v1251_v61, 0.0  ;;  %v1255_v2 = vadd.f32 %v1254_v44, %v7141_v27  ;;  %5735 = vmatmul.mubr.bf16.gmra.mrb[172].mxu0 %v7744_v47  ;;  %v10280_v35 = vld [vmem:[#allocation51_spill] sm:$0xff]  ;;  %v1258_v34 = vpop.f32.mrb[68].mxu0 }
 0x241   : > { %3857 = vmatprep.mubr.bf16.mxu1 %v3114_v24  ;;  %v1649_v51 = vadd.f32 %v8058_v12, %v7436_v5  ;;  %v1965_v42 = vmax.f32 %v1253_v63, 0.0  ;;  %v10278_v49 = vunpack.c.l.bf16 %v7660_v46  ;;  %v1979_v55 = vmax.f32 %v1647_v8, 0.0  ;;  %v10282_v47 = vld [vmem:[#allocation55_spill] sm:$0xff] }
 0x242   : > { %3858 = vmatmul.mubr.bf16.gmra.mrb[172].mxu1 %v3113_v32  ;;  %v2041_v39 = vmax.f32 %v1679_v19, 0.0  ;;  %v1966_v61 = vmax.f32 %v1255_v2, 0.0  ;;  %v8257_v24 = vadd.f32 %v8063_v9, %v10254_v52  ;;  %v10281_v63 = vunpack.c.l.bf16 %v10280_v35 }
 0x243   : > { %v8252_v58 = vmul.f32 %v10278_v49, %v2032_v14  ;;  %v10283_v32 = vunpack.c.l.bf16 %v10282_v47  ;;  %v10285_v14 = vunpack.c.l.bf16 %v10284_v28  ;;  %v10287_v19 = vunpack.c.l.bf16 %v7726_v7 }
 0x244   : > { %v2692_v44 = vmul.f32 %v10281_v63, %v1956_v31  ;;  %v10289_v8 = vunpack.c.h.bf16 %v10280_v35  ;;  %v10290_v23 = vunpack.c.h.bf16 %v10282_v47  ;;  %v1987_v56 = vmax.f32 %v1649_v51, 0.0  ;;  %v1684_v31 = vpop.f32.mrb[68].mxu1  ;;  %v10313_v63 = vld [vmem:[#allocation61_spill] sm:$0xff] }
 0x245   : > { %10279 = vst [vmem:[#allocation47_spill] sm:$0xff] %v8252_v58  ;;  %v2701_v26 = vmul.f32 %v10283_v32, %v1965_v42  ;;  %v8266_v49 = vmul.f32 %v10285_v14, %v1978_v17  ;;  %v8270_v2 = vmul.f32 %v10287_v19, %v2041_v39  ;;  %v1259_v17 = vadd.f32 %v1258_v34, %v7127_v20  ;;  %v1260_v14 = vpop.f32.mrb[69].mxu0  ;;  %v8282_v35 = vpop.f32.mrb[69].mxu1 }
 0x246   : > { %v2693_v9 = vmul.f32 %v10289_v8, %v1957_v54  ;;  %v2702_v12 = vmul.f32 %v10290_v23, %v1966_v61  ;;  %v1685_v19 = vadd.f32 %v1684_v31, %v7436_v5  ;;  %v10293_v54 = vunpack.c.h.bf16 %v10284_v28  ;;  %v1262_v61 = vpop.f32.mrb[70].mxu0  ;;  %v1688_v8 = vpop.f32.mrb[70].mxu1  ;;  %v6221_v28 = vld [vmem:[#allocation10 + $0x1c8] sm:$0xff]  }
 0x247   : > { %10286 = vst [vmem:[#allocation72_spill] sm:$0xff] %v8266_v49  ;;  %10288 = vst [vmem:[#allocation49_spill] sm:$0xff] %v8270_v2  ;;  %v2980_v32 = vpack.c.bf16 %v2701_v26, %v2692_v44  ;;  %v1261_v51 = vadd.f32 %v1260_v14, %v7141_v27  ;;  %v6219_v26 = vld [vmem:[#allocation10 + $0x180] sm:$0xff]   ;;  %v1974_v44 = vmax.f32 %v1259_v17, 0.0  ;;  %v1263_v39 = vadd.f32 %v1262_v61, %v7127_v20  ;;  %v1264_v42 = vpop.f32.mrb[71].mxu0  ;;  %v8293_v2 = vpop.f32.mrb[71].mxu1 }
 0x248   : > { %v8286_v23 = vmul.f32 %v10293_v54, %v1979_v55  ;;  %v2981_v47 = vpack.c.bf16 %v2702_v12, %v2693_v9  ;;  %v2050_v31 = vmax.f32 %v1685_v19, 0.0  ;;  %v1689_v58 = vadd.f32 %v1688_v8, %v7436_v5  ;;  %v8295_v55 = vld [vmem:[#allocation8 + $0x154] sm:$0xff]  ;;  %v1268_v15 = vpop.f32.mrb[72].mxu0 }
 0x249   : > { %v1975_v14 = vmax.f32 %v1261_v51, 0.0  ;;  %v1988_v12 = vmax.f32 %v8257_v24, 0.0  ;;  %v1265_v9 = vadd.f32 %v1264_v42, %v7141_v27  ;;  %v1655_v17 = vadd.f32 %v8100_v62, %v7436_v5  ;;  %v10295_v54 = vld [vmem:[#allocation58_spill] sm:$0xff]  ;;  %v6222_v62 = vld [vmem:[#allocation10 + $0x188] sm:$0xff]  }
 0x24a   : > { %10294 = vst [vmem:[#allocation48_spill] sm:$0xff] %v8286_v23  ;;  %3898 = vmatprep.mubr.bf16.mxu0 %v2981_v47  ;;  %v10296_v61 = vunpack.c.l.bf16 %v10295_v54  ;;  %v1983_v19 = vmax.f32 %v1263_v39, 0.0  ;;  %v10298_v8 = vunpack.c.l.bf16 %v7789_v40  ;;  %v2059_v23 = vmax.f32 %v1689_v58, 0.0 }
 0x24b   : > { %3899 = vmatmul.mubr.bf16.vlgmr.msra.gmra.mrb[176].mxu0 %v2980_v32  ;;  %v1984_v51 = vmax.f32 %v1265_v9, 0.0  ;;  %v1657_v24 = vadd.f32 %v8108_v45, %v10254_v52  ;;  %v1659_v42 = vadd.f32 %v8116_v18, %v7436_v5  ;;  %v10302_v32 = vld [vmem:[#allocation60_spill] sm:$0xff]  ;;  %v6224_v9 = vld [vmem:[#allocation10 + $0x1d0] sm:$0xff]   ;;  %v1996_v36 = vmax.f32 %v1655_v17, 0.0 }
 0x24c   : > { %v8303_v34 = vmul.f32 %v10296_v61, %v1987_v56  ;;  %v8307_v49 = vmul.f32 %v10298_v8, %v2050_v31  ;;  %5531 = vmatpush3.bf16.msra.mxu0 %v6219_v26  ;;  %v10300_v56 = vld [vmem:[#allocation57_spill] sm:$0xff]  ;;  %v10304_v31 = vunpack.c.l.bf16 %v7836_v25  ;;  %v10307_v8 = vunpack.c.h.bf16 %v10302_v32 }
 0x24d   : > { %v10301_v61 = vunpack.c.l.bf16 %v10300_v56  ;;  %5532 = vmatprep.subr.bf16.mxu0 %v6221_v28  ;;  %v10306_v18 = vunpack.c.h.bf16 %v10300_v56 }
 0x24e   : > { %10297 = vst [vmem:[#allocation50_spill] sm:$0xff] %v8303_v34  ;;  %10299 = vst [vmem:[#allocation51_spill] sm:$0xff] %v8307_v49  ;;  %v10303_v34 = vunpack.c.l.bf16 %v10302_v32  ;;  %v8320_v58 = vmul.f32 %v10304_v31, %v2059_v23  ;;  %v2720_v47 = vmul.f32 %v10307_v8, %v1984_v51  ;;  %v1270_v23 = vpop.f32.mrb[73].mxu0  ;;  %v2005_v32 = vmax.f32 %v1659_v42, 0.0 }
 0x24f   : > { %v2710_v39 = vmul.f32 %v10301_v61, %v1974_v44  ;;  %v2711_v26 = vmul.f32 %v10306_v18, %v1975_v14  ;;  %v1661_v44 = vadd.f32 %v8121_v57, %v10254_v52  ;;  %v1997_v14 = vmax.f32 %v1657_v24, 0.0  ;;  %v1272_v51 = vpop.f32.mrb[74].mxu0  ;;  %v8336_v57 = vld [vmem:[#allocation8 + $0x2a0] sm:$0xff]  ;;  %v6227_v24 = vld [vmem:[#allocation10 + $0x1d8] sm:$0xff]  }
 0x250   : > { %v2719_v3 = vmul.f32 %v10303_v34, %v1983_v19  ;;  %10305 = vst [vmem:[#allocation55_spill] sm:$0xff] %v8320_v58  ;;  %v1694_v34 = vpop.f32.mrb[72].mxu1  ;;  %v1269_v19 = vadd.f32 %v1268_v15, %v7127_v20  ;;  %v1271_v17 = vadd.f32 %v1270_v23, %v7141_v27  ;;  %5533 = vmatpush3.bf16.msra.mxu0 %v6222_v62  ;;  %v6225_v15 = vld [vmem:[#allocation10 + $0x190] sm:$0xff]   ;;  %v10308_v42 = vunpack.c.h.bf16 %v10295_v54 }
 0x251   : > { %v1695_v31 = vadd.f32 %v1694_v34, %v7436_v5  ;;  %v8333_v56 = vpop.f32.mrb[73].mxu1  ;;  %v2990_v18 = vpack.c.bf16 %v2720_v47, %v2711_v26  ;;  %5534 = vmatprep.subr.bf16.mxu0 %v6224_v9  ;;  %v2006_v62 = vmax.f32 %v1661_v44, 0.0  ;;  %v8352_v9 = vld [vmem:[#allocation8 + $0x2c4] sm:$0xff]  ;;  %v10314_v54 = vunpack.c.l.bf16 %v10313_v63 }
 0x252   : > { %v2989_v61 = vpack.c.bf16 %v2719_v3, %v2710_v39  ;;  %v1698_v8 = vpop.f32.mrb[74].mxu1  ;;  %v1992_v45 = vmax.f32 %v1269_v19, 0.0  ;;  %v1273_v3 = vadd.f32 %v1272_v51, %v7127_v20  ;;  %v1274_v39 = vpop.f32.mrb[75].mxu0  ;;  %v8344_v23 = vmul.f32 %v10308_v42, %v1988_v12  ;;  %10312 = vst [vmem:[#allocation57_spill] sm:$0xff] %v8352_v9  ;;  %v10320_v42 = vld [vmem:[#allocation63_spill] sm:$0xff] }
 0x253   : > { %v2068_v28 = vmax.f32 %v1695_v31, 0.0  ;;  %v1699_v34 = vadd.f32 %v1698_v8, %v7436_v5  ;;  %v8340_v49 = vpop.f32.mrb[75].mxu1  ;;  %v1993_v47 = vmax.f32 %v1271_v17, 0.0  ;;  %v1275_v26 = vadd.f32 %v1274_v39, %v7141_v27  ;;  %3906 = vmatprep.mubr.bf16.mxu0 %v2990_v18 }
 0x254   : > { %10309 = vst [vmem:[#allocation56_spill] sm:$0xff] %v8344_v23  ;;  %v2001_v19 = vmax.f32 %v1273_v3, 0.0  ;;  %3907 = vmatmul.mubr.bf16.gmra.mrb[180].mxu0 %v2989_v61  ;;  %v10310_v51 = vunpack.c.l.bf16 %v7886_v13  ;;  %v8356_v12 = vmul.f32 %v10314_v54, %v1996_v36  ;;  %v10316_v44 = vunpack.c.h.bf16 %v10313_v63  ;;  %v6228_v3 = vld [vmem:[#allocation10 + $0x198] sm:$0xff]   ;;  %v10323_v23 = vld [vmem:[#allocation64_spill] sm:$0xff] }
 0x255   : > { %v2077_v8 = vmax.f32 %v1699_v34, 0.0  ;;  %v2002_v18 = vmax.f32 %v1275_v26, 0.0  ;;  %5535 = vmatpush3.bf16.msra.mxu0 %v6225_v15  ;;  %v10324_v1 = vunpack.c.l.bf16 %v10323_v23  ;;  %v10325_v54 = vunpack.c.l.bf16 %v7932_v0 }
 0x256   : > { %v8349_v31 = vmul.f32 %v10310_v51, %v2068_v28  ;;  %10315 = vst [vmem:[#allocation60_spill] sm:$0xff] %v8356_v12  ;;  %v8360_v17 = vmul.f32 %v10316_v44, %v1997_v14  ;;  %v10318_v28 = vld [vmem:[#allocation62_spill] sm:$0xff]  ;;  %v10321_v51 = vunpack.c.l.bf16 %v10320_v42  ;;  %5536 = vmatprep.subr.bf16.mxu0 %v6227_v24  ;;  %v6230_v14 = vld [vmem:[#allocation10 + $0x1e0] sm:$0xff]   ;;  %v10328_v44 = vunpack.c.h.bf16 %v10320_v42 }
 0x257   : > { %v10319_v39 = vunpack.c.l.bf16 %v10318_v28  ;;  %v2737_v36 = vmul.f32 %v10324_v1, %v2001_v19  ;;  %v8373_v63 = vmul.f32 %v10325_v54, %v2077_v8  ;;  %v10327_v26 = vunpack.c.h.bf16 %v10318_v28 }
 0x258   : > { %10311 = vst [vmem:[#allocation58_spill] sm:$0xff] %v8349_v31  ;;  %10317 = vst [vmem:[#allocation61_spill] sm:$0xff] %v8360_v17  ;;  %v8367_v58 = vmul.f32 %v10321_v51, %v2005_v32  ;;  %v8379_v61 = vmul.f32 %v10328_v44, %v2006_v62  ;;  %v1704_v51 = vpop.f32.mrb[76].mxu1  ;;  %v8392_v62 = vadd.f32 %v8168_v38, %v7436_v5  ;;  %v6231_v44 = vld [vmem:[#allocation10 + $0x1a0] sm:$0xff]  }
 0x259   : > { %v2728_v34 = vmul.f32 %v10319_v39, %v1992_v45  ;;  %10326 = vst [vmem:[#allocation63_spill] sm:$0xff] %v8373_v63  ;;  %v2729_v15 = vmul.f32 %v10327_v26, %v1993_v47  ;;  %v10330_v45 = vunpack.c.h.bf16 %v10323_v23  ;;  %v1278_v39 = vpop.f32.mrb[76].mxu0  ;;  %v1705_v47 = vadd.f32 %v1704_v51, %v7436_v5  ;;  %v8388_v28 = vpop.f32.mrb[77].mxu1  ;;  %5537 = vmatpush3.bf16.msra.mxu0 %v6228_v3 }
 0x25a   : > { %10322 = vst [vmem:[#allocation62_spill] sm:$0xff] %v8367_v58  ;;  %10329 = vst [vmem:[#allocation64_spill] sm:$0xff] %v8379_v61  ;;  %v1279_v19 = vadd.f32 %v1278_v39, %v7127_v20  ;;  %v1280_v8 = vpop.f32.mrb[77].mxu0  ;;  %v8396_v23 = vadd.f32 %v8175_v16, %v10254_v52  ;;  %5538 = vmatprep.subr.bf16.mxu0 %v6230_v14  ;;  %v6233_v16 = vld [vmem:[#allocation10 + $0x1e8] sm:$0xff]   ;;  %v2014_v14 = vmax.f32 %v8392_v62, 0.0  ;;  %v10340_v62 = vld [vmem:[#allocation85_spill] sm:$0xff] }
 0x25b   : > { %v2738_v32 = vmul.f32 %v10330_v45, %v2002_v18  ;;  %v2998_v54 = vpack.c.bf16 %v2737_v36, %v2728_v34  ;;  %v1281_v18 = vadd.f32 %v1280_v8, %v7141_v27  ;;  %v1282_v42 = vpop.f32.mrb[78].mxu0  ;;  %v1708_v34 = vpop.f32.mrb[78].mxu1  ;;  %v8399_v36 = vld [vmem:[#allocation8 + $0x178] sm:$0xff]  ;;  %v2086_v24 = vmax.f32 %v1705_v47, 0.0 }
 0x25c   : > { %v2010_v45 = vmax.f32 %v1279_v19, 0.0  ;;  %v1283_v39 = vadd.f32 %v1282_v42, %v7127_v20  ;;  %v1284_v51 = vpop.f32.mrb[79].mxu0  ;;  %v1709_v38 = vadd.f32 %v1708_v34, %v7436_v5  ;;  %v8403_v1 = vpop.f32.mrb[79].mxu1  ;;  %v1669_v8 = vadd.f32 %v8180_v10, %v7436_v5  ;;  %v8426_v34 = vld [vmem:[#allocation8 + $0x2e8] sm:$0xff] }
 0x25d   : > { %v2999_v26 = vpack.c.bf16 %v2738_v32, %v2729_v15  ;;  %v2011_v15 = vmax.f32 %v1281_v18, 0.0  ;;  %v1285_v32 = vadd.f32 %v1284_v51, %v7141_v27  ;;  %v10331_v20 = vunpack.c.l.bf16 %v8060_v50  ;;  %5539 = vmatpush3.bf16.msra.mxu0 %v6231_v44  ;;  %v6234_v18 = vld [vmem:[#allocation10 + $0x1a8] sm:$0xff]   ;;  %v10335_v51 = vld [vmem:[#allocation73_spill] sm:$0xff]  ;;  %v1441_v58 = vpop.f32.mrb[80].mxu0 }
 0x25e   : > { %v2019_v19 = vmax.f32 %v1283_v39, 0.0  ;;  %v2095_v42 = vmax.f32 %v1709_v38, 0.0  ;;  %v2015_v31 = vmax.f32 %v8396_v23, 0.0  ;;  %v1671_v10 = vadd.f32 %v8184_v60, %v10254_v52  ;;  %10339 = vst [vmem:[#allocation73_spill] sm:$0xff] %v8426_v34  ;;  %5540 = vmatprep.subr.bf16.mxu0 %v6233_v16  ;;  %v6236_v60 = vld [vmem:[#allocation10 + $0x1f0] sm:$0xff]   ;;  %v1443_v17 = vpop.f32.mrb[81].mxu0 }
 0x25f   : > { %3914 = vmatprep.mubr.bf16.mxu0 %v2999_v26  ;;  %v8411_v47 = vmul.f32 %v10331_v20, %v2086_v24  ;;  %v2020_v27 = vmax.f32 %v1285_v32, 0.0  ;;  %v10333_v26 = vld [vmem:[#allocation70_spill] sm:$0xff]  ;;  %v10336_v3 = vunpack.c.l.bf16 %v10335_v51  ;;  %v10337_v38 = vunpack.c.l.bf16 %v8118_v59 }
 0x260   : > { %3915 = vmatmul.mubr.bf16.gmra.mrb[184].mxu0 %v2998_v54  ;;  %v10334_v39 = vunpack.c.l.bf16 %v10333_v26  ;;  %v2023_v32 = vmax.f32 %v1669_v8, 0.0  ;;  %v10341_v44 = vunpack.c.h.bf16 %v10333_v26  ;;  %v10346_v26 = vld [vmem:[#allocation81_spill] sm:$0xff] }
 0x261   : > { %10332 = vst [vmem:[#allocation94_spill] sm:$0xff] %v8411_v47  ;;  %v2755_v24 = vmul.f32 %v10336_v3, %v2019_v19  ;;  %v8424_v20 = vmul.f32 %v10337_v38, %v2095_v42  ;;  %v1714_v3 = vpop.f32.mrb[80].mxu1  ;;  %v10345_v38 = vld [vmem:[#allocation78_spill] sm:$0xff]  ;;  %5541 = vmatpush3.bf16.msra.mxu0 %v6234_v18  ;;  %v6237_v42 = vld [vmem:[#allocation10 + $0x1b0] sm:$0xff]  }
 0x262   : > { %v2746_v54 = vmul.f32 %v10334_v39, %v2010_v45  ;;  %v2747_v63 = vmul.f32 %v10341_v44, %v2011_v15  ;;  %v10342_v45 = vunpack.c.h.bf16 %v10335_v51  ;;  %v1442_v61 = vadd.f32 %v1441_v58, %v10345_v38  ;;  %v8440_v23 = vpop.f32.mrb[81].mxu1  ;;  %5542 = vmatprep.subr.bf16.mxu0 %v6236_v60  ;;  %v10347_v47 = vld [vmem:[#allocation66_spill] sm:$0xff] }
 0x263   : > { %10338 = vst [vmem:[#allocation70_spill] sm:$0xff] %v8424_v20  ;;  %v1715_v8 = vadd.f32 %v1714_v3, %v7436_v5  ;;  %v2024_v15 = vmax.f32 %v1671_v10, 0.0  ;;  %v1444_v51 = vadd.f32 %v1443_v17, %v10346_v26  ;;  %v6238_v10 = vld [vmem:[#allocation10 + $0x1f8] sm:$0xff]   ;;  %v10348_v17 = vunpack.c.l.bf16 %v10347_v47 }
 0x264   : > { %v2756_v39 = vmul.f32 %v10342_v45, %v2020_v27  ;;  %v3007_v59 = vpack.c.bf16 %v2755_v24, %v2746_v54  ;;  %v1445_v27 = vpop.f32.mrb[82].mxu0  ;;  %v1718_v45 = vpop.f32.mrb[82].mxu1  ;;  %v1958_v58 = vmax.f32 %v1442_v61, 0.0  ;;  %v10355_v60 = vunpack.c.l.bf16 %v8186_v41 }
 0x265   : > { %v1446_v54 = vadd.f32 %v1445_v27, %v10345_v38  ;;  %v1447_v24 = vpop.f32.mrb[83].mxu0  ;;  %v2104_v19 = vmax.f32 %v1715_v8, 0.0  ;;  %v1719_v16 = vadd.f32 %v1718_v45, %v7436_v5  ;;  %v8446_v3 = vpop.f32.mrb[83].mxu1  ;;  %v8450_v20 = vmul.f32 %v10348_v17, %v2014_v14  ;;  %v10352_v27 = vld [vmem:[#allocation71_spill] sm:$0xff]  ;;  %5543 = vmatpush3.bf16.msra.mxu0 %v6237_v42 }
 0x266   : > { %v3008_v44 = vpack.c.bf16 %v2756_v39, %v2747_v63  ;;  %v10350_v63 = vunpack.c.h.bf16 %v10347_v47  ;;  %v1959_v18 = vmax.f32 %v1444_v51, 0.0  ;;  %v1448_v61 = vadd.f32 %v1447_v24, %v10346_v26  ;;  %v8465_v17 = vld [vmem:[#allocation8 + $0x19c] sm:$0xff]  ;;  %v8467_v47 = vld [vmem:[#allocation8 + $0x30c] sm:$0xff]  ;;  %5544 = vmatprep.subr.bf16.mxu0 %v6238_v10 }
 0x267   : > { %10349 = vst [vmem:[#allocation85_spill] sm:$0xff] %v8450_v20  ;;  %v10353_v8 = vunpack.c.l.bf16 %v10352_v27  ;;  %v1967_v45 = vmax.f32 %v1446_v54, 0.0  ;;  %v8463_v12 = vmul.f32 %v10355_v60, %v2104_v19  ;;  %v2113_v14 = vmax.f32 %v1719_v16, 0.0  ;;  %10357 = vst [vmem:[#allocation71_spill] sm:$0xff] %v8467_v47  ;;  %v10359_v24 = vld [vmem:[#allocation40_spill] sm:$0xff]  ;;  %v6239_v19 = vld [vmem:[#allocation10 + $0x1b8] sm:$0xff]  }
 0x268   : > { %v8454_v39 = vmul.f32 %v10350_v63, %v2015_v31  ;;  %3922 = vmatprep.mubr.bf16.mxu0 %v3008_v44  ;;  %v1677_v31 = vadd.f32 %v8234_v53, %v10254_v52  ;;  %v1968_v51 = vmax.f32 %v1448_v61, 0.0  ;;  %v10358_v44 = vld [vmem:[#allocation41_spill] sm:$0xff]  ;;  %v10361_v16 = vunpack.c.h.bf16 %v10352_v27  ;;  %v10365_v20 = vld [vmem:[#allocation82_spill] sm:$0xff]  ;;  %v1451_v27 = vpop.f32.mrb[84].mxu0 }
 0x269   : > { %v8459_v6 = vmul.f32 %v10353_v8, %v2023_v32  ;;  %3923 = vmatmul.mubr.bf16.gmra.mrb[188].mxu0 %v3007_v59  ;;  %10356 = vst [vmem:[#allocation66_spill] sm:$0xff] %v8463_v12  ;;  %v10360_v63 = vpack.c.bf16 %v10358_v44, %v10359_v24  ;;  %v10363_v8 = vld [vmem:[#allocation74_spill] sm:$0xff]  ;;  %v10366_v53 = vunpack.c.l.bf16 %v10365_v20  ;;  %v10370_v42 = vunpack.c.h.bf16 %v10365_v20  ;;  %v6223_v32 = vld [vmem:[#allocation10 + $0x208] sm:$0xff]  }
 0x26a   : > { %10351 = vst [vmem:[#allocation78_spill] sm:$0xff] %v8454_v39  ;;  %v8478_v54 = vmul.f32 %v10361_v16, %v2024_v15  ;;  %v10364_v60 = vunpack.c.l.bf16 %v10363_v8  ;;  %v10367_v39 = vunpack.c.l.bf16 %v8236_v33  ;;  %v10369_v24 = vunpack.c.h.bf16 %v10363_v8  ;;  %v1724_v15 = vpop.f32.mrb[84].mxu1  ;;  %5545 = vmatpush3.bf16.msra.mxu0 %v6239_v19  ;;  %v8511_v19 = vld [vmem:[#allocation8 + $0x330] sm:$0xff] }
 0x26b   : > { %10354 = vst [vmem:[#allocation81_spill] sm:$0xff] %v8459_v6  ;;  %3930 = vmatprep.mubr.bf16.mxu0 %v10360_v63  ;;  %v2703_v61 = vmul.f32 %v10366_v53, %v1967_v45  ;;  %v2704_v59 = vmul.f32 %v10370_v42, %v1968_v51  ;;  %v1452_v45 = vadd.f32 %v1451_v27, %v10345_v38  ;;  %v1453_v53 = vpop.f32.mrb[85].mxu0 }
 0x26c   : > { %10362 = vst [vmem:[#allocation41_spill] sm:$0xff] %v8478_v54  ;;  %v2694_v6 = vmul.f32 %v10364_v60, %v1958_v58  ;;  %v8486_v44 = vmul.f32 %v10367_v39, %v2113_v14  ;;  %v2695_v63 = vmul.f32 %v10369_v24, %v1959_v18  ;;  %v1725_v10 = vadd.f32 %v1724_v15, %v7436_v5  ;;  %v8498_v14 = vpop.f32.mrb[85].mxu1  ;;  %v1455_v8 = vpop.f32.mrb[86].mxu0 }
 0x26d   : > { %v2033_v18 = vmax.f32 %v1677_v31, 0.0  ;;  %v1681_v20 = vadd.f32 %v8243_v43, %v10254_v52  ;;  %v1454_v51 = vadd.f32 %v1453_v53, %v10346_v26  ;;  %v1728_v42 = vpop.f32.mrb[86].mxu1  ;;  %v1457_v27 = vpop.f32.mrb[87].mxu0  ;;  %v1687_v31 = vadd.f32 %v8282_v35, %v10254_v52 }
 0x26e   : > { %10368 = vst [vmem:[#allocation40_spill] sm:$0xff] %v8486_v44  ;;  %v2982_v60 = vpack.c.bf16 %v2703_v61, %v2694_v6  ;;  %v2983_v24 = vpack.c.bf16 %v2704_v59, %v2695_v63  ;;  %v1976_v6 = vmax.f32 %v1452_v45, 0.0  ;;  %v1456_v61 = vadd.f32 %v1455_v8, %v10345_v38  ;;  %v8505_v16 = vpop.f32.mrb[87].mxu1  ;;  %v10371_v45 = vld [vmem:[#allocation53_spill] sm:$0xff]  ;;  %v10372_v8 = vld [vmem:[#allocation52_spill] sm:$0xff]  ;;  %v10378_v44 = vld [vmem:[#allocation79_spill] sm:$0xff] }
 0x26f   : > { %v2122_v39 = vmax.f32 %v1725_v10, 0.0  ;;  %v1729_v15 = vadd.f32 %v1728_v42, %v7436_v5  ;;  %v1977_v43 = vmax.f32 %v1454_v51, 0.0  ;;  %v1458_v53 = vadd.f32 %v1457_v27, %v10346_v26 }
 0x270   : > { %4059 = vmatprep.mubr.bf16.mxu1 %v2983_v24  ;;  %v1985_v63 = vmax.f32 %v1456_v61, 0.0  ;;  %v10373_v58 = vpack.c.bf16 %v10371_v45, %v10372_v8  ;;  %v10374_v10 = vunpack.c.l.bf16 %v8336_v57  ;;  %v10376_v51 = vunpack.c.h.bf16 %v7660_v46  ;;  %v10379_v45 = vld [vmem:[#allocation69_spill] sm:$0xff] }
 0x271   : > { %4060 = vmatmul.mubr.bf16.vlgmr.msra.gmra.mrb[176].mxu1 %v2982_v60  ;;  %v2131_v12 = vmax.f32 %v1729_v15, 0.0  ;;  %v2042_v27 = vmax.f32 %v1681_v20, 0.0  ;;  %v1691_v61 = vadd.f32 %v8293_v2, %v10254_v52  ;;  %v1986_v59 = vmax.f32 %v1458_v53, 0.0  ;;  %v6271_v60 = vld [vmem:[#allocation10 + $0x200] sm:$0xff]   ;;  %v6226_v20 = vld [vmem:[#allocation10 + $0x210] sm:$0xff]  }
 0x272   : > { %3931 = vmatmul.mubr.bf16.gmra.mrb[192].mxu0 %v10373_v58  ;;  %v8518_v42 = vmul.f32 %v10374_v10, %v2122_v39  ;;  %v8523_v24 = vmul.f32 %v10376_v51, %v2033_v18  ;;  %v10380_v58 = vpack.c.bf16 %v10378_v44, %v10379_v45  ;;  %5739 = vmatpush3.bf16.msra.mxu1 %v6271_v60  ;;  %v10381_v39 = vld [vmem:[#allocation87_spill] sm:$0xff]  ;;  %v10383_v10 = vld [vmem:[#allocation25_spill] sm:$0xff]  ;;  %v10385_v46 = vunpack.c.l.bf16 %v8352_v9  ;;  %v1461_v60 = vpop.f32.mrb[88].mxu0 }
 0x273   : > { %v10382_v8 = vunpack.c.l.bf16 %v10381_v39  ;;  %v10384_v35 = vunpack.c.l.bf16 %v10383_v10  ;;  %5740 = vmatprep.subr.bf16.mxu1 %v6223_v32  ;;  %v2051_v53 = vmax.f32 %v1687_v31, 0.0  ;;  %v10387_v44 = vunpack.c.h.bf16 %v10381_v39  ;;  %v8550_v39 = vld [vmem:[#allocation8 + $0x354] sm:$0xff] }
 0x274   : > { %10375 = vst [vmem:[#allocation74_spill] sm:$0xff] %v8518_v42  ;;  %10377 = vst [vmem:[#allocation82_spill] sm:$0xff] %v8523_v24  ;;  %3938 = vmatprep.mubr.bf16.mxu0 %v10380_v58  ;;  %v8536_v18 = vmul.f32 %v10385_v46, %v2131_v12  ;;  %v10388_v45 = vunpack.c.h.bf16 %v10383_v10  ;;  %v2060_v10 = vmax.f32 %v1691_v61, 0.0  ;;  %v10391_v61 = vunpack.c.h.bf16 %v7789_v40  ;;  %v6232_v40 = vld [vmem:[#allocation10 + $0x220] sm:$0xff]  }
 0x275   : > { %v2712_v15 = vmul.f32 %v10382_v8, %v1976_v6  ;;  %v2721_v54 = vmul.f32 %v10384_v35, %v1985_v63  ;;  %v2713_v51 = vmul.f32 %v10387_v44, %v1977_v43  ;;  %v1734_v6 = vpop.f32.mrb[88].mxu1  ;;  %v1462_v63 = vadd.f32 %v1461_v60, %v10345_v38  ;;  %v1463_v35 = vpop.f32.mrb[89].mxu0 }
 0x276   : > { %10386 = vst [vmem:[#allocation53_spill] sm:$0xff] %v8536_v18  ;;  %v2722_v58 = vmul.f32 %v10388_v45, %v1986_v59  ;;  %v1735_v46 = vadd.f32 %v1734_v6, %v7436_v5  ;;  %v8548_v31 = vpop.f32.mrb[89].mxu1  ;;  %v10389_v43 = vunpack.c.h.bf16 %v7726_v7  ;;  %v1464_v44 = vadd.f32 %v1463_v35, %v10346_v26  ;;  %v1465_v45 = vpop.f32.mrb[90].mxu0  ;;  %5741 = vmatpush3.bf16.msra.mxu1 %v6223_v32  ;;  %v8561_v7 = vld [vmem:[#allocation8 + $0x1c0] sm:$0xff] }
 0x277   : > { %v2991_v24 = vpack.c.bf16 %v2721_v54, %v2712_v15  ;;  %v1738_v54 = vpop.f32.mrb[90].mxu1  ;;  %v1994_v15 = vmax.f32 %v1462_v63, 0.0  ;;  %v1466_v12 = vadd.f32 %v1465_v45, %v10345_v38  ;;  %v1467_v8 = vpop.f32.mrb[91].mxu0  ;;  %5742 = vmatprep.subr.bf16.mxu1 %v6226_v20  ;;  %v8565_v35 = vmul.f32 %v10391_v61, %v2051_v53  ;;  %v8577_v53 = vld [vmem:[#allocation8 + $0x378] sm:$0xff]  ;;  %v10401_v61 = vld [vmem:[#allocation20_spill] sm:$0xff] }
 0x278   : > { %v8554_v59 = vmul.f32 %v10389_v43, %v2042_v27  ;;  %v2992_v60 = vpack.c.bf16 %v2722_v58, %v2713_v51  ;;  %v2140_v6 = vmax.f32 %v1735_v46, 0.0  ;;  %v1739_v2 = vadd.f32 %v1738_v54, %v7436_v5  ;;  %v8559_v42 = vpop.f32.mrb[91].mxu1  ;;  %v6229_v27 = vld [vmem:[#allocation10 + $0x218] sm:$0xff]   ;;  %v10393_v46 = vld [vmem:[#allocation89_spill] sm:$0xff]  ;;  %v10394_v43 = vld [vmem:[#allocation88_spill] sm:$0xff]  ;;  %10398 = vst [vmem:[#allocation87_spill] sm:$0xff] %v8577_v53 }
 0x279   : > { %10392 = vst [vmem:[#allocation79_spill] sm:$0xff] %v8565_v35  ;;  %v1995_v51 = vmax.f32 %v1464_v44, 0.0  ;;  %v1468_v32 = vadd.f32 %v1467_v8, %v10346_v26  ;;  %v2003_v63 = vmax.f32 %v1466_v12, 0.0  ;;  %v10395_v45 = vpack.c.bf16 %v10393_v46, %v10394_v43  ;;  %v10402_v46 = vld [vmem:[#allocation19_spill] sm:$0xff] }
 0x27a   : > { %10390 = vst [vmem:[#allocation52_spill] sm:$0xff] %v8554_v59  ;;  %4067 = vmatprep.mubr.bf16.mxu1 %v2992_v60  ;;  %v10396_v54 = vunpack.c.l.bf16 %v8426_v34  ;;  %v2149_v59 = vmax.f32 %v1739_v2, 0.0  ;;  %v10399_v8 = vunpack.c.h.bf16 %v7836_v25  ;;  %v1697_v12 = vadd.f32 %v8333_v56, %v10254_v52  ;;  %5743 = vmatpush3.bf16.msra.mxu1 %v6226_v20  ;;  %v10409_v56 = vld [vmem:[#allocation22_spill] sm:$0xff]  ;;  %v10422_v34 = vld [vmem:[#allocation31_spill] sm:$0xff] }
 0x27b   : > { %3939 = vmatmul.mubr.bf16.gmra.mrb[196].mxu0 %v10395_v45  ;;  %4068 = vmatmul.mubr.bf16.gmra.mrb[180].mxu1 %v2991_v24  ;;  %v2004_v60 = vmax.f32 %v1468_v32, 0.0  ;;  %v10403_v24 = vpack.c.bf16 %v10401_v61, %v10402_v46  ;;  %v10404_v2 = vunpack.c.l.bf16 %v7923_v48  ;;  %v10405_v45 = vunpack.c.l.bf16 %v8007_v4 }
 0x27c   : > { %v8574_v18 = vmul.f32 %v10396_v54, %v2140_v6  ;;  %v8581_v44 = vmul.f32 %v10399_v8, %v2060_v10  ;;  %v10406_v25 = vunpack.c.l.bf16 %v8467_v47  ;;  %v10408_v8 = vld [vmem:[#allocation21_spill] sm:$0xff]  ;;  %5744 = vmatprep.subr.bf16.mxu1 %v6229_v27  ;;  %v10410_v61 = vunpack.c.h.bf16 %v7923_v48  ;;  %v1471_v6 = vpop.f32.mrb[92].mxu0 }
 0x27d   : > { %3946 = vmatprep.mubr.bf16.mxu0 %v10403_v24  ;;  %v2730_v43 = vmul.f32 %v10404_v2, %v1994_v15  ;;  %v2739_v54 = vmul.f32 %v10405_v45, %v2003_v63  ;;  %v10411_v46 = vunpack.c.h.bf16 %v8007_v4  ;;  %v1744_v15 = vpop.f32.mrb[92].mxu1  ;;  %v10412_v63 = vld [vmem:[#allocation26_spill] sm:$0xff]  ;;  %v2069_v4 = vmax.f32 %v1697_v12, 0.0  ;;  %v8621_v12 = vld [vmem:[#allocation8 + $0x1e4] sm:$0xff] }
 0x27e   : > { %10397 = vst [vmem:[#allocation69_spill] sm:$0xff] %v8574_v18  ;;  %10400 = vst [vmem:[#allocation25_spill] sm:$0xff] %v8581_v44  ;;  %v8595_v10 = vmul.f32 %v10406_v25, %v2149_v59  ;;  %v2731_v20 = vmul.f32 %v10410_v61, %v1995_v51  ;;  %v1472_v59 = vadd.f32 %v1471_v6, %v10345_v38  ;;  %v1473_v25 = vpop.f32.mrb[93].mxu0  ;;  %v8610_v51 = vpop.f32.mrb[93].mxu1  ;;  %5745 = vmatpush3.bf16.msra.mxu1 %v6229_v27 }
 0x27f   : > { %v2740_v24 = vmul.f32 %v10411_v46, %v2004_v60  ;;  %v3000_v58 = vpack.c.bf16 %v2739_v54, %v2730_v43  ;;  %v1745_v48 = vadd.f32 %v1744_v15, %v7436_v5  ;;  %v8614_v60 = vadd.f32 %v8340_v49, %v10254_v52  ;;  %v1475_v46 = vpop.f32.mrb[94].mxu0  ;;  %v1748_v2 = vpop.f32.mrb[94].mxu1  ;;  %5746 = vmatprep.subr.bf16.mxu1 %v6232_v40  ;;  %v6235_v49 = vld [vmem:[#allocation10 + $0x228] sm:$0xff]  }
 0x280   : > { %10407 = vst [vmem:[#allocation89_spill] sm:$0xff] %v8595_v10  ;;  %v1474_v61 = vadd.f32 %v1473_v25, %v10346_v26  ;;  %v2012_v6 = vmax.f32 %v1472_v59, 0.0  ;;  %v1476_v43 = vadd.f32 %v1475_v46, %v10345_v38  ;;  %v1477_v54 = vpop.f32.mrb[95].mxu0  ;;  %v1749_v15 = vadd.f32 %v1748_v2, %v7436_v5  ;;  %v8619_v18 = vpop.f32.mrb[95].mxu1  ;;  %v8629_v59 = vld [vmem:[#allocation8 + $0x39c] sm:$0xff]  ;;  %v10414_v2 = vld [vmem:[#allocation29_spill] sm:$0xff] }
 0x281   : > { %v3001_v45 = vpack.c.bf16 %v2740_v24, %v2731_v20  ;;  %v2158_v32 = vmax.f32 %v1745_v48, 0.0  ;;  %v8625_v25 = vadd.f32 %v8388_v28, %v10254_v52  ;;  %v1478_v27 = vadd.f32 %v1477_v54, %v10346_v26  ;;  %10413 = vst [vmem:[#allocation88_spill] sm:$0xff] %v8629_v59  ;;  %v10415_v46 = vld [vmem:[#allocation28_spill] sm:$0xff] }
 0x282   : > { %v2013_v20 = vmax.f32 %v1474_v61, 0.0  ;;  %v2021_v48 = vmax.f32 %v1476_v43, 0.0  ;;  %v10416_v10 = vpack.c.bf16 %v10414_v2, %v10415_v46  ;;  %v10417_v44 = vunpack.c.l.bf16 %v8511_v19  ;;  %v10421_v43 = vld [vmem:[#allocation35_spill] sm:$0xff]  ;;  %5747 = vmatpush3.bf16.msra.mxu1 %v6232_v40 }
 0x283   : > { %4075 = vmatprep.mubr.bf16.mxu1 %v3001_v45  ;;  %v2167_v28 = vmax.f32 %v1749_v15, 0.0  ;;  %v10419_v54 = vunpack.c.h.bf16 %v7886_v13  ;;  %v2078_v24 = vmax.f32 %v8614_v60, 0.0  ;;  %v2022_v47 = vmax.f32 %v1478_v27, 0.0  ;;  %5748 = vmatprep.subr.bf16.mxu1 %v6235_v49  ;;  %v6240_v27 = vld [vmem:[#allocation10 + $0x230] sm:$0xff]  }
 0x284   : > { %3947 = vmatmul.mubr.bf16.gmra.mrb[200].mxu0 %v10416_v10  ;;  %4076 = vmatmul.mubr.bf16.gmra.mrb[184].mxu1 %v3000_v58  ;;  %v8636_v35 = vmul.f32 %v10417_v44, %v2158_v32  ;;  %v10423_v9 = vpack.c.bf16 %v10421_v43, %v10422_v34  ;;  %v10424_v44 = vunpack.c.l.bf16 %v8082_v21  ;;  %v10425_v32 = vunpack.c.l.bf16 %v8177_v37  ;;  %v10430_v43 = vld [vmem:[#allocation23_spill] sm:$0xff] }
 0x285   : > { %v8641_v45 = vmul.f32 %v10419_v54, %v2069_v4  ;;  %v10426_v13 = vunpack.c.l.bf16 %v8550_v39  ;;  %v2633_v60 = vunpack.c.l.bf16 %v8629_v59  ;;  %v2087_v34 = vmax.f32 %v8625_v25, 0.0  ;;  %v1754_v54 = vpop.f32.mrb[96].mxu1 }
 0x286   : > { %10418 = vst [vmem:[#allocation20_spill] sm:$0xff] %v8636_v35  ;;  %3954 = vmatprep.mubr.bf16.mxu0 %v10423_v9  ;;  %v2748_v10 = vmul.f32 %v10424_v44, %v2012_v6  ;;  %v2757_v15 = vmul.f32 %v10425_v32, %v2021_v48  ;;  %v10428_v9 = vunpack.c.h.bf16 %v8082_v21  ;;  %v10429_v40 = vunpack.c.h.bf16 %v8177_v37  ;;  %v1481_v6 = vpop.f32.mrb[96].mxu0  ;;  %v10431_v48 = vld [vmem:[#allocation27_spill] sm:$0xff]  ;;  %v8668_v58 = vpop.f32.mrb[97].mxu1  ;;  %5749 = vmatpush3.bf16.msra.mxu1 %v6235_v49 }
 0x287   : > { %10420 = vst [vmem:[#allocation19_spill] sm:$0xff] %v8641_v45  ;;  %v8654_v4 = vmul.f32 %v10426_v13, %v2167_v28  ;;  %v1482_v28 = vadd.f32 %v1481_v6, %v10345_v38  ;;  %v1483_v32 = vpop.f32.mrb[97].mxu0  ;;  %v1755_v25 = vadd.f32 %v1754_v54, %v7436_v5  ;;  %v8672_v21 = vadd.f32 %v8403_v1, %v10254_v52  ;;  %v10433_v6 = vld [vmem:[#allocation34_spill] sm:$0xff]  ;;  %v8681_v1 = vld [vmem:[#allocation8 + $0x3c0] sm:$0xff] }
 0x288   : > { %v2749_v2 = vmul.f32 %v10428_v9, %v2013_v20  ;;  %v2758_v46 = vmul.f32 %v10429_v40, %v2022_v47  ;;  %v3009_v13 = vpack.c.bf16 %v2757_v15, %v2748_v10  ;;  %v1484_v37 = vadd.f32 %v1483_v32, %v10346_v26  ;;  %v1485_v47 = vpop.f32.mrb[98].mxu0  ;;  %v1758_v9 = vpop.f32.mrb[98].mxu1  ;;  %v10432_v40 = vld [vmem:[#allocation91_spill] sm:$0xff]  ;;  %10435 = vst [vmem:[#allocation26_spill] sm:$0xff] %v8681_v1  ;;  %v6241_v32 = vld [vmem:[#allocation10 + $0x238] sm:$0xff]  }
 0x289   : > { %10427 = vst [vmem:[#allocation21_spill] sm:$0xff] %v8654_v4  ;;  %v2030_v10 = vmax.f32 %v1482_v28, 0.0  ;;  %v1486_v15 = vadd.f32 %v1485_v47, %v10345_v38  ;;  %v1487_v61 = vpop.f32.mrb[99].mxu0  ;;  %v2176_v54 = vmax.f32 %v1755_v25, 0.0  ;;  %v1759_v35 = vadd.f32 %v1758_v9, %v7436_v5  ;;  %v8679_v4 = vpop.f32.mrb[99].mxu1  ;;  %5750 = vmatprep.subr.bf16.mxu1 %v6240_v27 }
 0x28a   : > { %v3010_v20 = vpack.c.bf16 %v2758_v46, %v2749_v2  ;;  %10434 = vst [vmem:[#allocation22_spill] sm:$0xff] %v8679_v4  ;;  %v10436_v2 = vunpack.c.h.bf16 %v7932_v0  ;;  %v2031_v45 = vmax.f32 %v1484_v37, 0.0  ;;  %v1488_v49 = vadd.f32 %v1487_v61, %v10346_v26  ;;  %5751 = vmatpush3.bf16.msra.mxu1 %v6240_v27  ;;  %v10451_v0 = vld [vmem:[#allocation36_spill] sm:$0xff] }
 0x28b   : > { %v2039_v47 = vmax.f32 %v1486_v15, 0.0  ;;  %v10437_v25 = vpack.c.bf16 %v8133_v29, %v8127_v22  ;;  %v10438_v9 = vunpack.c.l.bf16 %v8577_v53  ;;  %v2185_v4 = vmax.f32 %v1759_v35, 0.0  ;;  %v10442_v22 = vld [vmem:[#allocation80_spill] sm:$0xff]  ;;  %5752 = vmatprep.subr.bf16.mxu1 %v6241_v32 }
 0x28c   : > { %v8685_v46 = vmul.f32 %v10436_v2, %v2078_v24  ;;  %4083 = vmatprep.mubr.bf16.mxu1 %v3010_v20  ;;  %v8697_v24 = vld [vmem:[#allocation8 + $0x3e4] sm:$0xff]  ;;  %v10441_v61 = vunpack.c.h.bf16 %v8060_v50  ;;  %v1717_v20 = vadd.f32 %v8440_v23, %v10254_v52  ;;  %v2040_v15 = vmax.f32 %v1488_v49, 0.0 }
 0x28d   : > { %3955 = vmatmul.mubr.bf16.gmra.mrb[204].mxu0 %v10437_v25  ;;  %4084 = vmatmul.mubr.bf16.gmra.mrb[188].mxu1 %v3009_v13  ;;  %v8694_v44 = vmul.f32 %v10438_v9, %v2176_v54  ;;  %10440 = vst [vmem:[#allocation28_spill] sm:$0xff] %v8697_v24  ;;  %v10443_v29 = vld [vmem:[#allocation76_spill] sm:$0xff]  ;;  %v2642_v54 = vunpack.c.l.bf16 %v8681_v1  ;;  %v2096_v35 = vmax.f32 %v8672_v21, 0.0  ;;  %v10445_v2 = vunpack.c.l.bf16 %v8200_v30  ;;  %v6242_v23 = vld [vmem:[#allocation11] sm:$0xff]   ;;  %v1491_v21 = vpop.f32.mrb[100].mxu0 }
 0x28e   : > { %v8701_v37 = vmul.f32 %v10441_v61, %v2087_v34  ;;  %v10444_v13 = vpack.c.bf16 %v10442_v22, %v10443_v29  ;;  %v10446_v50 = vunpack.c.l.bf16 %v8295_v55  ;;  %v8714_v9 = vmul.f32 %v2633_v60, %v2185_v4  ;;  %5753 = vmatpush3.bf16.msra.mxu1 %v6241_v32  ;;  %v10452_v32 = vld [vmem:[#allocation93_spill] sm:$0xff]  ;;  %v10486_v1 = vld [vmem:[#allocation68_spill] sm:$0xff] }
 0x28f   : > { %10439 = vst [vmem:[#allocation29_spill] sm:$0xff] %v8694_v44  ;;  %v2766_v25 = vmul.f32 %v10445_v2, %v2030_v10  ;;  %v10448_v49 = vunpack.c.h.bf16 %v8200_v30  ;;  %v1721_v22 = vadd.f32 %v8446_v3, %v10254_v52  ;;  %v10449_v27 = vunpack.c.h.bf16 %v8295_v55  ;;  %v8736_v44 = vld [vmem:[#allocation8 + $0x208] sm:$0xff]  ;;  %5786 = vmatprep.subr.bf16.mxu1 %v6242_v23 }
 0x290   : > { %3962 = vmatprep.mubr.bf16.mxu0 %v10444_v13  ;;  %v2775_v34 = vmul.f32 %v10446_v50, %v2039_v47  ;;  %10447 = vst [vmem:[#allocation35_spill] sm:$0xff] %v8714_v9  ;;  %v1764_v13 = vpop.f32.mrb[100].mxu1  ;;  %v2651_v10 = vunpack.c.l.bf16 %v8697_v24  ;;  %v1492_v2 = vadd.f32 %v1491_v21, %v10345_v38  ;;  %v1493_v47 = vpop.f32.mrb[101].mxu0  ;;  %v2105_v50 = vmax.f32 %v1717_v20, 0.0  ;;  %v10456_v9 = vld [vmem:[#allocation75_spill] sm:$0xff]  ;;  %v8804_v24 = vld [vmem:[#allocation8 + $0x450] sm:$0xff] }
 0x291   : > { %v2767_v61 = vmul.f32 %v10448_v49, %v2031_v45  ;;  %v2776_v29 = vmul.f32 %v10449_v27, %v2040_v15  ;;  %v1765_v30 = vadd.f32 %v1764_v13, %v7436_v5  ;;  %v8727_v45 = vpop.f32.mrb[101].mxu1  ;;  %v1494_v3 = vadd.f32 %v1493_v47, %v10346_v26  ;;  %v1495_v55 = vpop.f32.mrb[102].mxu0  ;;  %v10450_v27 = vld [vmem:[#allocation30_spill] sm:$0xff] }
 0x292   : > { %v3018_v4 = vpack.c.bf16 %v2775_v34, %v2766_v25  ;;  %v1768_v49 = vpop.f32.mrb[102].mxu1  ;;  %v2048_v21 = vmax.f32 %v1492_v2, 0.0  ;;  %v1496_v25 = vadd.f32 %v1495_v55, %v10345_v38  ;;  %v1497_v34 = vpop.f32.mrb[103].mxu0  ;;  %v2114_v20 = vmax.f32 %v1721_v22, 0.0  ;;  %v8749_v22 = vld [vmem:[#allocation8 + $0x408] sm:$0xff] }
 0x293   : > { %v3019_v15 = vpack.c.bf16 %v2776_v29, %v2767_v61  ;;  %v2194_v59 = vmax.f32 %v1765_v30, 0.0  ;;  %v1769_v60 = vadd.f32 %v1768_v49, %v7436_v5  ;;  %v8734_v13 = vpop.f32.mrb[103].mxu1  ;;  %v2049_v47 = vmax.f32 %v1494_v3, 0.0  ;;  %v10455_v30 = vld [vmem:[#allocation77_spill] sm:$0xff]  ;;  %10459 = vst [vmem:[#allocation27_spill] sm:$0xff] %v8749_v22  ;;  %v10462_v29 = vld [vmem:[#allocation86_spill] sm:$0xff] }
 0x294   : > { %v1498_v61 = vadd.f32 %v1497_v34, %v10346_v26  ;;  %v10453_v2 = vunpack.c.h.bf16 %v10452_v32  ;;  %v2057_v55 = vmax.f32 %v1496_v25, 0.0  ;;  %v10457_v49 = vpack.c.bf16 %v10455_v30, %v10456_v9  ;;  %v10463_v32 = vld [vmem:[#allocation84_spill] sm:$0xff]  ;;  %v1774_v25 = vpop.f32.mrb[104].mxu1 }
 0x295   : > { %4091 = vmatprep.mubr.bf16.mxu1 %v3019_v15  ;;  %v8747_v53 = vmul.f32 %v2642_v54, %v2194_v59  ;;  %v2203_v23 = vmax.f32 %v1769_v60, 0.0  ;;  %v10460_v3 = vunpack.c.h.bf16 %v8186_v41  ;;  %v10466_v54 = vunpack.c.l.bf16 %v8465_v17  ;;  %v8766_v41 = vld [vmem:[#allocation8 + $0x42c] sm:$0xff] }
 0x296   : > { %v8742_v28 = vmul.f32 %v10453_v2, %v2096_v35  ;;  %3963 = vmatmul.mubr.bf16.gmra.mrb[208].mxu0 %v10457_v49  ;;  %4092 = vmatmul.mubr.bf16.gmra.mrb[192].mxu1 %v3018_v4  ;;  %v2058_v34 = vmax.f32 %v1498_v61, 0.0  ;;  %v10464_v35 = vpack.c.bf16 %v10462_v29, %v10463_v32  ;;  %v10465_v4 = vunpack.c.l.bf16 %v8399_v36  ;;  %v10469_v61 = vld [vmem:[#allocation39_spill] sm:$0xff] }
 0x297   : > { %10458 = vst [vmem:[#allocation23_spill] sm:$0xff] %v8747_v53  ;;  %v8753_v15 = vmul.f32 %v10460_v3, %v2105_v50  ;;  %v2793_v60 = vmul.f32 %v10466_v54, %v2057_v55  ;;  %v8764_v2 = vmul.f32 %v2651_v10, %v2203_v23  ;;  %v10468_v50 = vld [vmem:[#allocation92_spill] sm:$0xff]  ;;  %v10470_v29 = vunpack.c.h.bf16 %v8236_v33 }
 0x298   : > { %10454 = vst [vmem:[#allocation31_spill] sm:$0xff] %v8742_v28  ;;  %3970 = vmatprep.mubr.bf16.mxu0 %v10464_v35  ;;  %v2784_v59 = vmul.f32 %v10465_v4, %v2048_v21  ;;  %v10472_v3 = vunpack.c.h.bf16 %v8399_v36  ;;  %v10473_v35 = vunpack.c.h.bf16 %v8465_v17  ;;  %v1501_v4 = vpop.f32.mrb[104].mxu0  ;;  %v2660_v10 = vunpack.c.l.bf16 %v8749_v22 }
 0x299   : > { %10461 = vst [vmem:[#allocation91_spill] sm:$0xff] %v8753_v15  ;;  %10467 = vst [vmem:[#allocation34_spill] sm:$0xff] %v8764_v2  ;;  %v8772_v49 = vmul.f32 %v10470_v29, %v2114_v20  ;;  %v1502_v55 = vadd.f32 %v1501_v4, %v10345_v38  ;;  %v1503_v23 = vpop.f32.mrb[105].mxu0  ;;  %v1775_v33 = vadd.f32 %v1774_v25, %v7436_v5  ;;  %v8783_v20 = vpop.f32.mrb[105].mxu1  ;;  %v8788_v29 = vld [vmem:[#allocation8 + $0x22c] sm:$0xff]  ;;  %v10474_v2 = vld [vmem:[#allocation83_spill] sm:$0xff] }
 0x29a   : > { %v2785_v32 = vmul.f32 %v10472_v3, %v2049_v47  ;;  %v2794_v21 = vmul.f32 %v10473_v35, %v2058_v34  ;;  %v3027_v54 = vpack.c.bf16 %v2793_v60, %v2784_v59  ;;  %v1727_v36 = vadd.f32 %v8498_v14, %v10254_v52  ;;  %v1505_v47 = vpop.f32.mrb[106].mxu0  ;;  %v1778_v3 = vpop.f32.mrb[106].mxu1 }
 0x29b   : > { %10471 = vst [vmem:[#allocation80_spill] sm:$0xff] %v8772_v49  ;;  %v1504_v17 = vadd.f32 %v1503_v23, %v10346_v26  ;;  %v2669_v35 = vunpack.c.l.bf16 %v8766_v41  ;;  %v2066_v59 = vmax.f32 %v1502_v55, 0.0  ;;  %v1506_v60 = vadd.f32 %v1505_v47, %v10345_v38  ;;  %v1507_v4 = vpop.f32.mrb[107].mxu0  ;;  %v8793_v9 = vpop.f32.mrb[107].mxu1 }
 0x29c   : > { %v3028_v34 = vpack.c.bf16 %v2794_v21, %v2785_v32  ;;  %v2212_v30 = vmax.f32 %v1775_v33, 0.0  ;;  %v1779_v25 = vadd.f32 %v1778_v3, %v7436_v5  ;;  %v1508_v14 = vadd.f32 %v1507_v4, %v10346_v26  ;;  %v10478_v32 = vld [vmem:[#allocation24_spill] sm:$0xff] }
 0x29d   : > { %v2067_v53 = vmax.f32 %v1504_v17, 0.0  ;;  %v2075_v23 = vmax.f32 %v1506_v60, 0.0  ;;  %v10475_v55 = vpack.c.bf16 %v10340_v62, %v10474_v2  ;;  %v2541_v33 = vunpack.c.l.bf16 %v8788_v29  ;;  %v10479_v62 = vld [vmem:[#allocation90_spill] sm:$0xff] }
 0x29e   : > { %4099 = vmatprep.mubr.bf16.mxu1 %v3028_v34  ;;  %v8801_v47 = vmul.f32 %v2660_v10, %v2212_v30  ;;  %v2221_v3 = vmax.f32 %v1779_v25, 0.0  ;;  %v2123_v17 = vmax.f32 %v1727_v36, 0.0  ;;  %v8808_v34 = vadd.f32 %v8505_v16, %v10254_v52  ;;  %v8819_v25 = vld [vmem:[#allocation8 + $0x474] sm:$0xff]  ;;  %v10485_v16 = vld [vmem:[#allocation43_spill] sm:$0xff] }
 0x29f   : > { %3971 = vmatmul.mubr.bf16.gmra.mrb[212].mxu0 %v10475_v55  ;;  %4100 = vmatmul.mubr.bf16.gmra.mrb[196].mxu1 %v3027_v54  ;;  %v10477_v4 = vunpack.c.l.bf16 %v8561_v7  ;;  %v2076_v21 = vmax.f32 %v1508_v14, 0.0  ;;  %v10480_v2 = vpack.c.bf16 %v10478_v32, %v10479_v62  ;;  %v10481_v30 = vunpack.c.l.bf16 %v8621_v12  ;;  %v10483_v36 = vld [vmem:[#allocation37_spill] sm:$0xff]  ;;  %v10484_v55 = vld [vmem:[#allocation38_spill] sm:$0xff] }
 0x2a0   : > { %10476 = vst [vmem:[#allocation76_spill] sm:$0xff] %v8801_v47  ;;  %v8817_v54 = vmul.f32 %v2669_v35, %v2221_v3  ;;  %v10487_v14 = vunpack.c.h.bf16 %v8561_v7  ;;  %v1511_v35 = vpop.f32.mrb[108].mxu0  ;;  %v1784_v3 = vpop.f32.mrb[108].mxu1  ;;  %v2678_v62 = vunpack.c.l.bf16 %v8804_v24  ;;  %v8842_v7 = vadd.f32 %v8559_v42, %v10254_v52 }
 0x2a1   : > { %v2802_v60 = vmul.f32 %v10477_v4, %v2066_v59  ;;  %3978 = vmatprep.mubr.bf16.mxu0 %v10480_v2  ;;  %v2811_v10 = vmul.f32 %v10481_v30, %v2075_v23  ;;  %v8827_v59 = vadd.f32 %v8548_v31, %v10254_v52  ;;  %v10488_v4 = vunpack.c.h.bf16 %v8621_v12  ;;  %v1513_v30 = vpop.f32.mrb[109].mxu0  ;;  %v8838_v31 = vpop.f32.mrb[109].mxu1 }
 0x2a2   : > { %10482 = vst [vmem:[#allocation30_spill] sm:$0xff] %v8817_v54  ;;  %v2803_v32 = vmul.f32 %v10487_v14, %v2067_v53  ;;  %v1512_v2 = vadd.f32 %v1511_v35, %v10345_v38  ;;  %v1785_v22 = vadd.f32 %v1784_v3, %v7436_v5  ;;  %v1514_v53 = vadd.f32 %v1513_v30, %v10346_v26  ;;  %v1515_v12 = vpop.f32.mrb[110].mxu0  ;;  %v1788_v14 = vpop.f32.mrb[110].mxu1 }
 0x2a3   : > { %v2812_v23 = vmul.f32 %v10488_v4, %v2076_v21  ;;  %v3036_v15 = vpack.c.bf16 %v2811_v10, %v2802_v60  ;;  %v2687_v4 = vunpack.c.l.bf16 %v8819_v25  ;;  %v1516_v28 = vadd.f32 %v1515_v12, %v10345_v38  ;;  %v1517_v49 = vpop.f32.mrb[111].mxu0  ;;  %v8848_v54 = vpop.f32.mrb[111].mxu1 }
 0x2a4   : > { %v2084_v35 = vmax.f32 %v1512_v2, 0.0  ;;  %v2230_v47 = vmax.f32 %v1785_v22, 0.0  ;;  %v1789_v3 = vadd.f32 %v1788_v14, %v7436_v5  ;;  %v10489_v60 = vunpack.c.h.bf16 %v8336_v57  ;;  %v2324_v57 = vld [vmem:[#allocation8 + $0x250] sm:$0xff] }
 0x2a5   : > { %v3037_v21 = vpack.c.bf16 %v2812_v23, %v2803_v32  ;;  %v2085_v10 = vmax.f32 %v1514_v53, 0.0  ;;  %v1518_v30 = vadd.f32 %v1517_v49, %v10346_v26  ;;  %v2542_v32 = vunpack.c.h.bf16 %v8788_v29 }
 0x2a6   : > { %v8852_v42 = vmul.f32 %v10489_v60, %v2123_v17  ;;  %v2132_v23 = vmax.f32 %v8808_v34, 0.0  ;;  %v2093_v2 = vmax.f32 %v1516_v28, 0.0  ;;  %v8857_v12 = vmul.f32 %v2678_v62, %v2230_v47  ;;  %v10496_v34 = vld [vmem:[#allocation42_spill] sm:$0xff]  ;;  %v10497_v62 = vld [vmem:[#allocation67_spill] sm:$0xff]  ;;  %v5210_v60 = vpop.f32.mrb[112].mxu1 }
 0x2a7   : > { %4107 = vmatprep.mubr.bf16.mxu1 %v3037_v21  ;;  %v10492_v5 = vpack.c.bf16 %v10409_v56, %v10408_v8  ;;  %v2239_v22 = vmax.f32 %v1789_v3, 0.0  ;;  %v2141_v17 = vmax.f32 %v8827_v59, 0.0  ;;  %v2150_v53 = vmax.f32 %v8842_v7, 0.0 }
 0x2a8   : > { %10490 = vst [vmem:[#allocation36_spill] sm:$0xff] %v8852_v42  ;;  %10491 = vst [vmem:[#allocation93_spill] sm:$0xff] %v8857_v12  ;;  %4108 = vmatmul.mubr.bf16.gmra.mrb[200].mxu1 %v3036_v15  ;;  %v8866_v49 = vadd.f32 %v8610_v51, %v10254_v52  ;;  %v2094_v29 = vmax.f32 %v1518_v30, 0.0  ;;  %v10493_v28 = vpack.c.bf16 %v10412_v63, %v7914_v11  ;;  %v10494_v47 = vunpack.c.l.bf16 %v8736_v44  ;;  %v1521_v51 = vpop.f32.mrb[112].mxu0  ;;  %v2329_v30 = vld [vmem:[#allocation8 + $0x274] sm:$0xff]  ;;  %v10500_v11 = vld [vmem:[#allocation44_spill] sm:$0xff] }
 0x2a9   : > { %3979 = vmatmul.mubr.bf16.gmra.mrb[216].mxu0 %v10492_v5  ;;  %v2829_v56 = vmul.f32 %v2541_v33, %v2093_v2  ;;  %v8873_v15 = vmul.f32 %v2687_v4, %v2239_v22  ;;  %v10498_v7 = vunpack.c.h.bf16 %v8736_v44  ;;  %v2550_v3 = vunpack.c.l.bf16 %v2324_v57  ;;  %v1523_v2 = vpop.f32.mrb[113].mxu0  ;;  %v5211_v44 = vpop.f32.mrb[113].mxu1  ;;  %v10502_v33 = vld [vmem:[#allocation45_spill] sm:$0xff] }
 0x2aa   : > { %3986 = vmatprep.mubr.bf16.mxu0 %v10493_v28  ;;  %v2820_v8 = vmul.f32 %v10494_v47, %v2084_v35  ;;  %v2830_v14 = vmul.f32 %v2542_v32, %v2094_v29  ;;  %v8883_v35 = vadd.f32 %v8619_v18, %v10254_v52  ;;  %v1522_v4 = vadd.f32 %v1521_v51, %v10345_v38  ;;  %v1525_v28 = vpop.f32.mrb[114].mxu0  ;;  %v5213_v47 = vpop.f32.mrb[114].mxu1  ;;  %v10503_v12 = vld [vmem:[#allocation65_spill] sm:$0xff] }
 0x2ab   : > { %10495 = vst [vmem:[#allocation77_spill] sm:$0xff] %v8873_v15  ;;  %v2821_v21 = vmul.f32 %v10498_v7, %v2085_v10  ;;  %v1524_v32 = vadd.f32 %v1523_v2, %v10346_v26  ;;  %v2551_v22 = vunpack.c.h.bf16 %v2324_v57  ;;  %v8889_v29 = vadd.f32 %v5211_v44, %v5210_v60  ;;  %v1527_v42 = vpop.f32.mrb[115].mxu0  ;;  %v5214_v5 = vpop.f32.mrb[115].mxu1  ;;  %v10505_v57 = vld [vmem:[#allocation57_spill] sm:$0xff] }
 0x2ac   : > { %v3045_v10 = vpack.c.bf16 %v2829_v56, %v2820_v8  ;;  %v2102_v63 = vmax.f32 %v1522_v4, 0.0  ;;  %v1526_v18 = vadd.f32 %v1525_v28, %v10345_v38  ;;  %v2559_v59 = vunpack.c.l.bf16 %v2329_v30 }
 0x2ad   : > { %10501 = vst [vmem:[#allocation75_spill] sm:$0xff] %v8889_v29  ;;  %v3046_v7 = vpack.c.bf16 %v2830_v14, %v2821_v21  ;;  %v2103_v15 = vmax.f32 %v1524_v32, 0.0  ;;  %v1528_v8 = vadd.f32 %v1527_v42, %v10346_v26  ;;  %v2560_v56 = vunpack.c.h.bf16 %v2329_v30  ;;  %v10509_v32 = vld [vmem:[#allocation54_spill] sm:$0xff]  ;;  %v10510_v42 = vld [vmem:[#allocation73_spill] sm:$0xff] }
 0x2ae   : > { %v8895_v2 = vadd.f32 %v5214_v5, %v5213_v47  ;;  %v10506_v60 = vunpack.c.h.bf16 %v10505_v57  ;;  %v2111_v14 = vmax.f32 %v1526_v18, 0.0  ;;  %v10507_v4 = vpack.c.bf16 %v10431_v48, %v10430_v43  ;;  %v10512_v47 = vld [vmem:[#allocation71_spill] sm:$0xff]  ;;  %v2334_v43 = vld [vmem:[#allocation8 + $0x298] sm:$0xff] }
 0x2af   : > { %4115 = vmatprep.mubr.bf16.mxu1 %v3046_v7  ;;  %v10511_v30 = vunpack.c.h.bf16 %v10510_v42  ;;  %v10513_v7 = vunpack.c.h.bf16 %v10512_v47  ;;  %v10514_v18 = vpack.c.bf16 %v10433_v6, %v10432_v40  ;;  %v2839_v47 = vmul.f32 %v2551_v22, %v2103_v15  ;;  %v2339_v21 = vld [vmem:[#allocation8 + $0x2bc] sm:$0xff]  ;;  %v10520_v22 = vld [vmem:[#allocation61_spill] sm:$0xff] }
 0x2b0   : > { %10504 = vst [vmem:[#allocation86_spill] sm:$0xff] %v8895_v2  ;;  %v8899_v44 = vmul.f32 %v10506_v60, %v2132_v23  ;;  %4116 = vmatmul.mubr.bf16.gmra.mrb[204].mxu1 %v3045_v10  ;;  %v2112_v60 = vmax.f32 %v1528_v8, 0.0  ;;  %v2838_v10 = vmul.f32 %v2550_v3, %v2102_v63  ;;  %v1531_v23 = vpop.f32.mrb[116].mxu0  ;;  %v5216_v8 = vpop.f32.mrb[116].mxu1  ;;  %v2568_v6 = vunpack.c.l.bf16 %v2334_v43 }
 0x2b1   : > { %3987 = vmatmul.mubr.bf16.gmra.mrb[220].mxu0 %v10507_v4  ;;  %v8909_v5 = vmul.f32 %v10511_v30, %v2141_v17  ;;  %v8913_v57 = vmul.f32 %v10513_v7, %v2150_v53  ;;  %v2847_v4 = vmul.f32 %v2559_v59, %v2111_v14  ;;  %v2159_v30 = vmax.f32 %v8866_v49, 0.0  ;;  %v5217_v2 = vpop.f32.mrb[117].mxu1  ;;  %v10518_v59 = vld [vmem:[#allocation50_spill] sm:$0xff] }
 0x2b2   : > { %3994 = vmatprep.mubr.bf16.mxu0 %v10514_v18  ;;  %v2168_v53 = vmax.f32 %v8883_v35, 0.0  ;;  %v2848_v7 = vmul.f32 %v2560_v56, %v2112_v60  ;;  %v1532_v40 = vadd.f32 %v1531_v23, %v10345_v38  ;;  %v1533_v18 = vpop.f32.mrb[117].mxu0  ;;  %v8928_v17 = vadd.f32 %v5217_v2, %v5216_v8  ;;  %v5219_v35 = vpop.f32.mrb[118].mxu1  ;;  %v10521_v56 = vld [vmem:[#allocation64_spill] sm:$0xff] }
 0x2b3   : > { %v3054_v48 = vpack.c.bf16 %v2847_v4, %v2838_v10  ;;  %v1534_v14 = vadd.f32 %v1533_v18, %v10346_v26  ;;  %v1535_v49 = vpop.f32.mrb[118].mxu0  ;;  %v2569_v51 = vunpack.c.h.bf16 %v2334_v43  ;;  %v2577_v42 = vunpack.c.l.bf16 %v2339_v21  ;;  %v5220_v10 = vpop.f32.mrb[119].mxu1 }
 0x2b4   : > { %10519 = vst [vmem:[#allocation84_spill] sm:$0xff] %v8928_v17  ;;  %v3055_v15 = vpack.c.bf16 %v2848_v7, %v2839_v47  ;;  %v2120_v29 = vmax.f32 %v1532_v40, 0.0  ;;  %v1536_v23 = vadd.f32 %v1535_v49, %v10345_v38  ;;  %v1537_v28 = vpop.f32.mrb[119].mxu0  ;;  %v2578_v3 = vunpack.c.h.bf16 %v2339_v21  ;;  %v2344_v21 = vld [vmem:[#allocation8 + $0x2e0] sm:$0xff]  ;;  %v10529_v49 = vld [vmem:[#allocation62_spill] sm:$0xff] }
 0x2b5   : > { %v2121_v4 = vmax.f32 %v1534_v14, 0.0  ;;  %v1538_v63 = vadd.f32 %v1537_v28, %v10346_v26  ;;  %v8934_v18 = vadd.f32 %v5220_v10, %v5219_v35  ;;  %v10523_v2 = vunpack.c.h.bf16 %v8511_v19  ;;  %v10526_v14 = vld [vmem:[#allocation22_spill] sm:$0xff] }
 0x2b6   : > { %4123 = vmatprep.mubr.bf16.mxu1 %v3055_v15  ;;  %v10524_v7 = vunpack.c.h.bf16 %v8550_v39  ;;  %v8946_v43 = vadd.f32 %v8668_v58, %v10254_v52  ;;  %v2129_v40 = vmax.f32 %v1536_v23, 0.0  ;;  %v10525_v28 = vpack.c.bf16 %v10451_v0, %v10450_v27  ;;  %v10530_v15 = vld [vmem:[#allocation78_spill] sm:$0xff]  ;;  %v10531_v23 = vld [vmem:[#allocation41_spill] sm:$0xff] }
 0x2b7   : > { %10522 = vst [vmem:[#allocation92_spill] sm:$0xff] %v8934_v18  ;;  %v8938_v47 = vmul.f32 %v10523_v2, %v2159_v30  ;;  %v8953_v19 = vadd.f32 %v10526_v14, %v10254_v52  ;;  %v8957_v39 = vadd.f32 %v8727_v45, %v10254_v52  ;;  %v2130_v30 = vmax.f32 %v1538_v63, 0.0  ;;  %v2349_v14 = vld [vmem:[#allocation8 + $0x304] sm:$0xff] }
 0x2b8   : > { %v8942_v8 = vmul.f32 %v10524_v7, %v2168_v53  ;;  %4124 = vmatmul.mubr.bf16.gmra.mrb[208].mxu1 %v3054_v48  ;;  %v10527_v58 = vpack.c.bf16 %v10469_v61, %v10468_v50  ;;  %v10528_v53 = vld [vmem:[#allocation60_spill] sm:$0xff]  ;;  %v8966_v0 = vadd.f32 %v8734_v13, %v10254_v52  ;;  %v2856_v27 = vmul.f32 %v2568_v6, %v2120_v29  ;;  %v1541_v7 = vpop.f32.mrb[120].mxu0  ;;  %v10533_v61 = vld [vmem:[#allocation81_spill] sm:$0xff] }
 0x2b9   : > { %3995 = vmatmul.mubr.bf16.gmra.mrb[224].mxu0 %v10525_v28  ;;  %v2865_v48 = vmul.f32 %v2577_v42, %v2129_v40  ;;  %v2857_v2 = vmul.f32 %v2569_v51, %v2121_v4  ;;  %v2866_v45 = vmul.f32 %v2578_v3, %v2130_v30  ;;  %v2586_v63 = vunpack.c.l.bf16 %v2344_v21  ;;  %v5222_v28 = vpop.f32.mrb[120].mxu1  ;;  %v1543_v60 = vpop.f32.mrb[121].mxu0  ;;  %v10535_v42 = vld [vmem:[#allocation52_spill] sm:$0xff] }
 0x2ba   : > { %4002 = vmatprep.mubr.bf16.mxu0 %v10527_v58  ;;  %v1542_v35 = vadd.f32 %v1541_v7, %v10345_v38  ;;  %v2587_v18 = vunpack.c.h.bf16 %v2344_v21  ;;  %v5223_v13 = vpop.f32.mrb[121].mxu1  ;;  %v8977_v51 = vadd.f32 %v8783_v20, %v10254_v52  ;;  %v1544_v3 = vadd.f32 %v1543_v60, %v10346_v26  ;;  %v1545_v40 = vpop.f32.mrb[122].mxu0 }
 0x2bb   : > { %v3063_v17 = vpack.c.bf16 %v2865_v48, %v2856_v27  ;;  %v8980_v4 = vadd.f32 %v5223_v13, %v5222_v28  ;;  %v5225_v30 = vpop.f32.mrb[122].mxu1  ;;  %v3064_v58 = vpack.c.bf16 %v2866_v45, %v2857_v2  ;;  %v1546_v7 = vadd.f32 %v1545_v40, %v10345_v38  ;;  %v1547_v50 = vpop.f32.mrb[123].mxu0  ;;  %v10539_v13 = vld [vmem:[#allocation79_spill] sm:$0xff] }
 0x2bc   : > { %v2138_v10 = vmax.f32 %v1542_v35, 0.0  ;;  %v2595_v21 = vunpack.c.l.bf16 %v2349_v14  ;;  %v2596_v27 = vunpack.c.h.bf16 %v2349_v14  ;;  %v5226_v48 = vpop.f32.mrb[123].mxu1  ;;  %v8985_v6 = vadd.f32 %v8793_v9, %v10254_v52  ;;  %v2354_v14 = vld [vmem:[#allocation8 + $0x328] sm:$0xff]  ;;  %v10540_v9 = vld [vmem:[#allocation25_spill] sm:$0xff] }
 0x2bd   : > { %10536 = vst [vmem:[#allocation39_spill] sm:$0xff] %v8980_v4  ;;  %v2139_v20 = vmax.f32 %v1544_v3, 0.0  ;;  %v1548_v29 = vadd.f32 %v1547_v50, %v10346_v26  ;;  %v8988_v60 = vadd.f32 %v5226_v48, %v5225_v30  ;;  %4131 = vmatprep.mubr.bf16.mxu1 %v3064_v58  ;;  %v2177_v28 = vmax.f32 %v8946_v43, 0.0 }
 0x2be   : > { %v2186_v35 = vmax.f32 %v8953_v19, 0.0  ;;  %v2147_v2 = vmax.f32 %v1546_v7, 0.0  ;;  %v10538_v45 = vpack.c.bf16 %v10484_v55, %v10483_v36  ;;  %v2195_v3 = vmax.f32 %v8957_v39, 0.0 }
 0x2bf   : > { %10537 = vst [vmem:[#allocation83_spill] sm:$0xff] %v8988_v60  ;;  %v2204_v50 = vmax.f32 %v8966_v0, 0.0  ;;  %v2213_v58 = vmax.f32 %v8977_v51, 0.0  ;;  %v2148_v30 = vmax.f32 %v1548_v29, 0.0  ;;  %v10541_v43 = vpack.c.bf16 %v10486_v1, %v10485_v16  ;;  %v1551_v0 = vpop.f32.mrb[124].mxu0  ;;  %v5228_v51 = vpop.f32.mrb[124].mxu1 }
 0x2c0   : > { %4132 = vmatmul.mubr.bf16.gmra.mrb[212].mxu1 %v3063_v17  ;;  %v1787_v36 = vadd.f32 %v8838_v31, %v10254_v52  ;;  %v2874_v55 = vmul.f32 %v2586_v63, %v2138_v10  ;;  %v2883_v17 = vmul.f32 %v2595_v21, %v2147_v2  ;;  %v2222_v48 = vmax.f32 %v8985_v6, 0.0  ;;  %v2359_v29 = vld [vmem:[#allocation8 + $0x34c] sm:$0xff]  ;;  %v5229_v31 = vpop.f32.mrb[125].mxu1  ;;  %v10543_v63 = vld [vmem:[#allocation31_spill] sm:$0xff] }
 0x2c1   : > { %4003 = vmatmul.mubr.bf16.gmra.mrb[228].mxu0 %v10538_v45  ;;  %v2875_v39 = vmul.f32 %v2587_v18, %v2139_v20  ;;  %v2884_v45 = vmul.f32 %v2596_v27, %v2148_v30  ;;  %v2604_v40 = vunpack.c.l.bf16 %v2354_v14  ;;  %v1791_v1 = vadd.f32 %v8848_v54, %v10254_v52  ;;  %v5231_v20 = vpop.f32.mrb[126].mxu1 }
 0x2c2   : > { %4010 = vmatprep.mubr.bf16.mxu0 %v10541_v43  ;;  %v1552_v16 = vadd.f32 %v1551_v0, %v10345_v38  ;;  %v1553_v43 = vpop.f32.mrb[125].mxu0  ;;  %v3072_v10 = vpack.c.bf16 %v2883_v17, %v2874_v55  ;;  %v2605_v6 = vunpack.c.h.bf16 %v2354_v14  ;;  %v9014_v18 = vadd.f32 %v5229_v31, %v5228_v51  ;;  %v5232_v4 = vpop.f32.mrb[127].mxu1  ;;  %v10544_v14 = vld [vmem:[#allocation87_spill] sm:$0xff] }
 0x2c3   : > { %v1554_v2 = vadd.f32 %v1553_v43, %v10346_v26  ;;  %v1555_v27 = vpop.f32.mrb[126].mxu0  ;;  %v3073_v30 = vpack.c.bf16 %v2884_v45, %v2875_v39  ;;  %v2231_v7 = vmax.f32 %v1787_v36, 0.0  ;;  %v2613_v54 = vunpack.c.l.bf16 %v2359_v29  ;;  %v10547_v45 = vld [vmem:[#allocation91_spill] sm:$0xff] }
 0x2c4   : > { %v2156_v60 = vmax.f32 %v1552_v16, 0.0  ;;  %v1556_v52 = vadd.f32 %v1555_v27, %v10345_v38  ;;  %v1557_v0 = vpop.f32.mrb[127].mxu0  ;;  %v2614_v17 = vunpack.c.h.bf16 %v2359_v29  ;;  %v9018_v21 = vadd.f32 %v5232_v4, %v5231_v20  ;;  %v10548_v16 = vld [vmem:[#allocation80_spill] sm:$0xff]  ;;  %v10551_v4 = vld [vmem:[#allocation26_spill] sm:$0xff] }
 0x2c5   : > { %v2157_v19 = vmax.f32 %v1554_v2, 0.0  ;;  %v1558_v55 = vadd.f32 %v1557_v0, %v10346_v26  ;;  %4139 = vmatprep.mubr.bf16.mxu1 %v3073_v30  ;;  %v10545_v51 = vunpack.c.h.bf16 %v10544_v14  ;;  %v2240_v31 = vmax.f32 %v1791_v1, 0.0  ;;  %v10549_v27 = vld [vmem:[#allocation88_spill] sm:$0xff] }
 0x2c6   : > { %v2165_v39 = vmax.f32 %v1556_v52, 0.0  ;;  %v10546_v36 = vpack.c.bf16 %v10497_v62, %v10496_v34  ;;  %v10550_v0 = vunpack.c.h.bf16 %v10549_v27  ;;  %v10552_v20 = vunpack.c.h.bf16 %v10551_v4  ;;  %v10555_v34 = vld [vmem:[#allocation59_spill] sm:$0xff] }
 0x2c7   : > { %v9022_v43 = vmul.f32 %v10545_v51, %v2177_v28  ;;  %v10553_v28 = vld [vmem:[#allocation28_spill] sm:$0xff]  ;;  %v2166_v52 = vmax.f32 %v1558_v55, 0.0  ;;  %v10556_v62 = vpack.c.bf16 %v10500_v11, %v10555_v34  ;;  %v10557_v51 = vld [vmem:[#allocation27_spill] sm:$0xff]  ;;  %v10560_v4 = vunpack.c.h.bf16 %v8804_v24  ;;  %v5234_v11 = vpop.f32.mrb[128].mxu1 }
 0x2c8   : > { %4140 = vmatmul.mubr.bf16.gmra.mrb[216].mxu1 %v3072_v10  ;;  %v9031_v29 = vmul.f32 %v10550_v0, %v2186_v35  ;;  %v9035_v30 = vmul.f32 %v10552_v20, %v2195_v3  ;;  %v10554_v14 = vunpack.c.h.bf16 %v10553_v28  ;;  %v2364_v10 = vld [vmem:[#allocation8 + $0x370] sm:$0xff]  ;;  %v10559_v35 = vunpack.c.h.bf16 %v8766_v41  ;;  %v1561_v28 = vpop.f32.mrb[128].mxu0  ;;  %v10561_v34 = vld [vmem:[#allocation36_spill] sm:$0xff] }
 0x2c9   : > { %4011 = vmatmul.mubr.bf16.gmra.mrb[232].mxu0 %v10546_v36  ;;  %v10558_v36 = vunpack.c.h.bf16 %v10557_v51  ;;  %v2892_v3 = vmul.f32 %v2604_v40, %v2156_v60  ;;  %v2901_v0 = vmul.f32 %v2613_v54, %v2165_v39  ;;  %v2893_v55 = vmul.f32 %v2605_v6, %v2157_v19  ;;  %v1563_v40 = vpop.f32.mrb[129].mxu0 }
 0x2ca   : > { %v9039_v1 = vmul.f32 %v10554_v14, %v2204_v50  ;;  %4018 = vmatprep.mubr.bf16.mxu0 %v10556_v62  ;;  %v9050_v27 = vmul.f32 %v10559_v35, %v2222_v48  ;;  %v9054_v50 = vmul.f32 %v10560_v4, %v2231_v7  ;;  %v2902_v20 = vmul.f32 %v2614_v17, %v2166_v52  ;;  %v2369_v14 = vld [vmem:[#allocation8 + $0x394] sm:$0xff]  ;;  %v5235_v48 = vpop.f32.mrb[129].mxu1  ;;  %v1565_v6 = vpop.f32.mrb[130].mxu0 }
 0x2cb   : > { %v9046_v2 = vmul.f32 %v10558_v36, %v2213_v58  ;;  %v10562_v58 = vunpack.c.h.bf16 %v8819_v25  ;;  %v1562_v41 = vadd.f32 %v1561_v28, %v10345_v38  ;;  %v2622_v60 = vunpack.c.l.bf16 %v2364_v10  ;;  %v5237_v54 = vpop.f32.mrb[130].mxu1  ;;  %v1567_v35 = vpop.f32.mrb[131].mxu0 }
 0x2cc   : > { %v3081_v24 = vpack.c.bf16 %v2901_v0, %v2892_v3  ;;  %v1564_v7 = vadd.f32 %v1563_v40, %v10346_v26  ;;  %v9064_v19 = vadd.f32 %v5235_v48, %v5234_v11  ;;  %v3082_v17 = vpack.c.bf16 %v2902_v20, %v2893_v55  ;;  %v5238_v4 = vpop.f32.mrb[131].mxu1 }
 0x2cd   : > { %v9060_v51 = vmul.f32 %v10562_v58, %v2240_v31  ;;  %v2174_v52 = vmax.f32 %v1562_v41, 0.0  ;;  %v2623_v25 = vunpack.c.h.bf16 %v2364_v10  ;;  %v1566_v31 = vadd.f32 %v1565_v6, %v10345_v38  ;;  %v10564_v41 = vld [vmem:[#allocation46_spill] sm:$0xff] }
 0x2ce   : > { %v2631_v36 = vunpack.c.l.bf16 %v2369_v14  ;;  %v2175_v28 = vmax.f32 %v1564_v7, 0.0  ;;  %v1568_v3 = vadd.f32 %v1567_v35, %v10346_v26  ;;  %v2632_v0 = vunpack.c.h.bf16 %v2369_v14  ;;  %4147 = vmatprep.mubr.bf16.mxu1 %v3082_v17  ;;  %v2374_v14 = vld [vmem:[#allocation8 + $0x3b8] sm:$0xff]  ;;  %v5240_v17 = vpop.f32.mrb[132].mxu1 }
 0x2cf   : > { %v9070_v58 = vadd.f32 %v5238_v4, %v5237_v54  ;;  %v2183_v11 = vmax.f32 %v1566_v31, 0.0  ;;  %v10563_v55 = vpack.c.bf16 %v10503_v12, %v10502_v33  ;;  %v2910_v20 = vmul.f32 %v2622_v60, %v2174_v52  ;;  %v5241_v35 = vpop.f32.mrb[133].mxu1 }
 0x2d0   : > { %4148 = vmatmul.mubr.bf16.gmra.mrb[220].mxu1 %v3081_v24  ;;  %v2184_v10 = vmax.f32 %v1568_v3, 0.0  ;;  %v10565_v40 = vpack.c.bf16 %v10509_v32, %v10564_v41  ;;  %v2911_v33 = vmul.f32 %v2623_v25, %v2175_v28  ;;  %v1571_v24 = vpop.f32.mrb[132].mxu0  ;;  %v2379_v32 = vld [vmem:[#allocation8 + $0x3dc] sm:$0xff]  ;;  %v2640_v3 = vunpack.c.l.bf16 %v2374_v14 }
 0x2d1   : > { %4019 = vmatmul.mubr.bf16.gmra.mrb[236].mxu0 %v10563_v55  ;;  %v2919_v7 = vmul.f32 %v2631_v36, %v2183_v11  ;;  %v1572_v31 = vadd.f32 %v1571_v24, %v10345_v38  ;;  %v1573_v36 = vpop.f32.mrb[133].mxu0  ;;  %v9090_v55 = vadd.f32 %v5241_v35, %v5240_v17  ;;  %v2649_v12 = vunpack.c.l.bf16 %v2379_v32  ;;  %v10567_v17 = vld [vmem:[#allocation32_spill] sm:$0xff] }
 0x2d2   : > { %4220 = vmatprep.mubr.bf16.mxu0 %v10565_v40  ;;  %v2920_v60 = vmul.f32 %v2632_v0, %v2184_v10  ;;  %v1574_v11 = vadd.f32 %v1573_v36, %v10346_v26  ;;  %v1575_v41 = vpop.f32.mrb[134].mxu0  ;;  %v5243_v40 = vpop.f32.mrb[134].mxu1  ;;  %v2641_v0 = vunpack.c.h.bf16 %v2374_v14  ;;  %v2650_v48 = vunpack.c.h.bf16 %v2379_v32  ;;  %v10568_v36 = vld [vmem:[#allocation33_spill] sm:$0xff]  ;;  %v10570_v14 = vld [vmem:[#allocation56_spill] sm:$0xff] }
 0x2d3   : > { %v3090_v4 = vpack.c.bf16 %v2919_v7, %v2910_v20  ;;  %v2192_v28 = vmax.f32 %v1572_v31, 0.0  ;;  %v1576_v10 = vadd.f32 %v1575_v41, %v10345_v38  ;;  %v1577_v54 = vpop.f32.mrb[135].mxu0  ;;  %v5244_v52 = vpop.f32.mrb[135].mxu1  ;;  %v10569_v35 = vpack.c.bf16 %v10567_v17, %v10568_v36 }
 0x2d4   : > { %v3091_v25 = vpack.c.bf16 %v2920_v60, %v2911_v33  ;;  %v2193_v6 = vmax.f32 %v1574_v11, 0.0  ;;  %v1578_v24 = vadd.f32 %v1577_v54, %v10346_v26  ;;  %v9094_v20 = vadd.f32 %v5244_v52, %v5243_v40  ;;  %v10571_v60 = vld [vmem:[#allocation48_spill] sm:$0xff]  ;;  %v2384_v11 = vld [vmem:[#allocation8 + $0x400] sm:$0xff]  ;;  %v1581_v32 = vpop.f32.mrb[136].mxu0  ;;  %v5246_v52 = vpop.f32.mrb[136].mxu1 }
 0x2d5   : > { %v2201_v7 = vmax.f32 %v1576_v10, 0.0  ;;  %v10572_v31 = vpack.c.bf16 %v10570_v14, %v10571_v60  ;;  %v2928_v41 = vmul.f32 %v2640_v3, %v2192_v28  ;;  %v2389_v40 = vld [vmem:[#allocation8 + $0x424] sm:$0xff]  ;;  %v5247_v10 = vpop.f32.mrb[137].mxu1  ;;  %v2658_v17 = vunpack.c.l.bf16 %v2384_v11 }
 0x2d6   : > { %10566 = vst [vmem:[#allocation24_spill] sm:$0xff] %v9094_v20  ;;  %4155 = vmatprep.mubr.bf16.mxu1 %v3091_v25  ;;  %v2202_v33 = vmax.f32 %v1578_v24, 0.0  ;;  %v2929_v62 = vmul.f32 %v2641_v0, %v2193_v6  ;;  %v1582_v25 = vadd.f32 %v1581_v32, %v10345_v38  ;;  %v9104_v36 = vadd.f32 %v5247_v10, %v5246_v52  ;;  %v5249_v14 = vpop.f32.mrb[138].mxu1  ;;  %v10573_v32 = vld [vmem:[#allocation72_spill] sm:$0xff] }
 0x2d7   : > { %v2937_v39 = vmul.f32 %v2649_v12, %v2201_v7  ;;  %v2659_v28 = vunpack.c.h.bf16 %v2384_v11  ;;  %v2667_v6 = vunpack.c.l.bf16 %v2389_v40  ;;  %v5250_v7 = vpop.f32.mrb[139].mxu1  ;;  %v10574_v52 = vpack.c.bf16 %v10518_v59, %v10573_v32 }
 0x2d8   : > { %4156 = vmatmul.mubr.bf16.gmra.mrb[224].mxu1 %v3090_v4  ;;  %v2938_v54 = vmul.f32 %v2650_v48, %v2202_v33  ;;  %v1583_v4 = vpop.f32.mrb[137].mxu0  ;;  %v2210_v12 = vmax.f32 %v1582_v25, 0.0  ;;  %v10575_v11 = vpack.c.bf16 %v10521_v56, %v10520_v22 }
 0x2d9   : > { %4221 = vmatmul.mubr.bf16.vlgmr.msra.gmra.mrb[240].mxu0 %v10569_v35  ;;  %v3099_v20 = vpack.c.bf16 %v2937_v39, %v2928_v41  ;;  %v1584_v24 = vadd.f32 %v1583_v4, %v10346_v26  ;;  %v1585_v35 = vpop.f32.mrb[138].mxu0  ;;  %v9108_v39 = vadd.f32 %v5250_v7, %v5249_v14  ;;  %v2394_v4 = vld [vmem:[#allocation8 + $0x448] sm:$0xff] }
 0x2da   : > { %4228 = vmatprep.mubr.bf16.mxu0 %v10572_v31  ;;  %v3100_v3 = vpack.c.bf16 %v2938_v54, %v2929_v62  ;;  %v1586_v48 = vadd.f32 %v1585_v35, %v10345_v38  ;;  %v1587_v0 = vpop.f32.mrb[139].mxu0  ;;  %v2668_v31 = vunpack.c.h.bf16 %v2389_v40  ;;  %v2946_v54 = vmul.f32 %v2658_v17, %v2210_v12  ;;  %v5252_v35 = vpop.f32.mrb[140].mxu1  ;;  %v2399_v14 = vld [vmem:[#allocation8 + $0x46c] sm:$0xff] }
 0x2db   : > { %v2211_v33 = vmax.f32 %v1584_v24, 0.0  ;;  %v1588_v60 = vadd.f32 %v1587_v0, %v10346_v26  ;;  %v1591_v40 = vpop.f32.mrb[140].mxu0  ;;  %v2676_v59 = vunpack.c.l.bf16 %v2394_v4 }
 0x2dc   : > { %4163 = vmatprep.mubr.bf16.mxu1 %v3100_v3  ;;  %v2219_v41 = vmax.f32 %v1586_v48, 0.0  ;;  %v1592_v3 = vadd.f32 %v1591_v40, %v10345_v38  ;;  %v5253_v48 = vpop.f32.mrb[141].mxu1 }
 0x2dd   : > { %v2220_v62 = vmax.f32 %v1588_v60, 0.0  ;;  %v2947_v10 = vmul.f32 %v2659_v28, %v2211_v33  ;;  %v9118_v60 = vadd.f32 %v5253_v48, %v5252_v35  ;;  %v5255_v56 = vpop.f32.mrb[142].mxu1  ;;  %v2685_v33 = vunpack.c.l.bf16 %v2399_v14  ;;  %v2261_v48 = vld [vmem:[#allocation8 + $0x44] ss:$72 sps:$4 sm:$0xff]  }
 0x2de   : > { %v2955_v25 = vmul.f32 %v2667_v6, %v2219_v41  ;;  %v2228_v12 = vmax.f32 %v1592_v3, 0.0  ;;  %v2677_v6 = vunpack.c.h.bf16 %v2394_v4  ;;  %v5256_v41 = vpop.f32.mrb[143].mxu1  ;;  %v9130_v4 = vld [vmem:[#allocation7 + $0x8] ss:$0 sm:$0xff] }
 0x2df   : > { %v2956_v24 = vmul.f32 %v2668_v31, %v2220_v62  ;;  %v2686_v62 = vunpack.c.h.bf16 %v2399_v14 }
 0x2e0   : > { %4164 = vmatmul.mubr.bf16.gmra.mrb[228].mxu1 %v3099_v20  ;;  %v1593_v20 = vpop.f32.mrb[141].mxu0  ;;  %v3108_v0 = vpack.c.bf16 %v2955_v25, %v2946_v54  ;;  %v10576_v25 = vpack.c.bf16 %v10529_v49, %v10528_v53 }
 0x2e1   : > { %4229 = vmatmul.mubr.bf16.gmra.mrb[244].mxu0 %v10574_v52  ;;  %v1594_v7 = vadd.f32 %v1593_v20, %v10346_v26  ;;  %v1595_v22 = vpop.f32.mrb[142].mxu0  ;;  %v3109_v17 = vpack.c.bf16 %v2956_v24, %v2947_v10  ;;  %v2964_v24 = vmul.f32 %v2676_v59, %v2228_v12  ;;  %v5258_v20 = vpop.f32.mrb[144].mxu1 }
 0x2e2   : > { %4236 = vmatprep.mubr.bf16.mxu0 %v10575_v11  ;;  %v1596_v28 = vadd.f32 %v1595_v22, %v10345_v38  ;;  %v1597_v31 = vpop.f32.mrb[143].mxu0  ;;  %v9122_v11 = vadd.f32 %v5256_v41, %v5255_v56  ;;  %v10577_v38 = vpack.c.bf16 %v10531_v23, %v10530_v15  ;;  %v5259_v53 = vpop.f32.mrb[145].mxu1 }
 0x2e3   : > { %v2229_v32 = vmax.f32 %v1594_v7, 0.0  ;;  %v1598_v52 = vadd.f32 %v1597_v31, %v10346_v26  ;;  %4171 = vmatprep.mubr.bf16.mxu1 %v3109_v17  ;;  %v2256_v26 = vld [vmem:[#allocation8 + $0x20] ss:$72 sps:$4 sm:$0xff]   ;;  %v5708_v3 = vpop.f32.mrb[144].mxu0  ;;  %v9134_v15 = vadd.f32 %v5259_v53, %v5258_v20  ;;  %v5261_v17 = vpop.f32.mrb[146].mxu1 }
 0x2e4   : > { %v2237_v54 = vmax.f32 %v1596_v28, 0.0  ;;  %v1827_v7 = vpop.f32.mrb[145].mxu0  ;;  %v2428_v22 = vunpack.c.h.bf16 %v2256_v26  ;;  %v2410_v28 = vunpack.c.l.bf16 %v2256_v26  ;;  %v5262_v41 = vpop.f32.mrb[147].mxu1  ;;  %v2281_v53 = vld [vmem:[#allocation8 + $0xd4] ss:$72 sps:$4 sm:$0xff]  }
 0x2e5   : > { %v2238_v10 = vmax.f32 %v1598_v52, 0.0  ;;  %v2965_v35 = vmul.f32 %v2677_v6, %v2229_v32  ;;  %v1828_v56 = vadd.f32 %v9130_v4, %v1827_v7  ;;  %v5709_v23 = vpop.f32.mrb[146].mxu0  ;;  %v5264_v7 = vpop.f32.mrb[148].mxu1 }
 0x2e6   : > { %v2973_v40 = vmul.f32 %v2685_v33, %v2237_v54  ;;  %v1839_v6 = vadd.f32 %v5709_v23, %v9130_v4  ;;  %v2437_v33 = vunpack.c.h.bf16 %v2261_v48  ;;  %v1830_v31 = vpop.f32.mrb[147].mxu0  ;;  %v9138_v54 = vadd.f32 %v5262_v41, %v5261_v17  ;;  %v5265_v17 = vpop.f32.mrb[149].mxu1 }
 0x2e7   : > { %v2974_v14 = vmul.f32 %v2686_v62, %v2238_v10  ;;  %v1962_v32 = vmax.f32 %v1828_v56, 0.0  ;;  %v1831_v52 = vadd.f32 %v9130_v4, %v1830_v31  ;;  %v2419_v62 = vunpack.c.l.bf16 %v2261_v48  ;;  %v10578_v10 = vld [vmem:[#allocation85_spill] sm:$0xff]  ;;  %v5712_v48 = vpop.f32.mrb[148].mxu0  ;;  %v5267_v31 = vpop.f32.mrb[150].mxu1 }
 0x2e8   : > { %4172 = vmatmul.mubr.bf16.gmra.mrb[232].mxu1 %v3108_v0  ;;  %v1836_v0 = vadd.f32 %v5708_v3, %v9130_v4  ;;  %v3117_v49 = vpack.c.bf16 %v2973_v40, %v2964_v24  ;;  %v10580_v40 = vld [vmem:[#allocation82_spill] sm:$0xff]  ;;  %v1843_v23 = vpop.f32.mrb[149].mxu0  ;;  %v2473_v41 = vunpack.c.h.bf16 %v2281_v53 }
 0x2e9   : > { %4237 = vmatmul.mubr.bf16.gmra.mrb[248].mxu0 %v10576_v25  ;;  %v3118_v59 = vpack.c.bf16 %v2974_v14, %v2965_v35  ;;  %v1989_v25 = vmax.f32 %v1839_v6, 0.0  ;;  %v1971_v24 = vmax.f32 %v1831_v52, 0.0  ;;  %v10581_v26 = vpack.c.bf16 %v10535_v42, %v10580_v40  ;;  %v2276_v3 = vld [vmem:[#allocation8 + $0xb0] ss:$72 sps:$4 sm:$0xff]   ;;  %v5713_v42 = vpop.f32.mrb[150].mxu0  ;;  %v5268_v52 = vpop.f32.mrb[151].mxu1 }
 0x2ea   : > { %4244 = vmatprep.mubr.bf16.mxu0 %v10577_v38  ;;  %v1980_v12 = vmax.f32 %v1836_v0, 0.0  ;;  %v10579_v38 = vpack.c.bf16 %v10533_v61, %v10578_v10  ;;  %v2698_v20 = vmul.f32 %v2410_v28, %v1962_v32  ;;  %v2464_v61 = vunpack.c.h.bf16 %v2276_v3  ;;  %v1846_v32 = vpop.f32.mrb[151].mxu0 }
 0x2eb   : > { %4179 = vmatprep.mubr.bf16.mxu1 %v3118_v59  ;;  %v2725_v14 = vmul.f32 %v2437_v33, %v1989_v25  ;;  %v2707_v0 = vmul.f32 %v2419_v62, %v1971_v24  ;;  %v1844_v59 = vadd.f32 %v9130_v4, %v1843_v23  ;;  %v9148_v6 = vadd.f32 %v5265_v17, %v5264_v7  ;;  %v6243_v62 = vld [vmem:[#allocation11 + $0x8] sm:$0xff]  }
 0x2ec   : > { %v2716_v35 = vmul.f32 %v2428_v22, %v1980_v12  ;;  %v2446_v33 = vunpack.c.l.bf16 %v2276_v3  ;;  %v1855_v28 = vadd.f32 %v5713_v42, %v9130_v4  ;;  %v1847_v10 = vadd.f32 %v9130_v4, %v1846_v32  ;;  %v5270_v42 = vpop.f32.mrb[152].mxu1 }
 0x2ed   : > { %v2986_v22 = vpack.c.bf16 %v2707_v0, %v2698_v20  ;;  %v1998_v25 = vmax.f32 %v1844_v59, 0.0  ;;  %v9152_v24 = vadd.f32 %v5268_v52, %v5267_v31  ;;  %v10585_v20 = vpack.c.bf16 %v10540_v9, %v10539_v13  ;;  %v6272_v0 = vld [vmem:[#allocation11] sm:$0xff]   ;;  %v5716_v59 = vpop.f32.mrb[152].mxu0 }
 0x2ee   : > { %v2995_v56 = vpack.c.bf16 %v2725_v14, %v2716_v35  ;;  %v2025_v40 = vmax.f32 %v1855_v28, 0.0  ;;  %v10583_v35 = vld [vmem:[#allocation47_spill] sm:$0xff]  ;;  %v2007_v3 = vmax.f32 %v1847_v10, 0.0  ;;  %v5271_v28 = vpop.f32.mrb[153].mxu1 }
 0x2ef   : > { %v2734_v23 = vmul.f32 %v2446_v33, %v1998_v25  ;;  %v2301_v31 = vld [vmem:[#allocation8 + $0x164] ss:$72 sps:$4 sm:$0xff]   ;;  %v9162_v9 = vadd.f32 %v5271_v28, %v5270_v42 }
 0x2f0   : > { %4180 = vmatmul.mubr.bf16.gmra.mrb[236].mxu1 %v3117_v49  ;;  %v1852_v49 = vadd.f32 %v5712_v48, %v9130_v4  ;;  %v2761_v7 = vmul.f32 %v2473_v41, %v2025_v40 }
 0x2f1   : > { %4245 = vmatmul.mubr.bf16.gmra.mrb[252].mxu0 %v10579_v38  ;;  %v2455_v38 = vunpack.c.l.bf16 %v2281_v53  ;;  %5754 = vmatprep.mubr.bf16.mxu1 %v2986_v22  ;;  %v6244_v53 = vld [vmem:[#allocation11 + $0x10] sm:$0xff]   ;;  %v1868_v22 = vadd.f32 %v5716_v59, %v9130_v4 }
 0x2f2   : > { %4252 = vmatprep.mubr.bf16.mxu0 %v10581_v26  ;;  %v2016_v12 = vmax.f32 %v1852_v49, 0.0  ;;  %v10582_v26 = vld [vmem:[#allocation49_spill] sm:$0xff]  ;;  %v2296_v49 = vld [vmem:[#allocation8 + $0x140] ss:$72 sps:$4 sm:$0xff]  }
 0x2f3   : > { %v10584_v14 = vpack.c.bf16 %v10582_v26, %v10583_v35  ;;  %v2743_v17 = vmul.f32 %v2455_v38, %v2007_v3  ;;  %v2500_v52 = vunpack.c.h.bf16 %v2296_v49  ;;  %v2052_v10 = vmax.f32 %v1868_v22, 0.0  ;;  %v6245_v35 = vld [vmem:[#allocation11 + $0x18] sm:$0xff]  }
 0x2f4   : > { %v2752_v48 = vmul.f32 %v2464_v61, %v2016_v12  ;;  %v5273_v12 = vpop.f32.mrb[154].mxu1  ;;  %v2482_v33 = vunpack.c.l.bf16 %v2296_v49  ;;  %v2509_v38 = vunpack.c.h.bf16 %v2301_v31 }
 0x2f5   : > { %v3004_v41 = vpack.c.bf16 %v2743_v17, %v2734_v23  ;;  %v5274_v26 = vpop.f32.mrb[155].mxu1  ;;  %v10587_v23 = vld [vmem:[#allocation51_spill] sm:$0xff]  ;;  %v2788_v42 = vmul.f32 %v2500_v52, %v2052_v10 }
 0x2f6   : > { %v3013_v32 = vpack.c.bf16 %v2761_v7, %v2752_v48  ;;  %v10586_v7 = vld [vmem:[#allocation55_spill] sm:$0xff] }
 0x2f7   : > { %v10589_v17 = vld [vmem:[#allocation19_spill] sm:$0xff] }
 0x2f8   : > { %5755 = vmatmul.mubr.bf16.vlgmr.msra.gmra.mrb[240].mxu1 %v2995_v56  ;;  %v1859_v56 = vpop.f32.mrb[153].mxu0  ;;  %v10590_v59 = vpack.c.bf16 %v8685_v46, %v10589_v17 }
 0x2f9   : > { %4253 = vmatmul.mubr.bf16.gmra.mrb[0].mxu0 %v10584_v14  ;;  %5787 = vmatpush3.bf16.msra.mxu1 %v6272_v0  ;;  %v1860_v13 = vadd.f32 %v9130_v4, %v1859_v56  ;;  %v5717_v61 = vpop.f32.mrb[154].mxu0  ;;  %v9166_v0 = vadd.f32 %v5274_v26, %v5273_v12  ;;  %v2316_v56 = vld [vmem:[#allocation8 + $0x1d0] ss:$72 sps:$4 sm:$0xff]   ;;  %v5276_v12 = vpop.f32.mrb[156].mxu1 }
 0x2fa   : > { %4260 = vmatprep.mubr.bf16.mxu0 %v10585_v20  ;;  %5788 = vmatprep.subr.bf16.mxu1 %v6243_v62  ;;  %v1871_v25 = vadd.f32 %v5717_v61, %v9130_v4  ;;  %v1862_v40 = vpop.f32.mrb[155].mxu0  ;;  %v2491_v20 = vunpack.c.l.bf16 %v2301_v31  ;;  %v6246_v31 = vld [vmem:[#allocation11 + $0x20] sm:$0xff]  }
 0x2fb   : > { %v2034_v14 = vmax.f32 %v1860_v13, 0.0  ;;  %v1863_v3 = vadd.f32 %v9130_v4, %v1862_v40  ;;  %5758 = vmatprep.mubr.bf16.mxu1 %v3004_v41  ;;  %v5720_v61 = vpop.f32.mrb[156].mxu0  ;;  %v2321_v41 = vld [vmem:[#allocation8 + $0x1f4] ss:$72 sps:$4 sm:$0xff]  }
 0x2fc   : > { %v2061_v48 = vmax.f32 %v1871_v25, 0.0  ;;  %v1884_v25 = vadd.f32 %v5720_v61, %v9130_v4  ;;  %v1875_v40 = vpop.f32.mrb[157].mxu0  ;;  %v10591_v61 = vld [vmem:[#allocation63_spill] sm:$0xff] }
 0x2fd   : > { %5789 = vmatpush3.bf16.msra.mxu1 %v6243_v62  ;;  %v10588_v62 = vpack.c.bf16 %v10586_v7, %v10587_v23  ;;  %v2043_v49 = vmax.f32 %v1863_v3, 0.0  ;;  %v2770_v28 = vmul.f32 %v2482_v33, %v2034_v14  ;;  %v2536_v3 = vunpack.c.h.bf16 %v2316_v56 }
 0x2fe   : > { %5790 = vmatprep.subr.bf16.mxu1 %v6244_v53  ;;  %v2797_v22 = vmul.f32 %v2509_v38, %v2061_v48  ;;  %v1876_v46 = vadd.f32 %v9130_v4, %v1875_v40  ;;  %v2088_v38 = vmax.f32 %v1884_v25, 0.0  ;;  %v2518_v33 = vunpack.c.l.bf16 %v2316_v56  ;;  %v2336_v40 = vld [vmem:[#allocation8 + $0x260] ss:$72 sps:$4 sm:$0xff]  }
 0x2ff   : > { %v2779_v13 = vmul.f32 %v2491_v20, %v2043_v49  ;;  %v2545_v20 = vunpack.c.h.bf16 %v2321_v41 }
 0x300   : > { %5759 = vmatmul.mubr.bf16.gmra.mrb[244].mxu1 %v3013_v32  ;;  %v5277_v32 = vpop.f32.mrb[157].mxu1  ;;  %v3031_v26 = vpack.c.bf16 %v2797_v22, %v2788_v42  ;;  %v2070_v49 = vmax.f32 %v1876_v46, 0.0 }
 0x301   : > { %4261 = vmatmul.mubr.bf16.gmra.mrb[4].mxu0 %v10588_v62  ;;  %5791 = vmatpush3.bf16.msra.mxu1 %v6244_v53  ;;  %v9176_v7 = vadd.f32 %v5277_v32, %v5276_v12  ;;  %v5721_v53 = vpop.f32.mrb[158].mxu0  ;;  %v5279_v52 = vpop.f32.mrb[158].mxu1  ;;  %v3022_v10 = vpack.c.bf16 %v2779_v13, %v2770_v28  ;;  %v6247_v62 = vld [vmem:[#allocation11 + $0x28] sm:$0xff]   ;;  %v10592_v28 = vld [vmem:[#allocation58_spill] sm:$0xff]  ;;  %v10594_v13 = vpack.c.bf16 %v10543_v63, %v8701_v37 }
 0x302   : > { %4268 = vmatprep.mubr.bf16.mxu0 %v10590_v59  ;;  %5792 = vmatprep.subr.bf16.mxu1 %v6245_v35  ;;  %v1887_v14 = vadd.f32 %v5721_v53, %v9130_v4  ;;  %v1878_v48 = vpop.f32.mrb[159].mxu0  ;;  %v5280_v23 = vpop.f32.mrb[159].mxu1  ;;  %v2527_v59 = vunpack.c.l.bf16 %v2321_v41  ;;  %v2824_v12 = vmul.f32 %v2536_v3, %v2088_v38  ;;  %v6248_v41 = vld [vmem:[#allocation11 + $0x30] sm:$0xff]   ;;  %v2806_v32 = vmul.f32 %v2518_v33, %v2070_v49 }
 0x303   : > { %v1879_v17 = vadd.f32 %v9130_v4, %v1878_v48  ;;  %v9180_v42 = vadd.f32 %v5280_v23, %v5279_v52  ;;  %5762 = vmatprep.mubr.bf16.mxu1 %v3022_v10  ;;  %v5724_v53 = vpop.f32.mrb[160].mxu0  ;;  %v5282_v52 = vpop.f32.mrb[160].mxu1  ;;  %v2341_v10 = vld [vmem:[#allocation8 + $0x284] ss:$72 sps:$4 sm:$0xff]   ;;  %v2554_v33 = vunpack.c.l.bf16 %v2336_v40 }
 0x304   : > { %v2097_v22 = vmax.f32 %v1887_v14, 0.0  ;;  %v1900_v14 = vadd.f32 %v5724_v53, %v9130_v4  ;;  %v1891_v48 = vpop.f32.mrb[161].mxu0  ;;  %v10595_v53 = vld [vmem:[#allocation70_spill] sm:$0xff] }
 0x305   : > { %5793 = vmatpush3.bf16.msra.mxu1 %v6245_v35  ;;  %v10593_v35 = vpack.c.bf16 %v10591_v61, %v10592_v28  ;;  %v2079_v56 = vmax.f32 %v1879_v17, 0.0  ;;  %v2572_v17 = vunpack.c.h.bf16 %v2336_v40  ;;  %v1892_v37 = vadd.f32 %v9130_v4, %v1891_v48  ;;  %v6249_v28 = vld [vmem:[#allocation11 + $0x38] sm:$0xff]  }
 0x306   : > { %5794 = vmatprep.subr.bf16.mxu1 %v6246_v31  ;;  %v2833_v25 = vmul.f32 %v2545_v20, %v2097_v22  ;;  %v2124_v20 = vmax.f32 %v1900_v14, 0.0  ;;  %v2356_v48 = vld [vmem:[#allocation8 + $0x2f0] ss:$72 sps:$4 sm:$0xff]  }
 0x307   : > { %v2815_v46 = vmul.f32 %v2527_v59, %v2079_v56  ;;  %v2581_v59 = vunpack.c.h.bf16 %v2341_v10 }
 0x308   : > { %5763 = vmatmul.mubr.bf16.gmra.mrb[248].mxu1 %v3031_v26  ;;  %v5283_v26 = vpop.f32.mrb[161].mxu1  ;;  %v3049_v23 = vpack.c.bf16 %v2833_v25, %v2824_v12 }
 0x309   : > { %4269 = vmatmul.mubr.bf16.gmra.mrb[8].mxu0 %v10593_v35  ;;  %5795 = vmatpush3.bf16.msra.mxu1 %v6246_v31  ;;  %v9190_v63 = vadd.f32 %v5283_v26, %v5282_v52  ;;  %v5725_v31 = vpop.f32.mrb[162].mxu0  ;;  %v5285_v3 = vpop.f32.mrb[162].mxu1  ;;  %v3040_v38 = vpack.c.bf16 %v2815_v46, %v2806_v32  ;;  %v2106_v35 = vmax.f32 %v1892_v37, 0.0  ;;  %v10596_v32 = vld [vmem:[#allocation94_spill] sm:$0xff]  ;;  %v10598_v46 = vpack.c.bf16 %v10548_v16, %v10547_v45 }
 0x30a   : > { %4276 = vmatprep.mubr.bf16.mxu0 %v10594_v13  ;;  %5796 = vmatprep.subr.bf16.mxu1 %v6247_v62  ;;  %v1903_v49 = vadd.f32 %v5725_v31, %v9130_v4  ;;  %v1894_v22 = vpop.f32.mrb[163].mxu0  ;;  %v5286_v61 = vpop.f32.mrb[163].mxu1  ;;  %v2563_v13 = vunpack.c.l.bf16 %v2341_v10  ;;  %v2860_v52 = vmul.f32 %v2572_v17, %v2124_v20 }
 0x30b   : > { %v1895_v56 = vadd.f32 %v9130_v4, %v1894_v22  ;;  %v9194_v12 = vadd.f32 %v5286_v61, %v5285_v3  ;;  %5766 = vmatprep.mubr.bf16.mxu1 %v3040_v38  ;;  %v2842_v10 = vmul.f32 %v2554_v33, %v2106_v35  ;;  %v5728_v37 = vpop.f32.mrb[164].mxu0  ;;  %v5288_v31 = vpop.f32.mrb[164].mxu1  ;;  %v2361_v3 = vld [vmem:[#allocation8 + $0x314] ss:$72 sps:$4 sm:$0xff]   ;;  %v2608_v61 = vunpack.c.h.bf16 %v2356_v48 }
 0x30c   : > { %v2133_v25 = vmax.f32 %v1903_v49, 0.0  ;;  %v1916_v49 = vadd.f32 %v5728_v37, %v9130_v4  ;;  %v1907_v22 = vpop.f32.mrb[165].mxu0  ;;  %v2590_v33 = vunpack.c.l.bf16 %v2356_v48  ;;  %v2617_v35 = vunpack.c.h.bf16 %v2361_v3 }
 0x30d   : > { %5797 = vmatpush3.bf16.msra.mxu1 %v6247_v62  ;;  %v10597_v62 = vpack.c.bf16 %v10595_v53, %v10596_v32  ;;  %v2115_v40 = vmax.f32 %v1895_v56, 0.0  ;;  %v1908_v56 = vadd.f32 %v9130_v4, %v1907_v22  ;;  %v5729_v16 = vpop.f32.mrb[166].mxu0  ;;  %v10602_v48 = vpack.c.bf16 %v8899_v44, %v10561_v34 }
 0x30e   : > { %5798 = vmatprep.subr.bf16.mxu1 %v6248_v41  ;;  %v2869_v14 = vmul.f32 %v2581_v59, %v2133_v25  ;;  %v2160_v20 = vmax.f32 %v1916_v49, 0.0  ;;  %v1919_v59 = vadd.f32 %v5729_v16, %v9130_v4 }
 0x30f   : > { %v2851_v26 = vmul.f32 %v2563_v13, %v2115_v40  ;;  %v1910_v13 = vpop.f32.mrb[167].mxu0  ;;  %v2142_v53 = vmax.f32 %v1908_v56, 0.0  ;;  %v2381_v56 = vld [vmem:[#allocation8 + $0x3a4] ss:$72 sps:$4 sm:$0xff]  }
 0x310   : > { %5767 = vmatmul.mubr.bf16.gmra.mrb[252].mxu1 %v3049_v23  ;;  %v3067_v38 = vpack.c.bf16 %v2869_v14, %v2860_v52  ;;  %v5289_v23 = vpop.f32.mrb[165].mxu1  ;;  %v1911_v32 = vadd.f32 %v9130_v4, %v1910_v13  ;;  %v10599_v52 = vld [vmem:[#allocation40_spill] sm:$0xff]  ;;  %v10600_v14 = vld [vmem:[#allocation66_spill] sm:$0xff] }
 0x311   : > { %4277 = vmatmul.mubr.bf16.gmra.mrb[12].mxu0 %v10597_v62  ;;  %5799 = vmatpush3.bf16.msra.mxu1 %v6248_v41  ;;  %v9204_v45 = vadd.f32 %v5289_v23, %v5288_v31  ;;  %v5291_v41 = vpop.f32.mrb[166].mxu1  ;;  %v3058_v17 = vpack.c.bf16 %v2851_v26, %v2842_v10  ;;  %v2599_v62 = vunpack.c.l.bf16 %v2361_v3  ;;  %v10601_v37 = vpack.c.bf16 %v10599_v52, %v10600_v14  ;;  %v2376_v31 = vld [vmem:[#allocation8 + $0x380] ss:$72 sps:$4 sm:$0xff]   ;;  %v5732_v3 = vpop.f32.mrb[168].mxu0 }
 0x312   : > { %4284 = vmatprep.mubr.bf16.mxu0 %v10598_v46  ;;  %5800 = vmatprep.subr.bf16.mxu1 %v6249_v28  ;;  %v5292_v25 = vpop.f32.mrb[167].mxu1  ;;  %v2169_v46 = vmax.f32 %v1919_v59, 0.0  ;;  %v2896_v10 = vmul.f32 %v2608_v61, %v2160_v20  ;;  %v2878_v49 = vmul.f32 %v2590_v33, %v2142_v53  ;;  %v2644_v13 = vunpack.c.h.bf16 %v2376_v31 }
 0x313   : > { %v9208_v40 = vadd.f32 %v5292_v25, %v5291_v41  ;;  %5770 = vmatprep.mubr.bf16.mxu1 %v3058_v17  ;;  %v5294_v23 = vpop.f32.mrb[168].mxu1  ;;  %v1932_v41 = vadd.f32 %v5732_v3, %v9130_v4  ;;  %v1923_v17 = vpop.f32.mrb[169].mxu0  ;;  %v2653_v53 = vunpack.c.h.bf16 %v2381_v56  ;;  %v2635_v14 = vunpack.c.l.bf16 %v2381_v56 }
 0x314   : > { %v2905_v26 = vmul.f32 %v2617_v35, %v2169_v46  ;;  %v5295_v59 = vpop.f32.mrb[169].mxu1  ;;  %v5733_v44 = vpop.f32.mrb[170].mxu0  ;;  %v2626_v35 = vunpack.c.l.bf16 %v2376_v31  ;;  %v10606_v31 = vpack.c.bf16 %v8913_v57, %v8909_v5 }
 0x315   : > { %5801 = vmatpush3.bf16.msra.mxu1 %v6249_v28  ;;  %v2151_v28 = vmax.f32 %v1911_v32, 0.0  ;;  %v9218_v25 = vadd.f32 %v5295_v59, %v5294_v23  ;;  %v5297_v34 = vpop.f32.mrb[170].mxu1  ;;  %v2196_v20 = vmax.f32 %v1932_v41, 0.0  ;;  %v1935_v33 = vadd.f32 %v5733_v44, %v9130_v4  ;;  %v1926_v32 = vpop.f32.mrb[171].mxu0  ;;  %v2396_v23 = vld [vmem:[#allocation8 + $0x410] ss:$72 sps:$4 sm:$0xff]  }
 0x316   : > { %v3085_v16 = vpack.c.bf16 %v2905_v26, %v2896_v10  ;;  %v1927_v52 = vadd.f32 %v9130_v4, %v1926_v32  ;;  %v10604_v10 = vld [vmem:[#allocation74_spill] sm:$0xff]  ;;  %v5736_v56 = vpop.f32.mrb[172].mxu0  ;;  %v2680_v32 = vunpack.c.h.bf16 %v2396_v23 }
 0x317   : > { %v2887_v22 = vmul.f32 %v2599_v62, %v2151_v28  ;;  %v5298_v62 = vpop.f32.mrb[171].mxu1  ;;  %v2205_v28 = vmax.f32 %v1935_v33, 0.0 }
 0x318   : > { %5771 = vmatmul.mubr.bf16.gmra.mrb[0].mxu1 %v3067_v38  ;;  %v1924_v38 = vadd.f32 %v9130_v4, %v1923_v17  ;;  %v5300_v59 = vpop.f32.mrb[172].mxu1 }
 0x319   : > { %4285 = vmatmul.mubr.bf16.gmra.mrb[16].mxu0 %v10601_v37  ;;  %v3076_v61 = vpack.c.bf16 %v2887_v22, %v2878_v49  ;;  %v9222_v37 = vadd.f32 %v5298_v62, %v5297_v34  ;;  %v2187_v49 = vmax.f32 %v1927_v52, 0.0  ;;  %v2932_v22 = vmul.f32 %v2644_v13, %v2196_v20  ;;  %v5301_v33 = vpop.f32.mrb[173].mxu1 }
 0x31a   : > { %4292 = vmatprep.mubr.bf16.mxu0 %v10602_v48  ;;  %v2178_v46 = vmax.f32 %v1924_v38, 0.0  ;;  %v10603_v48 = vld [vmem:[#allocation53_spill] sm:$0xff]  ;;  %v2941_v3 = vmul.f32 %v2653_v53, %v2205_v28  ;;  %v1948_v34 = vadd.f32 %v5736_v56, %v9130_v4  ;;  %v9232_v62 = vadd.f32 %v5301_v33, %v5300_v59  ;;  %v5303_v57 = vpop.f32.mrb[174].mxu1 }
 0x31b   : > { %5774 = vmatprep.mubr.bf16.mxu1 %v3076_v61  ;;  %v10605_v26 = vpack.c.bf16 %v10603_v48, %v10604_v10  ;;  %v2923_v17 = vmul.f32 %v2635_v14, %v2187_v49  ;;  %v2401_v38 = vld [vmem:[#allocation8 + $0x434] ss:$72 sps:$4 sm:$0xff]   ;;  %v1939_v61 = vpop.f32.mrb[173].mxu0  ;;  %v2662_v53 = vunpack.c.l.bf16 %v2396_v23  ;;  %v5304_v14 = vpop.f32.mrb[175].mxu1  ;;  %v10610_v23 = vpack.c.bf16 %v8942_v8, %v8938_v47 }
 0x31c   : > { %v2914_v41 = vmul.f32 %v2626_v35, %v2178_v46  ;;  %v3103_v44 = vpack.c.bf16 %v2941_v3, %v2932_v22  ;;  %v5737_v5 = vpop.f32.mrb[174].mxu0  ;;  %v2232_v20 = vmax.f32 %v1948_v34, 0.0  ;;  %v2689_v46 = vunpack.c.h.bf16 %v2401_v38  ;;  %v10608_v22 = vld [vmem:[#allocation69_spill] sm:$0xff] }
 0x31d   : > { %v1951_v35 = vadd.f32 %v5737_v5, %v9130_v4  ;;  %v1942_v52 = vpop.f32.mrb[175].mxu0  ;;  %v2671_v10 = vunpack.c.l.bf16 %v2401_v38 }
 0x31e   : > { %v3094_v13 = vpack.c.bf16 %v2923_v17, %v2914_v41  ;;  %v1943_v48 = vadd.f32 %v9130_v4, %v1942_v52  ;;  %v9247_v17 = vld [vmem:[%s9772_s5] ss:$0 sm:$0xff]  ;;  %v5322_v34 = vpop.f32.mrb[176].mxu0 }
 0x31f   : > { %v2241_v49 = vmax.f32 %v1951_v35, 0.0  ;;  %v5323_v33 = vpop.f32.mrb[177].mxu0 }
 0x320   : > { %5775 = vmatmul.mubr.bf16.gmra.mrb[4].mxu1 %v3085_v16  ;;  %v1940_v16 = vadd.f32 %v9130_v4, %v1939_v61  ;;  %v2223_v41 = vmax.f32 %v1943_v48, 0.0  ;;  %v2968_v4 = vmul.f32 %v2680_v32, %v2232_v20  ;;  %v5324_v5 = vadd.f32 %v5323_v33, %v5322_v34  ;;  %v10613_v20 = vld [vmem:[#allocation21_spill] sm:$0xff]  ;;  %v10619_v34 = vld [vmem:[#allocation35_spill] sm:$0xff] }
 0x321   : > { %4293 = vmatmul.mubr.bf16.gmra.mrb[20].mxu0 %v10605_v26  ;;  %v9236_v26 = vadd.f32 %v5304_v14, %v5303_v57  ;;  %5778 = vmatprep.mubr.bf16.mxu1 %v3094_v13  ;;  %v2977_v56 = vmul.f32 %v2689_v46, %v2241_v49  ;;  %v5325_v57 = vpop.f32.mrb[178].mxu0  ;;  %v10612_v13 = vld [vmem:[#allocation86_spill] sm:$0xff] }
 0x322   : > { %4300 = vmatprep.mubr.bf16.mxu0 %v10606_v31  ;;  %v2214_v28 = vmax.f32 %v1940_v16, 0.0  ;;  %v10607_v31 = vld [vmem:[#allocation89_spill] sm:$0xff]  ;;  %v2959_v38 = vmul.f32 %v2671_v10, %v2223_v41  ;;  %v5326_v8 = vpop.f32.mrb[179].mxu0  ;;  %v3743_v35 = vadd.f32 %v10612_v13, %v9247_v17 }
 0x323   : > { %v10609_v3 = vpack.c.bf16 %v10607_v31, %v10608_v22  ;;  %v3121_v61 = vpack.c.bf16 %v2977_v56, %v2968_v4  ;;  %v5327_v32 = vadd.f32 %v5326_v8, %v5325_v57  ;;  %v6273_v48 = vld [vmem:[%s6843_s17] sm:$0xff]   ;;  %v10617_v31 = vld [vmem:[#allocation84_spill] sm:$0xff] }
 0x324   : > { %v2950_v59 = vmul.f32 %v2662_v53, %v2214_v28  ;;  %v10614_v53 = vld [vmem:[#allocation20_spill] sm:$0xff]  ;;  %v10616_v28 = vpack.c.bf16 %v9031_v29, %v9022_v43  ;;  %v3748_v22 = vadd.f32 %v10617_v31, %v9247_v17  ;;  %v10620_v43 = vld [vmem:[#allocation29_spill] sm:$0xff]  ;;  %v10628_v31 = vpack.c.bf16 %v9050_v27, %v9046_v2 }
 0x325   : > { %v10615_v46 = vpack.c.bf16 %v10613_v20, %v10614_v53  ;;  %v9258_v14 = vadd.f32 %v5327_v32, %v3743_v35  ;;  %v10618_v4 = vld [vmem:[#allocation92_spill] sm:$0xff]  ;;  %v10621_v29 = vpack.c.bf16 %v10619_v34, %v10620_v43  ;;  %v10624_v20 = vld [vmem:[#allocation83_spill] sm:$0xff]  ;;  %v3767_v34 = vadd.f32 %v9018_v21, %v9247_v17 }
 0x326   : > { %v3112_v47 = vpack.c.bf16 %v2959_v38, %v2950_v59  ;;  %v3751_v56 = vadd.f32 %v10618_v4, %v9247_v17  ;;  %v3759_v53 = vadd.f32 %v10624_v20, %v9247_v17  ;;  %v10630_v2 = vld [vmem:[#allocation76_spill] sm:$0xff] }
 0x327   : > { %v5328_v10 = vpop.f32.mrb[180].mxu0 }
 0x328   : > { %5779 = vmatmul.mubr.bf16.gmra.mrb[8].mxu1 %v3103_v44  ;;  %v10611_v44 = vld [vmem:[#allocation75_spill] sm:$0xff]  ;;  %v5329_v49 = vpop.f32.mrb[181].mxu0 }
 0x329   : > { %4301 = vmatmul.mubr.bf16.gmra.mrb[24].mxu0 %v10609_v3  ;;  %v3740_v16 = vadd.f32 %v10611_v44, %v9247_v17  ;;  %5782 = vmatprep.mubr.bf16.mxu1 %v3112_v47  ;;  %v5330_v3 = vadd.f32 %v5329_v49, %v5328_v10  ;;  %v5331_v41 = vpop.f32.mrb[182].mxu0  ;;  %v10622_v44 = vpack.c.bf16 %v9039_v1, %v9035_v30  ;;  %v10623_v47 = vld [vmem:[#allocation39_spill] sm:$0xff]  ;;  %v6276_v10 = vld [vmem:[%s6843_s17 + $0x18] sm:$0xff]  }
 0x32a   : > { %4308 = vmatprep.mubr.bf16.mxu0 %v10610_v23  ;;  %v5332_v23 = vpop.f32.mrb[183].mxu0  ;;  %v3756_v8 = vadd.f32 %v10623_v47, %v9247_v17  ;;  %v10626_v30 = vld [vmem:[#allocation23_spill] sm:$0xff] }
 0x32b   : > { %v9253_v52 = vadd.f32 %v5324_v5, %v3740_v16  ;;  %v9268_v59 = vadd.f32 %v5330_v3, %v3748_v22  ;;  %v5333_v38 = vadd.f32 %v5332_v23, %v5331_v41  ;;  %v6275_v16 = vld [vmem:[%s6843_s17 + $0x10] sm:$0xff]   ;;  %v6277_v22 = vld [vmem:[%s6843_s17 + $0x20] sm:$0xff]   ;;  %v3764_v23 = vadd.f32 %v9014_v18, %v9247_v17 }
 0x32c   : > { %v10632_v18 = vpack.c.bf16 %v9060_v51, %v9054_v50 }
 0x32d   : > { %v9274_v33 = vadd.f32 %v5333_v38, %v3751_v56 }
 0x330   : > { %5783 = vmatmul.mubr.bf16.gmra.mrb[12].mxu1 %v3121_v61  ;;  %v6274_v61 = vld [vmem:[%s6843_s17 + $0x8] sm:$0xff]  }
 0x331   : > { %4309 = vmatmul.mubr.bf16.gmra.mrb[28].mxu0 %v10615_v46  ;;  %5802 = vmatprep.mubr.bf16.mxu1 %v6273_v48  ;;  %v10625_v48 = vld [vmem:[#allocation34_spill] sm:$0xff] }
 0x332   : > { %4316 = vmatprep.mubr.bf16.mxu0 %v10616_v28  ;;  %v10627_v1 = vpack.c.bf16 %v10625_v48, %v10626_v30 }
 0x333   : > { %v5334_v5 = vpop.f32.mrb[184].mxu0 }
 0x334   : > { %v5335_v57 = vpop.f32.mrb[185].mxu0 }
 0x335   : > { %v5336_v13 = vadd.f32 %v5335_v57, %v5334_v5  ;;  %v5337_v35 = vpop.f32.mrb[186].mxu0  ;;  %v6279_v5 = vld [vmem:[%s6843_s17 + $0x30] sm:$0xff]  }
 0x336   : > { %v5338_v32 = vpop.f32.mrb[187].mxu0 }
 0x337   : > { %v9284_v46 = vadd.f32 %v5336_v13, %v3756_v8  ;;  %v5339_v28 = vadd.f32 %v5338_v32, %v5337_v35  ;;  %v3772_v13 = vadd.f32 %v9064_v19, %v9247_v17 }
 0x338   : > { %5803 = vmatmul.mubr.bf16.vlgmr.msra.gmra.mrb[240].mxu1 %v6274_v61  ;;  %v10629_v61 = vld [vmem:[#allocation30_spill] sm:$0xff] }
 0x339   : > { %4317 = vmatmul.mubr.bf16.gmra.mrb[32].mxu0 %v10621_v29  ;;  %5806 = vmatprep.mubr.bf16.mxu1 %v6275_v16  ;;  %v9290_v49 = vadd.f32 %v5339_v28, %v3759_v53  ;;  %v10631_v27 = vpack.c.bf16 %v10629_v61, %v10630_v2  ;;  %v3775_v28 = vadd.f32 %v9070_v58, %v9247_v17  ;;  %v6281_v58 = vld [vmem:[%s6843_s17 + $0x40] sm:$0xff]  }
 0x33a   : > { %4324 = vmatprep.mubr.bf16.mxu0 %v10622_v44  ;;  %v6278_v44 = vld [vmem:[%s6843_s17 + $0x28] sm:$0xff]  }
 0x33c   : > { %v5340_v3 = vpop.f32.mrb[188].mxu0 }
 0x33d   : > { %v5341_v41 = vpop.f32.mrb[189].mxu0 }
 0x33e   : > { %v5342_v4 = vadd.f32 %v5341_v41, %v5340_v3  ;;  %v5343_v56 = vpop.f32.mrb[190].mxu0  ;;  %v6280_v3 = vld [vmem:[%s6843_s17 + $0x38] sm:$0xff]  }
 0x33f   : > { %v5344_v38 = vpop.f32.mrb[191].mxu0 }
 0x340   : > { %5807 = vmatmul.mubr.bf16.gmra.mrb[244].mxu1 %v6276_v10  ;;  %v9300_v43 = vadd.f32 %v5342_v4, %v3764_v23  ;;  %v5345_v29 = vadd.f32 %v5344_v38, %v5343_v56 }
 0x341   : > { %4325 = vmatmul.mubr.bf16.gmra.mrb[36].mxu0 %v10627_v1  ;;  %5810 = vmatprep.mubr.bf16.mxu1 %v6277_v22  ;;  %v10634_v22 = vld [vmem:[#allocation93_spill] sm:$0xff] }
 0x342   : > { %4332 = vmatprep.mubr.bf16.mxu0 %v10628_v31  ;;  %v9306_v16 = vadd.f32 %v5345_v29, %v3767_v34  ;;  %v10633_v31 = vld [vmem:[#allocation77_spill] sm:$0xff]  ;;  %v3780_v34 = vadd.f32 %v9090_v55, %v9247_v17 }
 0x343   : > { %v10635_v19 = vpack.c.bf16 %v10633_v31, %v10634_v22  ;;  %v3791_v22 = vadd.f32 %v9108_v39, %v9247_v17 }
 0x344   : > { %v5434_v47 = vpop.f32.mrb[176].mxu1 }
 0x345   : > { %v5346_v57 = vpop.f32.mrb[192].mxu0  ;;  %v5435_v8 = vpop.f32.mrb[177].mxu1 }
 0x346   : > { %v5347_v21 = vpop.f32.mrb[193].mxu0  ;;  %v5436_v32 = vadd.f32 %v5435_v8, %v5434_v47  ;;  %v5437_v53 = vpop.f32.mrb[178].mxu1 }
 0x347   : > { %v5348_v35 = vadd.f32 %v5347_v21, %v5346_v57  ;;  %v5349_v20 = vpop.f32.mrb[194].mxu0  ;;  %v5438_v51 = vpop.f32.mrb[179].mxu1 }
 0x348   : > { %5811 = vmatmul.mubr.bf16.gmra.mrb[248].mxu1 %v6278_v44  ;;  %v5350_v50 = vpop.f32.mrb[195].mxu0  ;;  %v9319_v30 = vadd.f32 %v5436_v32, %v9253_v52  ;;  %v5439_v10 = vadd.f32 %v5438_v51, %v5437_v53  ;;  %v10636_v44 = vld [vmem:[#allocation24_spill] sm:$0xff] }
 0x349   : > { %4333 = vmatmul.mubr.bf16.gmra.mrb[40].mxu0 %v10631_v27  ;;  %5814 = vmatprep.mubr.bf16.mxu1 %v6279_v5  ;;  %v9316_v48 = vadd.f32 %v5348_v35, %v3772_v13  ;;  %v5351_v1 = vadd.f32 %v5350_v50, %v5349_v20  ;;  %v6282_v13 = vld [vmem:[%s6843_s17 + $0x48] sm:$0xff]   ;;  %v6283_v32 = vld [vmem:[%s6843_s17 + $0x50] sm:$0xff]  }
 0x34a   : > { %4340 = vmatprep.mubr.bf16.mxu0 %v10632_v18  ;;  %v9328_v23 = vadd.f32 %v5439_v10, %v9258_v14  ;;  %v3783_v18 = vadd.f32 %v10636_v44, %v9247_v17 }
 0x34b   : > { %v9325_v41 = vadd.f32 %v5351_v1, %v3775_v28 }
 0x34e   : > { %v5352_v4 = vpop.f32.mrb[196].mxu0  ;;  %v5440_v56 = vpop.f32.mrb[180].mxu1 }
 0x34f   : > { %v5353_v52 = vpop.f32.mrb[197].mxu0  ;;  %v5441_v38 = vpop.f32.mrb[181].mxu1 }
 0x350   : > { %5815 = vmatmul.mubr.bf16.gmra.mrb[252].mxu1 %v6280_v3  ;;  %v5354_v29 = vadd.f32 %v5353_v52, %v5352_v4  ;;  %v5442_v61 = vadd.f32 %v5441_v38, %v5440_v56  ;;  %v5355_v2 = vpop.f32.mrb[198].mxu0  ;;  %v5443_v27 = vpop.f32.mrb[182].mxu1  ;;  %v6284_v52 = vld [vmem:[%s6843_s17 + $0x58] sm:$0xff]  }
 0x351   : > { %4341 = vmatmul.mubr.bf16.gmra.mrb[44].mxu0 %v10635_v19  ;;  %5818 = vmatprep.mubr.bf16.mxu1 %v6281_v58  ;;  %v5356_v14 = vpop.f32.mrb[199].mxu0  ;;  %v5444_v5 = vpop.f32.mrb[183].mxu1 }
 0x352   : > { %v9335_v57 = vadd.f32 %v5354_v29, %v3780_v34  ;;  %v9338_v47 = vadd.f32 %v5442_v61, %v9268_v59  ;;  %v5357_v21 = vadd.f32 %v5356_v14, %v5355_v2  ;;  %v5445_v8 = vadd.f32 %v5444_v5, %v5443_v27  ;;  %v6285_v34 = vld [vmem:[%s6843_s17 + $0x60] sm:$0xff]  }
 0x353   : > { %v3788_v59 = vadd.f32 %v9104_v36, %v9247_v17  ;;  %v3799_v5 = vadd.f32 %v9122_v11, %v9247_v17 }
 0x354   : > { %v9341_v55 = vadd.f32 %v5357_v21, %v3783_v18  ;;  %v9344_v35 = vadd.f32 %v5445_v8, %v9274_v33 }
 0x357   : > { %v5358_v20 = vpop.f32.mrb[200].mxu0  ;;  %v5446_v53 = vpop.f32.mrb[184].mxu1 }
 0x358   : > { %5819 = vmatmul.mubr.bf16.gmra.mrb[0].mxu1 %v6282_v13  ;;  %v5359_v28 = vpop.f32.mrb[201].mxu0  ;;  %v5447_v50 = vpop.f32.mrb[185].mxu1 }
 0x359   : > { %5822 = vmatprep.mubr.bf16.mxu1 %v6283_v32  ;;  %v5360_v51 = vadd.f32 %v5359_v28, %v5358_v20  ;;  %v5448_v1 = vadd.f32 %v5447_v50, %v5446_v53  ;;  %v5361_v10 = vpop.f32.mrb[202].mxu0  ;;  %v5449_v31 = vpop.f32.mrb[186].mxu1  ;;  %v6286_v53 = vld [vmem:[%s6843_s17 + $0x68] sm:$0xff]   ;;  %v6287_v50 = vld [vmem:[%s6843_s17 + $0x70] sm:$0xff]  }
 0x35a   : > { %v5362_v33 = vpop.f32.mrb[203].mxu0  ;;  %v5450_v19 = vpop.f32.mrb[187].mxu1 }
 0x35b   : > { %v9351_v3 = vadd.f32 %v5360_v51, %v3788_v59  ;;  %v9354_v58 = vadd.f32 %v5448_v1, %v9284_v46  ;;  %v5363_v4 = vadd.f32 %v5362_v33, %v5361_v10  ;;  %v5451_v56 = vadd.f32 %v5450_v19, %v5449_v31 }
 0x35c   : > { %v3796_v46 = vadd.f32 %v9118_v60, %v9247_v17  ;;  %v3807_v19 = vadd.f32 %v9138_v54, %v9247_v17 }
 0x35d   : > { %v9357_v36 = vadd.f32 %v5363_v4, %v3791_v22  ;;  %v9360_v38 = vadd.f32 %v5451_v56, %v9290_v49 }
 0x360   : > { %5823 = vmatmul.mubr.bf16.gmra.mrb[4].mxu1 %v6284_v52  ;;  %v5364_v29 = vpop.f32.mrb[204].mxu0  ;;  %v5452_v39 = vpop.f32.mrb[188].mxu1 }
 0x361   : > { %5826 = vmatprep.mubr.bf16.mxu1 %v6285_v34  ;;  %v5365_v61 = vpop.f32.mrb[205].mxu0  ;;  %v5453_v2 = vpop.f32.mrb[189].mxu1 }
 0x362   : > { %v5366_v27 = vadd.f32 %v5365_v61, %v5364_v29  ;;  %v5454_v44 = vadd.f32 %v5453_v2, %v5452_v39  ;;  %v5367_v18 = vpop.f32.mrb[206].mxu0  ;;  %v5455_v14 = vpop.f32.mrb[190].mxu1  ;;  %v6288_v39 = vld [vmem:[%s6843_s17 + $0x78] sm:$0xff]   ;;  %s6459_s17 = scalar_lea.vmem %s9720_s9, 4096 }
 0x363   : > { %v5368_v49 = vpop.f32.mrb[207].mxu0  ;;  %v5456_v21 = vpop.f32.mrb[191].mxu1  ;;  %p6460_p7 = scmp.ne.s32.totalorder %s9720_s9, %s6459_s17  ;;  %p6467_p0 = scmp.lt.s32.totalorder %s6465_s22, %s6459_s17 }
 0x364   : > { %v9367_v8 = vadd.f32 %v5366_v27, %v3796_v46  ;;  %v9370_v13 = vadd.f32 %v5454_v44, %v9300_v43  ;;  %v5369_v32 = vadd.f32 %v5368_v49, %v5367_v18  ;;  %v5457_v20 = vadd.f32 %v5456_v21, %v5455_v14 }
 0x365   : > { %v3804_v43 = vadd.f32 %v9134_v15, %v9247_v17  ;;  %v3812_v44 = vadd.f32 %v9148_v6, %v9247_v17  ;;  %v3815_v49 = vadd.f32 %v9152_v24, %v9247_v17  ;;  %v3820_v24 = vadd.f32 %v9162_v9, %v9247_v17  ;;  %p6461_p12 = pnand %p6460_p7, %p10637_p4  ;;  %p6468_p2 = por %p6467_p0, %p6466_p13 }
 0x366   : > { %v9373_v60 = vadd.f32 %v5369_v32, %v3799_v5  ;;  %v9376_v28 = vadd.f32 %v5457_v20, %v9306_v16 }
 0x367   : > { %p6462_p1 = pneg %p6461_p12 }
 0x368   : > { %5827 = vmatmul.mubr.bf16.gmra.mrb[8].mxu1 %v6286_v53 }
 0x369   : > { %5830 = vmatprep.mubr.bf16.mxu1 %v6287_v50  ;;  %v5370_v59 = vpop.f32.mrb[208].mxu0  ;;  %v5458_v11 = vpop.f32.mrb[192].mxu1  ;;  %p6469_p8 = pnand %p6468_p2, %p6462_p1 }
 0x36a   : > { %v5371_v51 = vpop.f32.mrb[209].mxu0  ;;  %v5459_v1 = vpop.f32.mrb[193].mxu1 }
 0x36b   : > { %v5372_v10 = vadd.f32 %v5371_v51, %v5370_v59  ;;  %v5460_v31 = vadd.f32 %v5459_v1, %v5458_v11  ;;  %v5373_v22 = vpop.f32.mrb[210].mxu0  ;;  %v5461_v33 = vpop.f32.mrb[194].mxu1 }
 0x36c   : > { %v5374_v4 = vpop.f32.mrb[211].mxu0  ;;  %v5462_v16 = vpop.f32.mrb[195].mxu1 }
 0x36d   : > { %v9383_v56 = vadd.f32 %v5372_v10, %v3804_v43  ;;  %v9386_v52 = vadd.f32 %v5460_v31, %v9316_v48  ;;  %v5375_v34 = vadd.f32 %v5374_v4, %v5373_v22  ;;  %v5463_v29 = vadd.f32 %v5462_v16, %v5461_v33 }
 0x36f   : > { %v9389_v61 = vadd.f32 %v5375_v34, %v3807_v19  ;;  %v9392_v15 = vadd.f32 %v5463_v29, %v9325_v41 }
 0x370   : > { %5831 = vmatmul.mubr.bf16.gmra.mrb[12].mxu1 %v6288_v39 }
 0x372   : > { %v5376_v2 = vpop.f32.mrb[212].mxu0  ;;  %v5464_v46 = vpop.f32.mrb[196].mxu1 }
 0x373   : > { %v5377_v27 = vpop.f32.mrb[213].mxu0  ;;  %v5465_v54 = vpop.f32.mrb[197].mxu1 }
 0x374   : > { %v5378_v18 = vadd.f32 %v5377_v27, %v5376_v2  ;;  %v5466_v14 = vadd.f32 %v5465_v54, %v5464_v46  ;;  %v5379_v48 = vpop.f32.mrb[214].mxu0  ;;  %v5467_v5 = vpop.f32.mrb[198].mxu1 }
 0x375   : > { %v5380_v21 = vpop.f32.mrb[215].mxu0  ;;  %v5468_v32 = vpop.f32.mrb[199].mxu1 }
 0x376   : > { %v9398_v20 = vadd.f32 %v5378_v18, %v3812_v44  ;;  %v9401_v41 = vadd.f32 %v5466_v14, %v9335_v57  ;;  %v5381_v53 = vadd.f32 %v5380_v21, %v5379_v48  ;;  %v5469_v50 = vadd.f32 %v5468_v32, %v5467_v5 }
 0x377   : > { %v3823_v57 = vadd.f32 %v9166_v0, %v9247_v17  ;;  %v3828_v0 = vadd.f32 %v9176_v7, %v9247_v17 }
 0x378   : > { %v9403_v59 = vadd.f32 %v5381_v53, %v3815_v49  ;;  %v9406_v6 = vadd.f32 %v5469_v50, %v9341_v55 }
 0x37b   : > { %v5470_v51 = vpop.f32.mrb[200].mxu1 }
 0x37c   : > { %v5382_v11 = vpop.f32.mrb[216].mxu0  ;;  %v5471_v43 = vpop.f32.mrb[201].mxu1 }
 0x37d   : > { %v5383_v1 = vpop.f32.mrb[217].mxu0  ;;  %v5472_v31 = vadd.f32 %v5471_v43, %v5470_v51  ;;  %v5473_v33 = vpop.f32.mrb[202].mxu1 }
 0x37e   : > { %v5384_v10 = vadd.f32 %v5383_v1, %v5382_v11  ;;  %v5385_v22 = vpop.f32.mrb[218].mxu0  ;;  %v5474_v4 = vpop.f32.mrb[203].mxu1 }
 0x37f   : > { %v5386_v19 = vpop.f32.mrb[219].mxu0  ;;  %v9415_v55 = vadd.f32 %v5472_v31, %v9351_v3  ;;  %v5475_v29 = vadd.f32 %v5474_v4, %v5473_v33  ;;  %v3831_v3 = vadd.f32 %v9180_v42, %v9247_v17  ;;  %v3836_v42 = vadd.f32 %v9190_v63, %v9247_v17 }
 0x380   : > { %v9412_v16 = vadd.f32 %v5384_v10, %v3820_v24  ;;  %v5387_v34 = vadd.f32 %v5386_v19, %v5385_v22 }
 0x381   : > { %v9420_v9 = vadd.f32 %v5475_v29, %v9357_v36 }
 0x382   : > { %v9417_v39 = vadd.f32 %v5387_v34, %v3823_v57 }
 0x383   : > { %v5476_v46 = vpop.f32.mrb[204].mxu1 }
 0x384   : > { %v5388_v2 = vpop.f32.mrb[220].mxu0  ;;  %v5477_v54 = vpop.f32.mrb[205].mxu1 }
 0x385   : > { %v5389_v27 = vpop.f32.mrb[221].mxu0  ;;  %v5478_v18 = vadd.f32 %v5477_v54, %v5476_v46  ;;  %v5479_v48 = vpop.f32.mrb[206].mxu1 }
 0x386   : > { %v5390_v44 = vadd.f32 %v5389_v27, %v5388_v2  ;;  %v5391_v14 = vpop.f32.mrb[222].mxu0  ;;  %v5480_v49 = vpop.f32.mrb[207].mxu1 }
 0x387   : > { %v5392_v5 = vpop.f32.mrb[223].mxu0  ;;  %v9429_v36 = vadd.f32 %v5478_v18, %v9367_v8  ;;  %v5481_v53 = vadd.f32 %v5480_v49, %v5479_v48  ;;  %v3839_v8 = vadd.f32 %v9194_v12, %v9247_v17  ;;  %v3844_v12 = vadd.f32 %v9204_v45, %v9247_v17 }
 0x388   : > { %v9426_v21 = vadd.f32 %v5390_v44, %v3828_v0  ;;  %v5393_v32 = vadd.f32 %v5392_v5, %v5391_v14 }
 0x389   : > { %v9434_v7 = vadd.f32 %v5481_v53, %v9373_v60 }
 0x38a   : > { %v9431_v50 = vadd.f32 %v5393_v32, %v3831_v3 }
 0x38b   : > { %v5482_v51 = vpop.f32.mrb[208].mxu1 }
 0x38c   : > { %v5394_v11 = vpop.f32.mrb[224].mxu0  ;;  %v5483_v43 = vpop.f32.mrb[209].mxu1 }
 0x38d   : > { %v5395_v1 = vpop.f32.mrb[225].mxu0  ;;  %v5484_v10 = vadd.f32 %v5483_v43, %v5482_v51  ;;  %v5485_v22 = vpop.f32.mrb[210].mxu1 }
 0x38e   : > { %v5396_v24 = vadd.f32 %v5395_v1, %v5394_v11  ;;  %v5397_v31 = vpop.f32.mrb[226].mxu0  ;;  %v5486_v57 = vpop.f32.mrb[211].mxu1 }
 0x38f   : > { %v5398_v33 = vpop.f32.mrb[227].mxu0  ;;  %v9443_v60 = vadd.f32 %v5484_v10, %v9383_v56  ;;  %v5487_v34 = vadd.f32 %v5486_v57, %v5485_v22  ;;  %v3847_v56 = vadd.f32 %v9208_v40, %v9247_v17  ;;  %v3852_v40 = vadd.f32 %v9218_v25, %v9247_v17 }
 0x390   : > { %v9440_v19 = vadd.f32 %v5396_v24, %v3836_v42  ;;  %v5399_v4 = vadd.f32 %v5398_v33, %v5397_v31 }
 0x391   : > { %v9448_v63 = vadd.f32 %v5487_v34, %v9389_v61 }
 0x392   : > { %v9445_v29 = vadd.f32 %v5399_v4, %v3839_v8 }
 0x393   : > { %v5488_v46 = vpop.f32.mrb[212].mxu1 }
 0x394   : > { %v5400_v2 = vpop.f32.mrb[228].mxu0  ;;  %v5489_v54 = vpop.f32.mrb[213].mxu1 }
 0x395   : > { %v5401_v27 = vpop.f32.mrb[229].mxu0  ;;  %v5490_v44 = vadd.f32 %v5489_v54, %v5488_v46  ;;  %v5491_v14 = vpop.f32.mrb[214].mxu1 }
 0x396   : > { %v5402_v0 = vadd.f32 %v5401_v27, %v5400_v2  ;;  %v5403_v18 = vpop.f32.mrb[230].mxu0  ;;  %v5492_v3 = vpop.f32.mrb[215].mxu1 }
 0x397   : > { %v5404_v48 = vpop.f32.mrb[231].mxu0  ;;  %v9457_v61 = vadd.f32 %v5490_v44, %v9398_v20  ;;  %v5493_v32 = vadd.f32 %v5492_v3, %v5491_v14  ;;  %v3855_v20 = vadd.f32 %v9222_v37, %v9247_v17  ;;  %v3860_v37 = vadd.f32 %v9232_v62, %v9247_v17 }
 0x398   : > { %v9454_v5 = vadd.f32 %v5402_v0, %v3844_v12  ;;  %v5405_v49 = vadd.f32 %v5404_v48, %v5403_v18 }
 0x399   : > { %v9462_v45 = vadd.f32 %v5493_v32, %v9403_v59 }
 0x39a   : > { %v9459_v53 = vadd.f32 %v5405_v49, %v3847_v56 }
 0x39b   : > { %v5494_v51 = vpop.f32.mrb[216].mxu1 }
 0x39c   : > { %v5406_v11 = vpop.f32.mrb[232].mxu0  ;;  %v5495_v43 = vpop.f32.mrb[217].mxu1 }
 0x39d   : > { %v5407_v1 = vpop.f32.mrb[233].mxu0  ;;  %v5496_v24 = vadd.f32 %v5495_v43, %v5494_v51  ;;  %v5497_v31 = vpop.f32.mrb[218].mxu1 }
 0x39e   : > { %v5408_v42 = vadd.f32 %v5407_v1, %v5406_v11  ;;  %v5409_v10 = vpop.f32.mrb[234].mxu0  ;;  %v5498_v8 = vpop.f32.mrb[219].mxu1 }
 0x39f   : > { %v5410_v22 = vpop.f32.mrb[235].mxu0  ;;  %v9471_v59 = vadd.f32 %v5496_v24, %v9412_v16  ;;  %v5499_v4 = vadd.f32 %v5498_v8, %v5497_v31  ;;  %v3863_v16 = vadd.f32 %v9236_v26, %v9247_v17 }
 0x3a0   : > { %v9468_v33 = vadd.f32 %v5408_v42, %v3852_v40  ;;  %v5411_v57 = vadd.f32 %v5410_v22, %v5409_v10 }
 0x3a1   : > { %v9476_v25 = vadd.f32 %v5499_v4, %v9417_v39 }
 0x3a2   : > { %v9473_v34 = vadd.f32 %v5411_v57, %v3855_v20 }
 0x3a3   : > { %v5500_v46 = vpop.f32.mrb[220].mxu1 }
 0x3a4   : > { %v5412_v2 = vpop.f32.mrb[236].mxu0  ;;  %v5501_v54 = vpop.f32.mrb[221].mxu1 }
 0x3a5   : > { %v5413_v27 = vpop.f32.mrb[237].mxu0  ;;  %v5502_v0 = vadd.f32 %v5501_v54, %v5500_v46  ;;  %v5503_v18 = vpop.f32.mrb[222].mxu1 }
 0x3a6   : > { %v5414_v12 = vadd.f32 %v5413_v27, %v5412_v2  ;;  %v5415_v44 = vpop.f32.mrb[238].mxu0  ;;  %v5504_v56 = vpop.f32.mrb[223].mxu1 }
 0x3a7   : > { %v5416_v14 = vpop.f32.mrb[239].mxu0  ;;  %v9485_v39 = vadd.f32 %v5502_v0, %v9426_v21  ;;  %v5505_v49 = vadd.f32 %v5504_v56, %v5503_v18 }
 0x3a8   : > { %v9482_v48 = vadd.f32 %v5414_v12, %v3860_v37  ;;  %v5417_v3 = vadd.f32 %v5416_v14, %v5415_v44 }
 0x3a9   : > { %v9490_v62 = vadd.f32 %v5505_v49, %v9431_v50 }
 0x3aa   : > { %v9487_v32 = vadd.f32 %v5417_v3, %v3863_v16 }
 0x3ab   : > { %v5506_v11 = vpop.f32.mrb[224].mxu1 }
 0x3ac   : > { %v5546_v51 = vpop.f32.mrb[240].mxu0  ;;  %v5507_v1 = vpop.f32.mrb[225].mxu1 }
 0x3ad   : > { %v5547_v43 = vpop.f32.mrb[241].mxu0  ;;  %v5508_v40 = vadd.f32 %v5507_v1, %v5506_v11  ;;  %v5509_v17 = vpop.f32.mrb[226].mxu1 }
 0x3ae   : > { %v5548_v26 = vadd.f32 %v5547_v43, %v5546_v51  ;;  %v5549_v42 = vpop.f32.mrb[242].mxu0  ;;  %v5510_v24 = vpop.f32.mrb[227].mxu1 }
 0x3af   : > { %v5550_v10 = vpop.f32.mrb[243].mxu0  ;;  %v9493_v21 = vadd.f32 %v5508_v40, %v9440_v19  ;;  %v5511_v31 = vadd.f32 %v5510_v24, %v5509_v17 }
 0x3b0   : > { %v5551_v20 = vadd.f32 %v5550_v10, %v5549_v42  ;;  %v9496_v22 = vadd.f32 %v5548_v26, %v9319_v30 }
 0x3b1   : > { %v9499_v50 = vadd.f32 %v5511_v31, %v9445_v29 }
 0x3b2   : > { %v9502_v8 = vadd.f32 %v5551_v20, %v9328_v23 }
 0x3b3   : > { %v5512_v57 = vpop.f32.mrb[228].mxu1 }
 0x3b4   : > { %v5552_v4 = vpop.f32.mrb[244].mxu0  ;;  %v5513_v2 = vpop.f32.mrb[229].mxu1 }
 0x3b5   : > { %v5553_v46 = vpop.f32.mrb[245].mxu0  ;;  %v5514_v27 = vadd.f32 %v5513_v2, %v5512_v57  ;;  %v5515_v37 = vpop.f32.mrb[230].mxu1 }
 0x3b6   : > { %v5554_v54 = vadd.f32 %v5553_v46, %v5552_v4  ;;  %v5555_v19 = vpop.f32.mrb[246].mxu0  ;;  %v5516_v12 = vpop.f32.mrb[231].mxu1 }
 0x3b7   : > { %v5556_v0 = vpop.f32.mrb[247].mxu0  ;;  %v9505_v44 = vadd.f32 %v5514_v27, %v9454_v5  ;;  %v5517_v30 = vadd.f32 %v5516_v12, %v5515_v37 }
 0x3b8   : > { %v5557_v18 = vadd.f32 %v5556_v0, %v5555_v19  ;;  %v9508_v29 = vadd.f32 %v5554_v54, %v9338_v47 }
 0x3b9   : > { %v9511_v23 = vadd.f32 %v5517_v30, %v9459_v53 }
 0x3ba   : > { %v9514_v16 = vadd.f32 %v5557_v18, %v9344_v35 }
 0x3bb   : > { %v5518_v14 = vpop.f32.mrb[232].mxu1 }
 0x3bc   : > { %v5558_v56 = vpop.f32.mrb[248].mxu0  ;;  %v5519_v3 = vpop.f32.mrb[233].mxu1 }
 0x3bd   : > { %v5559_v49 = vpop.f32.mrb[249].mxu0  ;;  %v5520_v11 = vadd.f32 %v5519_v3, %v5518_v14  ;;  %v5521_v1 = vpop.f32.mrb[234].mxu1 }
 0x3be   : > { %v5560_v51 = vadd.f32 %v5559_v49, %v5558_v56  ;;  %v5561_v5 = vpop.f32.mrb[250].mxu0  ;;  %v5522_v43 = vpop.f32.mrb[235].mxu1 }
 0x3bf   : > { %v5562_v40 = vpop.f32.mrb[251].mxu0  ;;  %v9517_v26 = vadd.f32 %v5520_v11, %v9468_v33  ;;  %v5523_v53 = vadd.f32 %v5522_v43, %v5521_v1 }
 0x3c0   : > { %v9520_v47 = vadd.f32 %v5560_v51, %v9354_v58  ;;  %v5563_v17 = vadd.f32 %v5562_v40, %v5561_v5 }
 0x3c1   : > { %v9523_v35 = vadd.f32 %v5523_v53, %v9473_v34 }
 0x3c2   : > { %v9526_v42 = vadd.f32 %v5563_v17, %v9360_v38 }
 0x3c3   : > { %v5524_v24 = vpop.f32.mrb[236].mxu1 }
 0x3c4   : > { %v5564_v10 = vpop.f32.mrb[252].mxu0  ;;  %v5525_v31 = vpop.f32.mrb[237].mxu1 }
 0x3c5   : > { %v5565_v20 = vpop.f32.mrb[253].mxu0  ;;  %v5526_v57 = vadd.f32 %v5525_v31, %v5524_v24  ;;  %v5527_v2 = vpop.f32.mrb[238].mxu1 }
 0x3c6   : > { %v5566_v4 = vadd.f32 %v5565_v20, %v5564_v10  ;;  %v5567_v33 = vpop.f32.mrb[254].mxu0  ;;  %v5528_v46 = vpop.f32.mrb[239].mxu1 }
 0x3c7   : > { %v5568_v27 = vpop.f32.mrb[255].mxu0  ;;  %v9529_v58 = vadd.f32 %v5526_v57, %v9482_v48  ;;  %v5529_v34 = vadd.f32 %v5528_v46, %v5527_v2 }
 0x3c8   : > { %v9532_v54 = vadd.f32 %v5566_v4, %v9370_v13  ;;  %v5569_v37 = vadd.f32 %v5568_v27, %v5567_v33 }
 0x3c9   : > { %v9535_v38 = vadd.f32 %v5529_v34, %v9487_v32 }
 0x3ca   : > { %v9538_v19 = vadd.f32 %v5569_v37, %v9376_v28 }
 0x3cc   : > { %v5570_v12 = vpop.f32.mrb[0].mxu0 }
 0x3cd   : > { %v5571_v0 = vpop.f32.mrb[1].mxu0 }
 0x3ce   : > { %v5572_v30 = vadd.f32 %v5571_v0, %v5570_v12  ;;  %v5573_v18 = vpop.f32.mrb[2].mxu0 }
 0x3cf   : > { %v5574_v14 = vpop.f32.mrb[3].mxu0 }
 0x3d0   : > { %v9541_v56 = vadd.f32 %v5572_v30, %v9386_v52  ;;  %v5575_v48 = vadd.f32 %v5574_v14, %v5573_v18 }
 0x3d2   : > { %v9544_v13 = vadd.f32 %v5575_v48, %v9392_v15 }
 0x3d4   : > { %v5576_v3 = vpop.f32.mrb[4].mxu0 }
 0x3d5   : > { %v5577_v49 = vpop.f32.mrb[5].mxu0 }
 0x3d6   : > { %v5578_v11 = vadd.f32 %v5577_v49, %v5576_v3  ;;  %v5579_v32 = vpop.f32.mrb[6].mxu0 }
 0x3d7   : > { %v5580_v51 = vpop.f32.mrb[7].mxu0 }
 0x3d8   : > { %v9547_v28 = vadd.f32 %v5578_v11, %v9401_v41  ;;  %v5581_v1 = vadd.f32 %v5580_v51, %v5579_v32 }
 0x3da   : > { %v9550_v5 = vadd.f32 %v5581_v1, %v9406_v6 }
 0x3dc   : > { %v5582_v43 = vpop.f32.mrb[8].mxu0 }
 0x3dd   : > { %v5583_v40 = vpop.f32.mrb[9].mxu0 }
 0x3de   : > { %v5584_v52 = vadd.f32 %v5583_v40, %v5582_v43  ;;  %v5585_v53 = vpop.f32.mrb[10].mxu0 }
 0x3df   : > { %v5586_v17 = vpop.f32.mrb[11].mxu0 }
 0x3e0   : > { %v9553_v15 = vadd.f32 %v5584_v52, %v9415_v55  ;;  %v5587_v24 = vadd.f32 %v5586_v17, %v5585_v53 }
 0x3e2   : > { %v9556_v10 = vadd.f32 %v5587_v24, %v9420_v9 }
 0x3e4   : > { %v5588_v31 = vpop.f32.mrb[12].mxu0 }
 0x3e5   : > { %v5589_v20 = vpop.f32.mrb[13].mxu0 }
 0x3e6   : > { %v5590_v41 = vadd.f32 %v5589_v20, %v5588_v31  ;;  %v5591_v57 = vpop.f32.mrb[14].mxu0 }
 0x3e7   : > { %v5592_v4 = vpop.f32.mrb[15].mxu0 }
 0x3e8   : > { %v9559_v6 = vadd.f32 %v5590_v41, %v9429_v36  ;;  %v5593_v2 = vadd.f32 %v5592_v4, %v5591_v57 }
 0x3ea   : > { %v9562_v33 = vadd.f32 %v5593_v2, %v9434_v7 }
 0x3ec   : > { %v5594_v46 = vpop.f32.mrb[16].mxu0 }
 0x3ed   : > { %v5595_v27 = vpop.f32.mrb[17].mxu0 }
 0x3ee   : > { %v5596_v55 = vadd.f32 %v5595_v27, %v5594_v46  ;;  %v5597_v34 = vpop.f32.mrb[18].mxu0 }
 0x3ef   : > { %v5598_v37 = vpop.f32.mrb[19].mxu0 }
 0x3f0   : > { %v9565_v9 = vadd.f32 %v5596_v55, %v9443_v60  ;;  %v5599_v12 = vadd.f32 %v5598_v37, %v5597_v34 }
 0x3f2   : > { %v9568_v0 = vadd.f32 %v5599_v12, %v9448_v63 }
 0x3f4   : > { %v5600_v30 = vpop.f32.mrb[20].mxu0 }
 0x3f5   : > { %v5601_v18 = vpop.f32.mrb[21].mxu0 }
 0x3f6   : > { %v5602_v36 = vadd.f32 %v5601_v18, %v5600_v30  ;;  %v5603_v14 = vpop.f32.mrb[22].mxu0 }
 0x3f7   : > { %v5604_v48 = vpop.f32.mrb[23].mxu0 }
 0x3f8   : > { %v9571_v7 = vadd.f32 %v5602_v36, %v9457_v61  ;;  %v5605_v3 = vadd.f32 %v5604_v48, %v5603_v14 }
 0x3fa   : > { %v9574_v49 = vadd.f32 %v5605_v3, %v9462_v45 }
 0x3fc   : > { %v5606_v11 = vpop.f32.mrb[24].mxu0 }
 0x3fd   : > { %v5607_v32 = vpop.f32.mrb[25].mxu0 }
 0x3fe   : > { %v5608_v60 = vadd.f32 %v5607_v32, %v5606_v11  ;;  %v5609_v51 = vpop.f32.mrb[26].mxu0 }
 0x3ff   : > { %v5610_v1 = vpop.f32.mrb[27].mxu0 }
 0x400   : > { %v9577_v63 = vadd.f32 %v5608_v60, %v9471_v59  ;;  %v5611_v43 = vadd.f32 %v5610_v1, %v5609_v51  ;;  %v9591_v59 = vld [vmem:[%s9774_s7] ss:$0 sm:$0xff] }
 0x401   : > { %v5856_v34 = vadd.f32 %v9591_v59, %v9502_v8 }
 0x402   : > { %v9580_v40 = vadd.f32 %v5611_v43, %v9476_v25 }
 0x404   : > { %v5612_v52 = vpop.f32.mrb[28].mxu0 }
 0x405   : > { %v5613_v61 = vpop.f32.mrb[29].mxu0 }
 0x406   : > { %v5614_v53 = vadd.f32 %v5613_v61, %v5612_v52  ;;  %v5615_v17 = vpop.f32.mrb[30].mxu0  ;;  %v5862_v52 = vadd.f32 %v9591_v59, %v9538_v19 }
 0x407   : > { %v5616_v24 = vpop.f32.mrb[31].mxu0 }
 0x408   : > { %v9583_v45 = vadd.f32 %v5614_v53, %v9485_v39  ;;  %v5617_v31 = vadd.f32 %v5616_v24, %v5615_v17  ;;  %v5854_v39 = vadd.f32 %v9591_v59, %v9514_v16  ;;  %v5864_v24 = vadd.f32 %v9591_v59, %v9526_v42 }
 0x409   : > { %v5866_v42 = vadd.f32 %v9591_v59, %v9547_v28  ;;  %v5872_v28 = vadd.f32 %v9591_v59, %v9544_v13  ;;  %v5874_v13 = vadd.f32 %v9591_v59, %v9559_v6  ;;  %v5880_v6 = vadd.f32 %v9591_v59, %v9556_v10 }
 0x40a   : > { %v9586_v20 = vadd.f32 %v5617_v31, %v9490_v62  ;;  %v5882_v10 = vadd.f32 %v9591_v59, %v9571_v7 }
 0x40b   : > { %v5804_v25 = vpop.f32.mrb[240].mxu1 }
 0x40c   : > { %v5618_v41 = vpop.f32.mrb[32].mxu0  ;;  %v5850_v57 = vadd.f32 %v5804_v25, %v9508_v29  ;;  %v4615_v2 = vpop.f32.mrb[241].mxu1 }
 0x40d   : > { %v5619_v4 = vpop.f32.mrb[33].mxu0  ;;  %v5852_v27 = vadd.f32 %v4615_v2, %v9496_v22  ;;  %v5805_v55 = vpop.f32.mrb[242].mxu1 }
 0x40e   : > { %v5620_v46 = vadd.f32 %v5619_v4, %v5618_v41  ;;  %v5621_v62 = vpop.f32.mrb[34].mxu0  ;;  %v5851_v37 = vadd.f32 %v5850_v57, %v9591_v59  ;;  %v5855_v12 = vadd.f32 %v5854_v39, %v5805_v55  ;;  %v4618_v18 = vpop.f32.mrb[243].mxu1 }
 0x40f   : > { %v5622_v30 = vpop.f32.mrb[35].mxu0  ;;  %v5853_v36 = vadd.f32 %v5852_v27, %v9591_v59  ;;  %v5857_v16 = vadd.f32 %v5856_v34, %v4618_v18 }
 0x410   : > { %v9602_v29 = vadd.f32 %v5620_v46, %v9493_v21  ;;  %v5623_v14 = vadd.f32 %v5622_v30, %v5621_v62  ;;  %v4776_v48 = vmax.f32 %v5851_v37, 0.0  ;;  %v4777_v3 = vmax.f32 %v5855_v12, 0.0 }
 0x411   : > { %v4774_v22 = vmax.f32 %v5853_v36, 0.0  ;;  %v4775_v32 = vmax.f32 %v5857_v16, 0.0  ;;  %v5858_v21 = vadd.f32 %v9591_v59, %v9532_v54  ;;  %v5870_v30 = vadd.f32 %v9591_v59, %v9550_v5 }
 0x412   : > { %v9606_v11 = vadd.f32 %v5623_v14, %v9499_v50  ;;  %4808 = vst [vmem:[%s9608_s15 + $0x10] sm:$0xff] %v4776_v48  ;;  %4809 = vst [vmem:[%s9608_s15 + $0x18] sm:$0xff] %v4777_v3  ;;  %v5860_v50 = vadd.f32 %v9591_v59, %v9520_v47 }
 0x413   : > { %4806 = vst [vmem:[%s9608_s15] sm:$0xff] %v4774_v22  ;;  %4807 = vst [vmem:[%s9608_s15 + $0x8] sm:$0xff] %v4775_v32  ;;  %v5808_v60 = vpop.f32.mrb[244].mxu1 }
 0x414   : > { %v5624_v8 = vpop.f32.mrb[36].mxu0  ;;  %v5859_v51 = vadd.f32 %v5858_v21, %v5808_v60  ;;  %v4631_v43 = vpop.f32.mrb[245].mxu1 }
 0x415   : > { %v5625_v1 = vpop.f32.mrb[37].mxu0  ;;  %v5861_v53 = vadd.f32 %v5860_v50, %v4631_v43  ;;  %v5809_v54 = vpop.f32.mrb[246].mxu1 }
 0x416   : > { %v5626_v61 = vadd.f32 %v5625_v1, %v5624_v8  ;;  %v5627_v17 = vpop.f32.mrb[38].mxu0  ;;  %v4780_v31 = vmax.f32 %v5859_v51, 0.0  ;;  %v5863_v41 = vadd.f32 %v5862_v52, %v5809_v54  ;;  %v4634_v25 = vpop.f32.mrb[247].mxu1 }
 0x417   : > { %v5628_v47 = vpop.f32.mrb[39].mxu0  ;;  %v4778_v4 = vmax.f32 %v5861_v53, 0.0  ;;  %v5865_v19 = vadd.f32 %v5864_v24, %v4634_v25  ;;  %v5878_v53 = vadd.f32 %v9591_v59, %v9562_v33 }
 0x418   : > { %v9623_v57 = vadd.f32 %v5626_v61, %v9505_v44  ;;  %v5629_v2 = vadd.f32 %v5628_v47, %v5627_v17  ;;  %4812 = vst [vmem:[%s9608_s15 + $0x30] sm:$0xff] %v4780_v31  ;;  %v4781_v39 = vmax.f32 %v5863_v41, 0.0  ;;  %v5868_v44 = vadd.f32 %v9591_v59, %v9541_v56 }
 0x419   : > { %4810 = vst [vmem:[%s9608_s15 + $0x20] sm:$0xff] %v4778_v4  ;;  %v4779_v27 = vmax.f32 %v5865_v19, 0.0 }
 0x41a   : > { %v9628_v46 = vadd.f32 %v5629_v2, %v9511_v23  ;;  %4813 = vst [vmem:[%s9608_s15 + $0x38] sm:$0xff] %v4781_v39 }
 0x41b   : > { %4811 = vst [vmem:[%s9608_s15 + $0x28] sm:$0xff] %v4779_v27  ;;  %v5812_v55 = vpop.f32.mrb[248].mxu1 }
 0x41c   : > { %v5630_v62 = vpop.f32.mrb[40].mxu0  ;;  %v5867_v34 = vadd.f32 %v5866_v42, %v5812_v55  ;;  %v4647_v12 = vpop.f32.mrb[249].mxu1 }
 0x41d   : > { %v5631_v37 = vpop.f32.mrb[41].mxu0  ;;  %v5869_v18 = vadd.f32 %v5868_v44, %v4647_v12  ;;  %v5813_v14 = vpop.f32.mrb[250].mxu1 }
 0x41e   : > { %v5632_v23 = vadd.f32 %v5631_v37, %v5630_v62  ;;  %v5633_v36 = vpop.f32.mrb[42].mxu0  ;;  %v4784_v16 = vmax.f32 %v5867_v34, 0.0  ;;  %v5871_v48 = vadd.f32 %v5870_v30, %v5813_v14  ;;  %v4650_v3 = vpop.f32.mrb[251].mxu1  ;;  %v5888_v37 = vadd.f32 %v9591_v59, %v9568_v0 }
 0x41f   : > { %v5634_v56 = vpop.f32.mrb[43].mxu0  ;;  %v4782_v32 = vmax.f32 %v5869_v18, 0.0  ;;  %v5873_v5 = vadd.f32 %v5872_v28, %v4650_v3  ;;  %v5890_v14 = vadd.f32 %v9591_v59, %v9583_v45  ;;  %v5892_v0 = vadd.f32 %v9591_v59, %v9577_v63 }
 0x420   : > { %v9641_v22 = vadd.f32 %v5632_v23, %v9517_v26  ;;  %v5635_v21 = vadd.f32 %v5634_v56, %v5633_v36  ;;  %4816 = vst [vmem:[%s9608_s15 + $0x50] sm:$0xff] %v4784_v16  ;;  %v4785_v8 = vmax.f32 %v5871_v48, 0.0  ;;  %v5876_v26 = vadd.f32 %v9591_v59, %v9553_v15 }
 0x421   : > { %4814 = vst [vmem:[%s9608_s15 + $0x40] sm:$0xff] %v4782_v32  ;;  %v4783_v50 = vmax.f32 %v5873_v5, 0.0  ;;  %v5894_v48 = vadd.f32 %v9591_v59, %v9586_v20  ;;  %v5896_v32 = vadd.f32 %v9591_v59, %v9580_v40  ;;  %v5900_v40 = vadd.f32 %v9591_v59, %v9602_v29 }
 0x422   : > { %v9646_v60 = vadd.f32 %v5635_v21, %v9523_v35  ;;  %4817 = vst [vmem:[%s9608_s15 + $0x58] sm:$0xff] %v4785_v8 }
 0x423   : > { %4815 = vst [vmem:[%s9608_s15 + $0x48] sm:$0xff] %v4783_v50  ;;  %v5816_v1 = vpop.f32.mrb[252].mxu1 }
 0x424   : > { %v5636_v51 = vpop.f32.mrb[44].mxu0  ;;  %v5875_v43 = vadd.f32 %v5874_v13, %v5816_v1  ;;  %v4663_v61 = vpop.f32.mrb[253].mxu1 }
 0x425   : > { %v5637_v52 = vpop.f32.mrb[45].mxu0  ;;  %v5877_v17 = vadd.f32 %v5876_v26, %v4663_v61  ;;  %v5817_v24 = vpop.f32.mrb[254].mxu1 }
 0x426   : > { %v5638_v35 = vadd.f32 %v5637_v52, %v5636_v51  ;;  %v5639_v54 = vpop.f32.mrb[46].mxu0  ;;  %v4788_v31 = vmax.f32 %v5875_v43, 0.0  ;;  %v5879_v41 = vadd.f32 %v5878_v53, %v5817_v24  ;;  %v4666_v47 = vpop.f32.mrb[255].mxu1  ;;  %v5898_v51 = vadd.f32 %v9591_v59, %v9623_v57 }
 0x427   : > { %v5640_v15 = vpop.f32.mrb[47].mxu0  ;;  %v4786_v4 = vmax.f32 %v5877_v17, 0.0  ;;  %v5881_v33 = vadd.f32 %v5880_v6, %v4666_v47  ;;  %v5902_v43 = vadd.f32 %v9591_v59, %v9628_v46  ;;  %v5904_v53 = vadd.f32 %v9591_v59, %v9606_v11 }
 0x428   : > { %v9659_v25 = vadd.f32 %v5638_v35, %v9529_v58  ;;  %v5641_v2 = vadd.f32 %v5640_v15, %v5639_v54  ;;  %4820 = vst [vmem:[%s9608_s15 + $0x70] sm:$0xff] %v4788_v31  ;;  %v4789_v19 = vmax.f32 %v5879_v41, 0.0  ;;  %v5884_v58 = vadd.f32 %v9591_v59, %v9565_v9 }
 0x429   : > { %4818 = vst [vmem:[%s9608_s15 + $0x60] sm:$0xff] %v4786_v4  ;;  %v4787_v27 = vmax.f32 %v5881_v33, 0.0  ;;  %v5908_v11 = vadd.f32 %v9591_v59, %v9641_v22  ;;  %v5912_v33 = vadd.f32 %v9591_v59, %v9646_v60 }
 0x42a   : > { %v9664_v39 = vadd.f32 %v5641_v2, %v9535_v38  ;;  %4821 = vst [vmem:[%s9608_s15 + $0x78] sm:$0xff] %v4789_v19  ;;  %v5886_v38 = vadd.f32 %v9591_v59, %v9574_v49  ;;  %v5906_v46 = vadd.f32 %v9591_v59, %v9659_v25 }
 0x42b   : > { %4819 = vst [vmem:[%s9608_s15 + $0x68] sm:$0xff] %v4787_v27  ;;  %v5820_v42 = vpop.f32.mrb[0].mxu1 }
 0x42c   : > { %v5883_v62 = vadd.f32 %v5882_v10, %v5820_v42  ;;  %v4679_v55 = vpop.f32.mrb[1].mxu1  ;;  %v5910_v47 = vadd.f32 %v9591_v59, %v9664_v39 }
 0x42d   : > { %v5885_v44 = vadd.f32 %v5884_v58, %v4679_v55  ;;  %v5821_v34 = vpop.f32.mrb[2].mxu1 }
 0x42e   : > { %v4792_v12 = vmax.f32 %v5883_v62, 0.0  ;;  %v5887_v7 = vadd.f32 %v5886_v38, %v5821_v34  ;;  %v4682_v30 = vpop.f32.mrb[3].mxu1 }
 0x42f   : > { %v4790_v23 = vmax.f32 %v5885_v44, 0.0  ;;  %v5889_v18 = vadd.f32 %v5888_v37, %v4682_v30 }
 0x430   : > { %4824 = vst [vmem:[%s9608_s15 + $0x90] sm:$0xff] %v4792_v12  ;;  %v4793_v36 = vmax.f32 %v5887_v7, 0.0 }
 0x431   : > { %4822 = vst [vmem:[%s9608_s15 + $0x80] sm:$0xff] %v4790_v23  ;;  %v4791_v9 = vmax.f32 %v5889_v18, 0.0 }
 0x432   : > { %4825 = vst [vmem:[%s9608_s15 + $0x98] sm:$0xff] %v4793_v36 }
 0x433   : > { %4823 = vst [vmem:[%s9608_s15 + $0x88] sm:$0xff] %v4791_v9  ;;  %v5824_v49 = vpop.f32.mrb[4].mxu1 }
 0x434   : > { %v5891_v28 = vadd.f32 %v5890_v14, %v5824_v49  ;;  %v4695_v16 = vpop.f32.mrb[5].mxu1 }
 0x435   : > { %v5893_v56 = vadd.f32 %v5892_v0, %v4695_v16  ;;  %v5825_v3 = vpop.f32.mrb[6].mxu1 }
 0x436   : > { %v4796_v21 = vmax.f32 %v5891_v28, 0.0  ;;  %v5895_v45 = vadd.f32 %v5894_v48, %v5825_v3  ;;  %v4698_v5 = vpop.f32.mrb[7].mxu1 }
 0x437   : > { %v4794_v8 = vmax.f32 %v5893_v56, 0.0  ;;  %v5897_v50 = vadd.f32 %v5896_v32, %v4698_v5 }
 0x438   : > { %4828 = vst [vmem:[%s9608_s15 + $0xb0] sm:$0xff] %v4796_v21  ;;  %v4797_v13 = vmax.f32 %v5895_v45, 0.0 }
 0x439   : > { %4826 = vst [vmem:[%s9608_s15 + $0xa0] sm:$0xff] %v4794_v8  ;;  %v4795_v63 = vmax.f32 %v5897_v50, 0.0 }
 0x43a   : > { %4829 = vst [vmem:[%s9608_s15 + $0xb8] sm:$0xff] %v4797_v13 }
 0x43b   : > { %4827 = vst [vmem:[%s9608_s15 + $0xa8] sm:$0xff] %v4795_v63  ;;  %v5828_v20 = vpop.f32.mrb[8].mxu1 }
 0x43c   : > { %v5899_v1 = vadd.f32 %v5898_v51, %v5828_v20  ;;  %v4711_v26 = vpop.f32.mrb[9].mxu1 }
 0x43d   : > { %v5901_v52 = vadd.f32 %v5900_v40, %v4711_v26  ;;  %v5829_v61 = vpop.f32.mrb[10].mxu1 }
 0x43e   : > { %v4800_v35 = vmax.f32 %v5899_v1, 0.0  ;;  %v5903_v57 = vadd.f32 %v5902_v43, %v5829_v61  ;;  %v4714_v17 = vpop.f32.mrb[11].mxu1 }
 0x43f   : > { %v4798_v54 = vmax.f32 %v5901_v52, 0.0  ;;  %v5905_v24 = vadd.f32 %v5904_v53, %v4714_v17 }
 0x440   : > { %4832 = vst [vmem:[%s9608_s15 + $0xd0] sm:$0xff] %v4800_v35  ;;  %v4801_v29 = vmax.f32 %v5903_v57, 0.0 }
 0x441   : > { %4830 = vst [vmem:[%s9608_s15 + $0xc0] sm:$0xff] %v4798_v54  ;;  %v4799_v6 = vmax.f32 %v5905_v24, 0.0 }
 0x442   : > { %4833 = vst [vmem:[%s9608_s15 + $0xd8] sm:$0xff] %v4801_v29 }
 0x443   : > { %4831 = vst [vmem:[%s9608_s15 + $0xc8] sm:$0xff] %v4799_v6  ;;  %v5832_v31 = vpop.f32.mrb[12].mxu1 }
 0x444   : > { %v5907_v41 = vadd.f32 %v5906_v46, %v5832_v31  ;;  %v4727_v15 = vpop.f32.mrb[13].mxu1 }
 0x445   : > { %v5909_v4 = vadd.f32 %v5908_v11, %v4727_v15  ;;  %v5833_v2 = vpop.f32.mrb[14].mxu1 }
 0x446   : > { %v4804_v25 = vmax.f32 %v5907_v41, 0.0  ;;  %v5911_v19 = vadd.f32 %v5910_v47, %v5833_v2  ;;  %v4730_v22 = vpop.f32.mrb[15].mxu1 }
 0x447   : > { %v4802_v27 = vmax.f32 %v5909_v4, 0.0  ;;  %v5913_v10 = vadd.f32 %v5912_v33, %v4730_v22 }
 0x448   : > { %4836 = vst [vmem:[%s9608_s15 + $0xf0] sm:$0xff] %v4804_v25  ;;  %v4805_v42 = vmax.f32 %v5911_v19, 0.0 }
 0x449   : > { %4834 = vst [vmem:[%s9608_s15 + $0xe0] sm:$0xff] %v4802_v27  ;;  %v4803_v59 = vmax.f32 %v5913_v10, 0.0 }
 0x44a   : > { %4837 = vst [vmem:[%s9608_s15 + $0xf8] sm:$0xff] %v4805_v42 }
 0x44b   : > { %4835 = vst [vmem:[%s9608_s15 + $0xe8] sm:$0xff] %v4803_v59 }
 0x44c   : > { %6472 = shalt.err (!%p6469_p8)
}
 0x44d   : > { %s6473_s10 = scalar_lea.hbm %s9718_s26, 4096  ;;  %s6477_s13 = scalar_lea.hbm %s9775_s8, 8192 }
 0x44e   : > { %p6474_p6 = scmp.ne.s32.totalorder %s9718_s26, %s6473_s10  ;;  %p6478_p3 = scmp.lt.u32.totalorder %s9718_s26, %s9775_s8 }
 0x44f   : > { %p6479_p5 = scmp.lt.u32.totalorder %s6477_s13, %s6473_s10  ;;  %p6481_p7 = scmp.lt.u32.totalorder %s6473_s10, %s9718_s26 }
 0x450   : > { %p6475_p10 = pnand %p6474_p6, %p10637_p4 }
 0x451   : > { %p6480_p9 = por %p6479_p5, %p6478_p3 }
 0x452   : > { %p6476_p11 = pneg %p6475_p10 }
 0x453   : > { %p6482_p12 = por %p6481_p7, %p6480_p9 }
 0x455   : > { %p6483_p1 = pnand %p6482_p12, %p6476_p11 }
 0x457   : > { %6486 = shalt.err (!%p6483_p1)
}
 0x458   : > { %s6551_s17 = smov 128   ;;  %s6552_s12 = smov 8  }
 0x459   : > { %5968 = dma.vmem_to_hbm [thread:$0]  (%p10637_p4), %s9720_s9, 4096, %s9718_s26, %s4839_s11, %s6551_s17, %s6551_s17, %s6552_s12  }
 0x45a PF: > { %s4867_s14 = sand.u32 1, %s6525_s27   ;;  %p10638_p13 = scmp.ne.s32.totalorder %s9996_s25, 0 }
 0x45b   : > { %p10639_p0 = scmp.ge.s32.totalorder %s6537_s30, 2  ;;  %s4868_s22 = scalar_lea.sflag [#allocation4], %s4867_s14 }
 0x45d   : > { %p5991_p2 = pnand %p10639_p0, %p10638_p13 }
 0x45f   : > { %6520 = dma.done.wait (!%p5991_p2), %s4868_s22, 4096  }
 0x460   : > { %6522 = vsyncadd (!%p5991_p2), %s4868_s22, 4294963200  ;;  %p24_p8 = scmp.ge.s32.totalorder %s6763_s23, 4   ;;  %s10640_s27 = smov %s6529_s28 }
 0x461   : > { %s10641_s28 = smov %s6533_s29  ;;  %s10642_s29 = smov %s6775_s21 }
 0x462   : > { %s10643_s30 = smov %s6763_s23  ;;  %26 = sbr.rel (!%p24_p8) target bundleno = 8 (0x8), region = 117 }
 0x469   :  { %4873 = vsyncpa [#allocation3], 1 }
 0x46a   :  { %4875 = vsyncpa [#allocation3 + $0x1], 1 }
 0x46b   :  { %4876 = vsyncpa [#allocation6], 1 }
 0x46c   :  { %4877 = vsyncpa [#allocation9], 1 }
 0x46d   :  { %4878 = vsyncpa [#allocation12], 1 }
 0x46e   :  { %4879 = vsyncpa [#allocation4], 1 }
 0x46f   :  { %4881 = vsyncpa [#allocation4 + $0x1], 1 }

</bundles_post_ra>
